<compile_context>
chip_gen: v6e
topology: v6e:2x2x1
jax: 0.10.0
libtpu: 0.0.40
codegen_flags: <defaults>
</compile_context>

<pallas_src>
import math
import jax
import jax.numpy as jnp
from jax.experimental import pallas as pl
from jax.experimental.pallas import tpu as pltpu

# ----- model hyper-parameters (small, consistent with the module) -----
DIM = 32                  # token feature dim
HEADS = 4
DIM_HEAD = 8
INNER = HEADS * DIM_HEAD  # 32
MLP = 64
DEPTH = 2
NBLOCKS = 2 * DEPTH       # one Transformer block per modality per layer
EPS = 1e-5
SCALE = DIM_HEAD ** (-0.5)
SQRT2 = math.sqrt(2.0)
OUT_DIM = 4 * DIM         # 128 -> exactly one lane-dense vreg row


# ---------------------------------------------------------------------
# in-kernel helpers
# ---------------------------------------------------------------------
def _layernorm(x, g, b):
    mu = jnp.mean(x, axis=-1, keepdims=True)
    var = jnp.mean((x - mu) ** 2, axis=-1, keepdims=True)
    return (x - mu) * jax.lax.rsqrt(var + EPS) * g + b


def _gelu_exact(x):
    # PyTorch nn.GELU() default (erf-based, exact), kept in f32.
    return 0.5 * x * (1.0 + jax.lax.erf(x / SQRT2))


# ---------------------------------------------------------------------
# fully fused forward kernel: one grid step == one batch element
# ---------------------------------------------------------------------
def fused_forward_kernel(mri_ref, pet_ref, qo_ref, kv_ref, w1_ref, w2_ref,
                         vec_ref, b1_ref, out_ref):
    mri = mri_ref[0]   # (N_MRI, DIM)
    pet = pet_ref[0]   # (N_PET, DIM)

    def transformer_block(blk, x, ctx):
        """Transformer(dim, depth=1)(x, context=ctx) + x  (outer residual fused in)."""
        vecs = vec_ref[blk]                       # (8, DIM)
        ln1_g, ln1_b = vecs[0:1], vecs[1:2]
        ln2_g, ln2_b = vecs[2:3], vecs[3:4]
        lnf_g, lnf_b = vecs[4:5], vecs[5:6]
        bo, b2 = vecs[6:7], vecs[7:8]
        b1 = b1_ref[blk]                          # (1, MLP)

        wq = qo_ref[2 * blk]                      # (H, Dh, DIM); softmax scale pre-folded
        wo = qo_ref[2 * blk + 1]                  # (H, Dh, DIM): wo[h,d,D] = Wo[h*Dh+d, D]
        wkv = kv_ref[blk]                         # (2H, Dh, DIM): k heads then v heads

        n = x.shape[0]
        m = ctx.shape[0]

        # ---- PreNorm(x) + cross attention (context is NOT normalized, as in PyTorch) ----
        xn = _layernorm(x, ln1_g, ln1_b)
        xb = jnp.broadcast_to(xn, (HEADS, n, DIM))        # head-batched views
        cb = jnp.broadcast_to(ctx, (2 * HEADS, m, DIM))   # k+v heads in one batch

        # scale already folded into wq
        q = jnp.einsum('hnD,hdD->hnd', xb, wq, preferred_element_type=jnp.float32)   # (H,n,Dh)
        kv = jnp.einsum('hmD,hdD->hmd', cb, wkv, preferred_element_type=jnp.float32) # (2H,m,Dh)
        k, v = kv[:HEADS], kv[HEADS:]                      # free leading-dim slices

        dots = jnp.einsum('hnd,hmd->hnm', q, k,
                          preferred_element_type=jnp.float32)           # (H,n,m)
        dots = dots - jnp.max(dots, axis=-1, keepdims=True)              # stable softmax
        e = jnp.exp(dots)
        attn = e / jnp.sum(e, axis=-1, keepdims=True)

        o = jnp.einsum('hnm,hmd->hnd', attn, v,
                       preferred_element_type=jnp.float32)               # (H,n,Dh)
        # concat-heads @ Wo  ==  sum_h (o_h @ Wo_h)
        proj = jnp.einsum('hnd,hdD->hnD', o, wo,
                          preferred_element_type=jnp.float32)            # (H,n,DIM)
        attn_out = jnp.sum(proj, axis=0) + bo
        x1 = attn_out + x

        # ---- PreNorm(x1) + FeedForward ----
        xn2 = _layernorm(x1, ln2_g, ln2_b)
        hid = _gelu_exact(jnp.dot(xn2, w1_ref[blk],
                                  preferred_element_type=jnp.float32) + b1)
        ff = jnp.dot(hid, w2_ref[blk], preferred_element_type=jnp.float32) + b2
        x2 = ff + x1

        # trailing LayerNorm of the inner Transformer, then outer '+ tokens' residual
        return _layernorm(x2, lnf_g, lnf_b) + x
        # TODO(synk): nn.Dropout layers are inference no-ops (dropout=0.0), intentionally omitted.

    for layer in range(DEPTH):
        mri = transformer_block(2 * layer, mri, pet)
        # PyTorch reference: pet attends to the ALREADY-updated mri tokens of this layer.
        pet = transformer_block(2 * layer + 1, pet, mri)

    # ---- avg / max pooling over tokens; lane-dense (1, 4*DIM) = (1, 128) output row ----
    mri_avg = jnp.mean(mri, axis=0, keepdims=True)
    pet_avg = jnp.mean(pet, axis=0, keepdims=True)
    mri_max = jnp.max(mri, axis=0, keepdims=True)
    pet_max = jnp.max(pet, axis=0, keepdims=True)
    out_ref[0] = jnp.concatenate([mri_avg, pet_avg, mri_max, pet_max], axis=-1)


# ---------------------------------------------------------------------
# wrapper: single pallas_call for the whole forward pass
# ---------------------------------------------------------------------
def cross_transformer_mod_avg(mri_tokens, pet_tokens, params):
    attn_qo, attn_kv, w1, w2, vec, b1 = params
    B, n_mri, _ = mri_tokens.shape
    _, n_pet, _ = pet_tokens.shape

    def tok_spec(n):
        return pl.BlockSpec((1, n, DIM), lambda b: (b, 0, 0))

    def const_spec(arr):
        # whole array, same block every grid step -> DMA'd once, kept resident in VMEM
        return pl.BlockSpec(arr.shape, lambda b, _n=arr.ndim: (0,) * _n)

    out3 = pl.pallas_call(
        fused_forward_kernel,
        out_shape=jax.ShapeDtypeStruct((B, 1, OUT_DIM), jnp.float32),
        grid=(B,),
        in_specs=[tok_spec(n_mri), tok_spec(n_pet),
                  const_spec(attn_qo), const_spec(attn_kv),
                  const_spec(w1), const_spec(w2),
                  const_spec(vec), const_spec(b1)],
        out_specs=pl.BlockSpec((1, 1, OUT_DIM), lambda b: (b, 0, 0)),
        compiler_params=pltpu.CompilerParams(
            dimension_semantics=("parallel",)),   # lets v7x split the batch over its 2 TCs
    )(mri_tokens, pet_tokens, attn_qo, attn_kv, w1, w2, vec, b1)
    return out3.reshape(B, OUT_DIM)


# ---------------------------------------------------------------------
# parameter construction (deterministic, synthetic) + host-side packing
# ---------------------------------------------------------------------
def init_params(key):
    ks = jax.random.split(key, 9)
    w = lambda k, shape: 0.02 * jax.random.normal(k, shape, jnp.float32)

    wq = w(ks[0], (NBLOCKS, DIM, INNER))     # to_q   (no bias)
    wk = w(ks[1], (NBLOCKS, DIM, INNER))     # to_kv, k half (no bias)
    wv = w(ks[2], (NBLOCKS, DIM, INNER))     # to_kv, v half (no bias)
    wo = w(ks[3], (NBLOCKS, INNER, DIM))     # to_out weight
    bo = w(ks[4], (NBLOCKS, DIM))            # to_out bias
    w1 = w(ks[5], (NBLOCKS, DIM, MLP))       # FF first linear
    b1 = w(ks[6], (NBLOCKS, 1, MLP))
    w2 = w(ks[7], (NBLOCKS, MLP, DIM))       # FF second linear
    b2 = w(ks[8], (NBLOCKS, DIM))

    # head-split attention weights, packed lane-major (last dim = DIM = 32)
    def head_split(wmat):                    # (DIM, INNER) -> (H, Dh, DIM)
        return jnp.transpose(wmat.reshape(DIM, HEADS, DIM_HEAD), (1, 2, 0))

    qo, kv = [], []
    for blk in range(NBLOCKS):
        qo.append(head_split(wq[blk]) * SCALE)             # softmax scale folded into Wq
        qo.append(wo[blk].reshape(HEADS, DIM_HEAD, DIM))   # wo[h,d,D] = Wo[h*Dh+d, D]
        kv.append(jnp.concatenate([head_split(wk[blk]), head_split(wv[blk])], axis=0))
    attn_qo = jnp.stack(qo, axis=0)          # (2*NBLOCKS, H,  Dh, DIM)
    attn_kv = jnp.stack(kv, axis=0)          # (NBLOCKS,  2H, Dh, DIM)

    ones = jnp.ones((NBLOCKS, 1, DIM), jnp.float32)
    zeros = jnp.zeros((NBLOCKS, 1, DIM), jnp.float32)
    # rows: ln1_g, ln1_b, ln2_g, ln2_b, lnf_g, lnf_b, bo, b2
    vec = jnp.concatenate([ones, zeros, ones, zeros, ones, zeros,
                           bo[:, None, :], b2[:, None, :]], axis=1)   # (NBLOCKS, 8, DIM)

    return attn_qo, attn_kv, w1, w2, vec, b1


# ---------------------------------------------------------------------
# pure-JAX reference (same packed params) for a sanity check
# ---------------------------------------------------------------------
def reference_forward(mri, pet, params):
    attn_qo, attn_kv, w1, w2, vec, b1 = params

    def layernorm(x, g, b):
        mu = x.mean(-1, keepdims=True)
        var = ((x - mu) ** 2).mean(-1, keepdims=True)
        return (x - mu) / jnp.sqrt(var + EPS) * g + b

    def block(blk, x, ctx):
        v8 = vec[blk]
        ln1_g, ln1_b, ln2_g, ln2_b, lnf_g, lnf_b, bo, b2 = [v8[i] for i in range(8)]
        wq = attn_qo[2 * blk]
        wo = attn_qo[2 * blk + 1]
        wk = attn_kv[blk, :HEADS]
        wv = attn_kv[blk, HEADS:]
        xn = layernorm(x, ln1_g, ln1_b)
        q = jnp.einsum('bnD,hdD->bhnd', xn, wq)
        k = jnp.einsum('bmD,hdD->bhmd', ctx, wk)
        vv = jnp.einsum('bmD,hdD->bhmd', ctx, wv)
        attn = jax.nn.softmax(jnp.einsum('bhnd,bhmd->bhnm', q, k), axis=-1)
        o = jnp.einsum('bhnm,bhmd->bhnd', attn, vv)
        x1 = jnp.einsum('bhnd,hdD->bnD', o, wo) + bo + x
        xn2 = layernorm(x1, ln2_g, ln2_b)
        hid = jax.nn.gelu(xn2 @ w1[blk] + b1[blk], approximate=False)
        x2 = hid @ w2[blk] + b2 + x1
        return layernorm(x2, lnf_g, lnf_b) + x

    for layer in range(DEPTH):
        mri = block(2 * layer, mri, pet)
        pet = block(2 * layer + 1, pet, mri)
    return jnp.concatenate([mri.mean(1), pet.mean(1), mri.max(1), pet.max(1)], axis=-1)


if __name__ == "__main__":
    key = jax.random.PRNGKey(0)
    k_mri, k_pet, k_params = jax.random.split(key, 3)

    B, N_MRI, N_PET = 2, 8, 8
    mri = jax.random.normal(k_mri, (B, N_MRI, DIM), jnp.float32)
    pet = jax.random.normal(k_pet, (B, N_PET, DIM), jnp.float32)
    params = init_params(k_params)

    fwd = jax.jit(cross_transformer_mod_avg)
    out = fwd(mri, pet, params)
    out = jax.block_until_ready(out)

    assert out.shape == (B, 4 * DIM), out.shape
    assert bool(jnp.all(jnp.isfinite(out)))

    # loose tolerance: XLA / Mosaic may use different multi-pass f32 matmul strategies,
    # so only guard against real semantic bugs (those show up as O(0.1..1) differences).
    ref = jax.jit(reference_forward)(mri, pet, params)
    max_err = float(jnp.max(jnp.abs(out - ref)))
    assert max_err < 5e-2, f"max |kernel - reference| = {max_err}"

    print("KERNEL_OK")
</pallas_src>

<mosaic_0001>
module attributes {stable_mosaic.version = 11 : i64} {
  func.func @fused_forward_kernel(%arg0: i32, %arg1: memref<1x8x32xf32, #tpu.memory_space<vmem>>, %arg2: memref<1x8x32xf32, #tpu.memory_space<vmem>>, %arg3: memref<8x4x8x32xf32, #tpu.memory_space<vmem>>, %arg4: memref<4x8x8x32xf32, #tpu.memory_space<vmem>>, %arg5: memref<4x32x64xf32, #tpu.memory_space<vmem>>, %arg6: memref<4x64x32xf32, #tpu.memory_space<vmem>>, %arg7: memref<4x8x32xf32, #tpu.memory_space<vmem>>, %arg8: memref<4x1x64xf32, #tpu.memory_space<vmem>>, %arg9: memref<1x1x128xf32, #tpu.memory_space<vmem>>) attributes {dimension_semantics = [#tpu.dimension_semantics<parallel>], iteration_bounds = array<i64: 2>, scalar_prefetch = 0 : i64, scratch_operands = 0 : i64, tpu.core_type = #tpu.core_type<tc>, window_params = [{transform_indices = @transform_0, window_bounds = array<i64: 1, 8, 32>}, {transform_indices = @transform_1, window_bounds = array<i64: 1, 8, 32>}, {pipeline_mode = #tpu.pipeline_mode<synchronous>, transform_indices = @transform_2, window_bounds = array<i64: 8, 4, 8, 32>}, {pipeline_mode = #tpu.pipeline_mode<synchronous>, transform_indices = @transform_3, window_bounds = array<i64: 4, 8, 8, 32>}, {pipeline_mode = #tpu.pipeline_mode<synchronous>, transform_indices = @transform_4, window_bounds = array<i64: 4, 32, 64>}, {pipeline_mode = #tpu.pipeline_mode<synchronous>, transform_indices = @transform_5, window_bounds = array<i64: 4, 64, 32>}, {pipeline_mode = #tpu.pipeline_mode<synchronous>, transform_indices = @transform_6, window_bounds = array<i64: 4, 8, 32>}, {pipeline_mode = #tpu.pipeline_mode<synchronous>, transform_indices = @transform_7, window_bounds = array<i64: 4, 1, 64>}, {transform_indices = @transform_8, window_bounds = array<i64: 1, 1, 128>}]} {
    %c0 = arith.constant 0 : index
    %c0_0 = arith.constant 0 : index
    %c0_1 = arith.constant 0 : index
    %0 = vector.load %arg1[%c0, %c0_0, %c0_1] : memref<1x8x32xf32, #tpu.memory_space<vmem>>, vector<1x8x32xf32>
    %1 = vector.shape_cast %0 : vector<1x8x32xf32> to vector<8x32xf32>
    %c0_2 = arith.constant 0 : index
    %c0_3 = arith.constant 0 : index
    %c0_4 = arith.constant 0 : index
    %2 = vector.load %arg2[%c0_2, %c0_3, %c0_4] : memref<1x8x32xf32, #tpu.memory_space<vmem>>, vector<1x8x32xf32>
    %3 = vector.shape_cast %2 : vector<1x8x32xf32> to vector<8x32xf32>
    %c0_5 = arith.constant 0 : index
    %c0_6 = arith.constant 0 : index
    %c0_7 = arith.constant 0 : index
    %4 = vector.load %arg7[%c0_5, %c0_6, %c0_7] : memref<4x8x32xf32, #tpu.memory_space<vmem>>, vector<1x8x32xf32>
    %5 = vector.shape_cast %4 : vector<1x8x32xf32> to vector<8x32xf32>
    %6 = vector.extract_strided_slice %5 {offsets = [0, 0], sizes = [1, 32], strides = [1, 1]} : vector<8x32xf32> to vector<1x32xf32>
    %7 = vector.extract_strided_slice %5 {offsets = [1, 0], sizes = [1, 32], strides = [1, 1]} : vector<8x32xf32> to vector<1x32xf32>
    %8 = vector.extract_strided_slice %5 {offsets = [2, 0], sizes = [1, 32], strides = [1, 1]} : vector<8x32xf32> to vector<1x32xf32>
    %9 = vector.extract_strided_slice %5 {offsets = [3, 0], sizes = [1, 32], strides = [1, 1]} : vector<8x32xf32> to vector<1x32xf32>
    %10 = vector.extract_strided_slice %5 {offsets = [4, 0], sizes = [1, 32], strides = [1, 1]} : vector<8x32xf32> to vector<1x32xf32>
    %11 = vector.extract_strided_slice %5 {offsets = [5, 0], sizes = [1, 32], strides = [1, 1]} : vector<8x32xf32> to vector<1x32xf32>
    %12 = vector.extract_strided_slice %5 {offsets = [6, 0], sizes = [1, 32], strides = [1, 1]} : vector<8x32xf32> to vector<1x32xf32>
    %13 = vector.extract_strided_slice %5 {offsets = [7, 0], sizes = [1, 32], strides = [1, 1]} : vector<8x32xf32> to vector<1x32xf32>
    %c0_8 = arith.constant 0 : index
    %c0_9 = arith.constant 0 : index
    %c0_10 = arith.constant 0 : index
    %14 = vector.load %arg8[%c0_8, %c0_9, %c0_10] : memref<4x1x64xf32, #tpu.memory_space<vmem>>, vector<1x1x64xf32>
    %15 = vector.shape_cast %14 : vector<1x1x64xf32> to vector<1x64xf32>
    %c0_11 = arith.constant 0 : index
    %c0_12 = arith.constant 0 : index
    %c0_13 = arith.constant 0 : index
    %c0_14 = arith.constant 0 : index
    %16 = vector.load %arg3[%c0_11, %c0_12, %c0_13, %c0_14] : memref<8x4x8x32xf32, #tpu.memory_space<vmem>>, vector<1x4x8x32xf32>
    %17 = vector.shape_cast %16 : vector<1x4x8x32xf32> to vector<4x8x32xf32>
    %c1 = arith.constant 1 : index
    %c0_15 = arith.constant 0 : index
    %c0_16 = arith.constant 0 : index
    %c0_17 = arith.constant 0 : index
    %18 = vector.load %arg3[%c1, %c0_15, %c0_16, %c0_17] : memref<8x4x8x32xf32, #tpu.memory_space<vmem>>, vector<1x4x8x32xf32>
    %19 = vector.shape_cast %18 : vector<1x4x8x32xf32> to vector<4x8x32xf32>
    %c0_18 = arith.constant 0 : index
    %c0_19 = arith.constant 0 : index
    %c0_20 = arith.constant 0 : index
    %c0_21 = arith.constant 0 : index
    %20 = vector.load %arg4[%c0_18, %c0_19, %c0_20, %c0_21] : memref<4x8x8x32xf32, #tpu.memory_space<vmem>>, vector<1x8x8x32xf32>
    %21 = vector.shape_cast %20 : vector<1x8x8x32xf32> to vector<8x8x32xf32>
    %cst = arith.constant dense<0.000000e+00> : vector<8xf32>
    %22 = vector.multi_reduction <add>, %1, %cst [1] : vector<8x32xf32> to vector<8xf32>
    %23 = vector.shape_cast %22 : vector<8xf32> to vector<8x1xf32>
    %cst_22 = arith.constant 3.200000e+01 : f32
    %24 = vector.broadcast %cst_22 : f32 to vector<8x1xf32>
    %25 = arith.divf %23, %24 : vector<8x1xf32>
    %26 = vector.broadcast %25 : vector<8x1xf32> to vector<8x32xf32>
    %27 = arith.subf %1, %26 : vector<8x32xf32>
    %28 = arith.mulf %27, %27 : vector<8x32xf32>
    %cst_23 = arith.constant dense<0.000000e+00> : vector<8xf32>
    %29 = vector.multi_reduction <add>, %28, %cst_23 [1] : vector<8x32xf32> to vector<8xf32>
    %30 = vector.shape_cast %29 : vector<8xf32> to vector<8x1xf32>
    %cst_24 = arith.constant 3.200000e+01 : f32
    %31 = vector.broadcast %cst_24 : f32 to vector<8x1xf32>
    %32 = arith.divf %30, %31 : vector<8x1xf32>
    %33 = vector.broadcast %25 : vector<8x1xf32> to vector<8x32xf32>
    %34 = arith.subf %1, %33 : vector<8x32xf32>
    %cst_25 = arith.constant 9.99999974E-6 : f32
    %35 = vector.broadcast %cst_25 : f32 to vector<8x1xf32>
    %36 = arith.addf %32, %35 : vector<8x1xf32>
    %37 = math.rsqrt %36 : vector<8x1xf32>
    %38 = vector.broadcast %37 : vector<8x1xf32> to vector<8x32xf32>
    %39 = arith.mulf %34, %38 : vector<8x32xf32>
    %40 = vector.broadcast %6 : vector<1x32xf32> to vector<8x32xf32>
    %41 = arith.mulf %39, %40 : vector<8x32xf32>
    %42 = vector.broadcast %7 : vector<1x32xf32> to vector<8x32xf32>
    %43 = arith.addf %41, %42 : vector<8x32xf32>
    %44 = vector.shape_cast %43 : vector<8x32xf32> to vector<1x8x32xf32>
    %45 = vector.broadcast %44 : vector<1x8x32xf32> to vector<4x8x32xf32>
    %46 = vector.shape_cast %3 : vector<8x32xf32> to vector<1x8x32xf32>
    %47 = vector.broadcast %46 : vector<1x8x32xf32> to vector<8x8x32xf32>
    "tpu.trace_start"() <{level = 10 : i32, message = "hnD,hdD->hnd"}> : () -> ()
    %cst_26 = arith.constant dense<0.000000e+00> : vector<4x8x8xf32>
    %48 = tpu.matmul %45, %17, %cst_26 {dimension_numbers = #tpu.dot_dimension_numbers<[2], [2], [1], [1], [0, 0, 0, 1, 1, 1], [0], [0]>} : vector<4x8x32xf32>, vector<4x8x32xf32>, vector<4x8x8xf32> -> vector<4x8x8xf32>
    "tpu.trace_stop"() : () -> ()
    "tpu.trace_start"() <{level = 10 : i32, message = "hmD,hdD->hmd"}> : () -> ()
    %cst_27 = arith.constant dense<0.000000e+00> : vector<8x8x8xf32>
    %49 = tpu.matmul %47, %21, %cst_27 {dimension_numbers = #tpu.dot_dimension_numbers<[2], [2], [1], [1], [0, 0, 0, 1, 1, 1], [0], [0]>} : vector<8x8x32xf32>, vector<8x8x32xf32>, vector<8x8x8xf32> -> vector<8x8x8xf32>
    "tpu.trace_stop"() : () -> ()
    %50 = vector.extract_strided_slice %49 {offsets = [0, 0, 0], sizes = [4, 8, 8], strides = [1, 1, 1]} : vector<8x8x8xf32> to vector<4x8x8xf32>
    %51 = vector.extract_strided_slice %49 {offsets = [4, 0, 0], sizes = [4, 8, 8], strides = [1, 1, 1]} : vector<8x8x8xf32> to vector<4x8x8xf32>
    "tpu.trace_start"() <{level = 10 : i32, message = "hnd,hmd->hnm"}> : () -> ()
    %cst_28 = arith.constant dense<0.000000e+00> : vector<4x8x8xf32>
    %52 = tpu.matmul %48, %50, %cst_28 {dimension_numbers = #tpu.dot_dimension_numbers<[2], [2], [1], [1], [0, 0, 0, 1, 1, 1], [0], [0]>} : vector<4x8x8xf32>, vector<4x8x8xf32>, vector<4x8x8xf32> -> vector<4x8x8xf32>
    "tpu.trace_stop"() : () -> ()
    %cst_29 = arith.constant dense<0xFF800000> : vector<4x8xf32>
    %53 = vector.multi_reduction <maximumf>, %52, %cst_29 [2] : vector<4x8x8xf32> to vector<4x8xf32>
    %54 = vector.shape_cast %53 : vector<4x8xf32> to vector<4x8x1xf32>
    %55 = vector.broadcast %54 : vector<4x8x1xf32> to vector<4x8x8xf32>
    %56 = arith.subf %52, %55 : vector<4x8x8xf32>
    %57 = math.exp %56 : vector<4x8x8xf32>
    %cst_30 = arith.constant dense<0.000000e+00> : vector<4x8xf32>
    %58 = vector.multi_reduction <add>, %57, %cst_30 [2] : vector<4x8x8xf32> to vector<4x8xf32>
    %59 = vector.shape_cast %58 : vector<4x8xf32> to vector<4x8x1xf32>
    %60 = vector.broadcast %59 : vector<4x8x1xf32> to vector<4x8x8xf32>
    %61 = arith.divf %57, %60 : vector<4x8x8xf32>
    "tpu.trace_start"() <{level = 10 : i32, message = "hnm,hmd->hnd"}> : () -> ()
    %cst_31 = arith.constant dense<0.000000e+00> : vector<4x8x8xf32>
    %62 = tpu.matmul %61, %51, %cst_31 {dimension_numbers = #tpu.dot_dimension_numbers<[2], [1], [1], [2], [0, 0, 0, 1, 1, 2], [0], [0]>} : vector<4x8x8xf32>, vector<4x8x8xf32>, vector<4x8x8xf32> -> vector<4x8x8xf32>
    "tpu.trace_stop"() : () -> ()
    "tpu.trace_start"() <{level = 10 : i32, message = "hnd,hdD->hnD"}> : () -> ()
    %cst_32 = arith.constant dense<0.000000e+00> : vector<4x8x32xf32>
    %63 = tpu.matmul %62, %19, %cst_32 {dimension_numbers = #tpu.dot_dimension_numbers<[2], [1], [1], [2], [0, 0, 0, 1, 1, 2], [0], [0]>} : vector<4x8x8xf32>, vector<4x8x32xf32>, vector<4x8x32xf32> -> vector<4x8x32xf32>
    "tpu.trace_stop"() : () -> ()
    %cst_33 = arith.constant dense<0.000000e+00> : vector<8x32xf32>
    %64 = vector.multi_reduction <add>, %63, %cst_33 [0] : vector<4x8x32xf32> to vector<8x32xf32>
    %65 = vector.broadcast %12 : vector<1x32xf32> to vector<8x32xf32>
    %66 = arith.addf %64, %65 : vector<8x32xf32>
    %67 = arith.addf %66, %1 : vector<8x32xf32>
    %cst_34 = arith.constant dense<0.000000e+00> : vector<8xf32>
    %68 = vector.multi_reduction <add>, %67, %cst_34 [1] : vector<8x32xf32> to vector<8xf32>
    %69 = vector.shape_cast %68 : vector<8xf32> to vector<8x1xf32>
    %cst_35 = arith.constant 3.200000e+01 : f32
    %70 = vector.broadcast %cst_35 : f32 to vector<8x1xf32>
    %71 = arith.divf %69, %70 : vector<8x1xf32>
    %72 = vector.broadcast %71 : vector<8x1xf32> to vector<8x32xf32>
    %73 = arith.subf %67, %72 : vector<8x32xf32>
    %74 = arith.mulf %73, %73 : vector<8x32xf32>
    %cst_36 = arith.constant dense<0.000000e+00> : vector<8xf32>
    %75 = vector.multi_reduction <add>, %74, %cst_36 [1] : vector<8x32xf32> to vector<8xf32>
    %76 = vector.shape_cast %75 : vector<8xf32> to vector<8x1xf32>
    %cst_37 = arith.constant 3.200000e+01 : f32
    %77 = vector.broadcast %cst_37 : f32 to vector<8x1xf32>
    %78 = arith.divf %76, %77 : vector<8x1xf32>
    %79 = vector.broadcast %71 : vector<8x1xf32> to vector<8x32xf32>
    %80 = arith.subf %67, %79 : vector<8x32xf32>
    %cst_38 = arith.constant 9.99999974E-6 : f32
    %81 = vector.broadcast %cst_38 : f32 to vector<8x1xf32>
    %82 = arith.addf %78, %81 : vector<8x1xf32>
    %83 = math.rsqrt %82 : vector<8x1xf32>
    %84 = vector.broadcast %83 : vector<8x1xf32> to vector<8x32xf32>
    %85 = arith.mulf %80, %84 : vector<8x32xf32>
    %86 = vector.broadcast %8 : vector<1x32xf32> to vector<8x32xf32>
    %87 = arith.mulf %85, %86 : vector<8x32xf32>
    %88 = vector.broadcast %9 : vector<1x32xf32> to vector<8x32xf32>
    %89 = arith.addf %87, %88 : vector<8x32xf32>
    %c0_39 = arith.constant 0 : index
    %c0_40 = arith.constant 0 : index
    %c0_41 = arith.constant 0 : index
    %90 = vector.load %arg5[%c0_39, %c0_40, %c0_41] : memref<4x32x64xf32, #tpu.memory_space<vmem>>, vector<1x32x64xf32>
    %91 = vector.shape_cast %90 : vector<1x32x64xf32> to vector<32x64xf32>
    %cst_42 = arith.constant dense<0.000000e+00> : vector<8x64xf32>
    %92 = tpu.matmul %89, %91, %cst_42 {dimension_numbers = #tpu.dot_dimension_numbers<[1], [0], [0], [1], [0, 0, 1, 1], [], []>} : vector<8x32xf32>, vector<32x64xf32>, vector<8x64xf32> -> vector<8x64xf32>
    %93 = vector.broadcast %15 : vector<1x64xf32> to vector<8x64xf32>
    %94 = arith.addf %92, %93 : vector<8x64xf32>
    %cst_43 = arith.constant 5.000000e-01 : f32
    %95 = vector.broadcast %cst_43 : f32 to vector<8x64xf32>
    %96 = arith.mulf %95, %94 : vector<8x64xf32>
    %cst_44 = arith.constant 1.41421354 : f32
    %97 = vector.broadcast %cst_44 : f32 to vector<8x64xf32>
    %98 = arith.divf %94, %97 : vector<8x64xf32>
    %99 = math.erf %98 : vector<8x64xf32>
    %cst_45 = arith.constant 1.000000e+00 : f32
    %100 = vector.broadcast %cst_45 : f32 to vector<8x64xf32>
    %101 = arith.addf %100, %99 : vector<8x64xf32>
    %102 = arith.mulf %96, %101 : vector<8x64xf32>
    %c0_46 = arith.constant 0 : index
    %c0_47 = arith.constant 0 : index
    %c0_48 = arith.constant 0 : index
    %103 = vector.load %arg6[%c0_46, %c0_47, %c0_48] : memref<4x64x32xf32, #tpu.memory_space<vmem>>, vector<1x64x32xf32>
    %104 = vector.shape_cast %103 : vector<1x64x32xf32> to vector<64x32xf32>
    %cst_49 = arith.constant dense<0.000000e+00> : vector<8x32xf32>
    %105 = tpu.matmul %102, %104, %cst_49 {dimension_numbers = #tpu.dot_dimension_numbers<[1], [0], [0], [1], [0, 0, 1, 1], [], []>} : vector<8x64xf32>, vector<64x32xf32>, vector<8x32xf32> -> vector<8x32xf32>
    %106 = vector.broadcast %13 : vector<1x32xf32> to vector<8x32xf32>
    %107 = arith.addf %105, %106 : vector<8x32xf32>
    %108 = arith.addf %107, %67 : vector<8x32xf32>
    %cst_50 = arith.constant dense<0.000000e+00> : vector<8xf32>
    %109 = vector.multi_reduction <add>, %108, %cst_50 [1] : vector<8x32xf32> to vector<8xf32>
    %110 = vector.shape_cast %109 : vector<8xf32> to vector<8x1xf32>
    %cst_51 = arith.constant 3.200000e+01 : f32
    %111 = vector.broadcast %cst_51 : f32 to vector<8x1xf32>
    %112 = arith.divf %110, %111 : vector<8x1xf32>
    %113 = vector.broadcast %112 : vector<8x1xf32> to vector<8x32xf32>
    %114 = arith.subf %108, %113 : vector<8x32xf32>
    %115 = arith.mulf %114, %114 : vector<8x32xf32>
    %cst_52 = arith.constant dense<0.000000e+00> : vector<8xf32>
    %116 = vector.multi_reduction <add>, %115, %cst_52 [1] : vector<8x32xf32> to vector<8xf32>
    %117 = vector.shape_cast %116 : vector<8xf32> to vector<8x1xf32>
    %cst_53 = arith.constant 3.200000e+01 : f32
    %118 = vector.broadcast %cst_53 : f32 to vector<8x1xf32>
    %119 = arith.divf %117, %118 : vector<8x1xf32>
    %120 = vector.broadcast %112 : vector<8x1xf32> to vector<8x32xf32>
    %121 = arith.subf %108, %120 : vector<8x32xf32>
    %cst_54 = arith.constant 9.99999974E-6 : f32
    %122 = vector.broadcast %cst_54 : f32 to vector<8x1xf32>
    %123 = arith.addf %119, %122 : vector<8x1xf32>
    %124 = math.rsqrt %123 : vector<8x1xf32>
    %125 = vector.broadcast %124 : vector<8x1xf32> to vector<8x32xf32>
    %126 = arith.mulf %121, %125 : vector<8x32xf32>
    %127 = vector.broadcast %10 : vector<1x32xf32> to vector<8x32xf32>
    %128 = arith.mulf %126, %127 : vector<8x32xf32>
    %129 = vector.broadcast %11 : vector<1x32xf32> to vector<8x32xf32>
    %130 = arith.addf %128, %129 : vector<8x32xf32>
    %131 = arith.addf %130, %1 : vector<8x32xf32>
    %c1_55 = arith.constant 1 : index
    %c0_56 = arith.constant 0 : index
    %c0_57 = arith.constant 0 : index
    %132 = vector.load %arg7[%c1_55, %c0_56, %c0_57] : memref<4x8x32xf32, #tpu.memory_space<vmem>>, vector<1x8x32xf32>
    %133 = vector.shape_cast %132 : vector<1x8x32xf32> to vector<8x32xf32>
    %134 = vector.extract_strided_slice %133 {offsets = [0, 0], sizes = [1, 32], strides = [1, 1]} : vector<8x32xf32> to vector<1x32xf32>
    %135 = vector.extract_strided_slice %133 {offsets = [1, 0], sizes = [1, 32], strides = [1, 1]} : vector<8x32xf32> to vector<1x32xf32>
    %136 = vector.extract_strided_slice %133 {offsets = [2, 0], sizes = [1, 32], strides = [1, 1]} : vector<8x32xf32> to vector<1x32xf32>
    %137 = vector.extract_strided_slice %133 {offsets = [3, 0], sizes = [1, 32], strides = [1, 1]} : vector<8x32xf32> to vector<1x32xf32>
    %138 = vector.extract_strided_slice %133 {offsets = [4, 0], sizes = [1, 32], strides = [1, 1]} : vector<8x32xf32> to vector<1x32xf32>
    %139 = vector.extract_strided_slice %133 {offsets = [5, 0], sizes = [1, 32], strides = [1, 1]} : vector<8x32xf32> to vector<1x32xf32>
    %140 = vector.extract_strided_slice %133 {offsets = [6, 0], sizes = [1, 32], strides = [1, 1]} : vector<8x32xf32> to vector<1x32xf32>
    %141 = vector.extract_strided_slice %133 {offsets = [7, 0], sizes = [1, 32], strides = [1, 1]} : vector<8x32xf32> to vector<1x32xf32>
    %c1_58 = arith.constant 1 : index
    %c0_59 = arith.constant 0 : index
    %c0_60 = arith.constant 0 : index
    %142 = vector.load %arg8[%c1_58, %c0_59, %c0_60] : memref<4x1x64xf32, #tpu.memory_space<vmem>>, vector<1x1x64xf32>
    %143 = vector.shape_cast %142 : vector<1x1x64xf32> to vector<1x64xf32>
    %c2 = arith.constant 2 : index
    %c0_61 = arith.constant 0 : index
    %c0_62 = arith.constant 0 : index
    %c0_63 = arith.constant 0 : index
    %144 = vector.load %arg3[%c2, %c0_61, %c0_62, %c0_63] : memref<8x4x8x32xf32, #tpu.memory_space<vmem>>, vector<1x4x8x32xf32>
    %145 = vector.shape_cast %144 : vector<1x4x8x32xf32> to vector<4x8x32xf32>
    %c3 = arith.constant 3 : index
    %c0_64 = arith.constant 0 : index
    %c0_65 = arith.constant 0 : index
    %c0_66 = arith.constant 0 : index
    %146 = vector.load %arg3[%c3, %c0_64, %c0_65, %c0_66] : memref<8x4x8x32xf32, #tpu.memory_space<vmem>>, vector<1x4x8x32xf32>
    %147 = vector.shape_cast %146 : vector<1x4x8x32xf32> to vector<4x8x32xf32>
    %c1_67 = arith.constant 1 : index
    %c0_68 = arith.constant 0 : index
    %c0_69 = arith.constant 0 : index
    %c0_70 = arith.constant 0 : index
    %148 = vector.load %arg4[%c1_67, %c0_68, %c0_69, %c0_70] : memref<4x8x8x32xf32, #tpu.memory_space<vmem>>, vector<1x8x8x32xf32>
    %149 = vector.shape_cast %148 : vector<1x8x8x32xf32> to vector<8x8x32xf32>
    %cst_71 = arith.constant dense<0.000000e+00> : vector<8xf32>
    %150 = vector.multi_reduction <add>, %3, %cst_71 [1] : vector<8x32xf32> to vector<8xf32>
    %151 = vector.shape_cast %150 : vector<8xf32> to vector<8x1xf32>
    %cst_72 = arith.constant 3.200000e+01 : f32
    %152 = vector.broadcast %cst_72 : f32 to vector<8x1xf32>
    %153 = arith.divf %151, %152 : vector<8x1xf32>
    %154 = vector.broadcast %153 : vector<8x1xf32> to vector<8x32xf32>
    %155 = arith.subf %3, %154 : vector<8x32xf32>
    %156 = arith.mulf %155, %155 : vector<8x32xf32>
    %cst_73 = arith.constant dense<0.000000e+00> : vector<8xf32>
    %157 = vector.multi_reduction <add>, %156, %cst_73 [1] : vector<8x32xf32> to vector<8xf32>
    %158 = vector.shape_cast %157 : vector<8xf32> to vector<8x1xf32>
    %cst_74 = arith.constant 3.200000e+01 : f32
    %159 = vector.broadcast %cst_74 : f32 to vector<8x1xf32>
    %160 = arith.divf %158, %159 : vector<8x1xf32>
    %161 = vector.broadcast %153 : vector<8x1xf32> to vector<8x32xf32>
    %162 = arith.subf %3, %161 : vector<8x32xf32>
    %cst_75 = arith.constant 9.99999974E-6 : f32
    %163 = vector.broadcast %cst_75 : f32 to vector<8x1xf32>
    %164 = arith.addf %160, %163 : vector<8x1xf32>
    %165 = math.rsqrt %164 : vector<8x1xf32>
    %166 = vector.broadcast %165 : vector<8x1xf32> to vector<8x32xf32>
    %167 = arith.mulf %162, %166 : vector<8x32xf32>
    %168 = vector.broadcast %134 : vector<1x32xf32> to vector<8x32xf32>
    %169 = arith.mulf %167, %168 : vector<8x32xf32>
    %170 = vector.broadcast %135 : vector<1x32xf32> to vector<8x32xf32>
    %171 = arith.addf %169, %170 : vector<8x32xf32>
    %172 = vector.shape_cast %171 : vector<8x32xf32> to vector<1x8x32xf32>
    %173 = vector.broadcast %172 : vector<1x8x32xf32> to vector<4x8x32xf32>
    %174 = vector.shape_cast %131 : vector<8x32xf32> to vector<1x8x32xf32>
    %175 = vector.broadcast %174 : vector<1x8x32xf32> to vector<8x8x32xf32>
    "tpu.trace_start"() <{level = 10 : i32, message = "hnD,hdD->hnd"}> : () -> ()
    %cst_76 = arith.constant dense<0.000000e+00> : vector<4x8x8xf32>
    %176 = tpu.matmul %173, %145, %cst_76 {dimension_numbers = #tpu.dot_dimension_numbers<[2], [2], [1], [1], [0, 0, 0, 1, 1, 1], [0], [0]>} : vector<4x8x32xf32>, vector<4x8x32xf32>, vector<4x8x8xf32> -> vector<4x8x8xf32>
    "tpu.trace_stop"() : () -> ()
    "tpu.trace_start"() <{level = 10 : i32, message = "hmD,hdD->hmd"}> : () -> ()
    %cst_77 = arith.constant dense<0.000000e+00> : vector<8x8x8xf32>
    %177 = tpu.matmul %175, %149, %cst_77 {dimension_numbers = #tpu.dot_dimension_numbers<[2], [2], [1], [1], [0, 0, 0, 1, 1, 1], [0], [0]>} : vector<8x8x32xf32>, vector<8x8x32xf32>, vector<8x8x8xf32> -> vector<8x8x8xf32>
    "tpu.trace_stop"() : () -> ()
    %178 = vector.extract_strided_slice %177 {offsets = [0, 0, 0], sizes = [4, 8, 8], strides = [1, 1, 1]} : vector<8x8x8xf32> to vector<4x8x8xf32>
    %179 = vector.extract_strided_slice %177 {offsets = [4, 0, 0], sizes = [4, 8, 8], strides = [1, 1, 1]} : vector<8x8x8xf32> to vector<4x8x8xf32>
    "tpu.trace_start"() <{level = 10 : i32, message = "hnd,hmd->hnm"}> : () -> ()
    %cst_78 = arith.constant dense<0.000000e+00> : vector<4x8x8xf32>
    %180 = tpu.matmul %176, %178, %cst_78 {dimension_numbers = #tpu.dot_dimension_numbers<[2], [2], [1], [1], [0, 0, 0, 1, 1, 1], [0], [0]>} : vector<4x8x8xf32>, vector<4x8x8xf32>, vector<4x8x8xf32> -> vector<4x8x8xf32>
    "tpu.trace_stop"() : () -> ()
    %cst_79 = arith.constant dense<0xFF800000> : vector<4x8xf32>
    %181 = vector.multi_reduction <maximumf>, %180, %cst_79 [2] : vector<4x8x8xf32> to vector<4x8xf32>
    %182 = vector.shape_cast %181 : vector<4x8xf32> to vector<4x8x1xf32>
    %183 = vector.broadcast %182 : vector<4x8x1xf32> to vector<4x8x8xf32>
    %184 = arith.subf %180, %183 : vector<4x8x8xf32>
    %185 = math.exp %184 : vector<4x8x8xf32>
    %cst_80 = arith.constant dense<0.000000e+00> : vector<4x8xf32>
    %186 = vector.multi_reduction <add>, %185, %cst_80 [2] : vector<4x8x8xf32> to vector<4x8xf32>
    %187 = vector.shape_cast %186 : vector<4x8xf32> to vector<4x8x1xf32>
    %188 = vector.broadcast %187 : vector<4x8x1xf32> to vector<4x8x8xf32>
    %189 = arith.divf %185, %188 : vector<4x8x8xf32>
    "tpu.trace_start"() <{level = 10 : i32, message = "hnm,hmd->hnd"}> : () -> ()
    %cst_81 = arith.constant dense<0.000000e+00> : vector<4x8x8xf32>
    %190 = tpu.matmul %189, %179, %cst_81 {dimension_numbers = #tpu.dot_dimension_numbers<[2], [1], [1], [2], [0, 0, 0, 1, 1, 2], [0], [0]>} : vector<4x8x8xf32>, vector<4x8x8xf32>, vector<4x8x8xf32> -> vector<4x8x8xf32>
    "tpu.trace_stop"() : () -> ()
    "tpu.trace_start"() <{level = 10 : i32, message = "hnd,hdD->hnD"}> : () -> ()
    %cst_82 = arith.constant dense<0.000000e+00> : vector<4x8x32xf32>
    %191 = tpu.matmul %190, %147, %cst_82 {dimension_numbers = #tpu.dot_dimension_numbers<[2], [1], [1], [2], [0, 0, 0, 1, 1, 2], [0], [0]>} : vector<4x8x8xf32>, vector<4x8x32xf32>, vector<4x8x32xf32> -> vector<4x8x32xf32>
    "tpu.trace_stop"() : () -> ()
    %cst_83 = arith.constant dense<0.000000e+00> : vector<8x32xf32>
    %192 = vector.multi_reduction <add>, %191, %cst_83 [0] : vector<4x8x32xf32> to vector<8x32xf32>
    %193 = vector.broadcast %140 : vector<1x32xf32> to vector<8x32xf32>
    %194 = arith.addf %192, %193 : vector<8x32xf32>
    %195 = arith.addf %194, %3 : vector<8x32xf32>
    %cst_84 = arith.constant dense<0.000000e+00> : vector<8xf32>
    %196 = vector.multi_reduction <add>, %195, %cst_84 [1] : vector<8x32xf32> to vector<8xf32>
    %197 = vector.shape_cast %196 : vector<8xf32> to vector<8x1xf32>
    %cst_85 = arith.constant 3.200000e+01 : f32
    %198 = vector.broadcast %cst_85 : f32 to vector<8x1xf32>
    %199 = arith.divf %197, %198 : vector<8x1xf32>
    %200 = vector.broadcast %199 : vector<8x1xf32> to vector<8x32xf32>
    %201 = arith.subf %195, %200 : vector<8x32xf32>
    %202 = arith.mulf %201, %201 : vector<8x32xf32>
    %cst_86 = arith.constant dense<0.000000e+00> : vector<8xf32>
    %203 = vector.multi_reduction <add>, %202, %cst_86 [1] : vector<8x32xf32> to vector<8xf32>
    %204 = vector.shape_cast %203 : vector<8xf32> to vector<8x1xf32>
    %cst_87 = arith.constant 3.200000e+01 : f32
    %205 = vector.broadcast %cst_87 : f32 to vector<8x1xf32>
    %206 = arith.divf %204, %205 : vector<8x1xf32>
    %207 = vector.broadcast %199 : vector<8x1xf32> to vector<8x32xf32>
    %208 = arith.subf %195, %207 : vector<8x32xf32>
    %cst_88 = arith.constant 9.99999974E-6 : f32
    %209 = vector.broadcast %cst_88 : f32 to vector<8x1xf32>
    %210 = arith.addf %206, %209 : vector<8x1xf32>
    %211 = math.rsqrt %210 : vector<8x1xf32>
    %212 = vector.broadcast %211 : vector<8x1xf32> to vector<8x32xf32>
    %213 = arith.mulf %208, %212 : vector<8x32xf32>
    %214 = vector.broadcast %136 : vector<1x32xf32> to vector<8x32xf32>
    %215 = arith.mulf %213, %214 : vector<8x32xf32>
    %216 = vector.broadcast %137 : vector<1x32xf32> to vector<8x32xf32>
    %217 = arith.addf %215, %216 : vector<8x32xf32>
    %c1_89 = arith.constant 1 : index
    %c0_90 = arith.constant 0 : index
    %c0_91 = arith.constant 0 : index
    %218 = vector.load %arg5[%c1_89, %c0_90, %c0_91] : memref<4x32x64xf32, #tpu.memory_space<vmem>>, vector<1x32x64xf32>
    %219 = vector.shape_cast %218 : vector<1x32x64xf32> to vector<32x64xf32>
    %cst_92 = arith.constant dense<0.000000e+00> : vector<8x64xf32>
    %220 = tpu.matmul %217, %219, %cst_92 {dimension_numbers = #tpu.dot_dimension_numbers<[1], [0], [0], [1], [0, 0, 1, 1], [], []>} : vector<8x32xf32>, vector<32x64xf32>, vector<8x64xf32> -> vector<8x64xf32>
    %221 = vector.broadcast %143 : vector<1x64xf32> to vector<8x64xf32>
    %222 = arith.addf %220, %221 : vector<8x64xf32>
    %cst_93 = arith.constant 5.000000e-01 : f32
    %223 = vector.broadcast %cst_93 : f32 to vector<8x64xf32>
    %224 = arith.mulf %223, %222 : vector<8x64xf32>
    %cst_94 = arith.constant 1.41421354 : f32
    %225 = vector.broadcast %cst_94 : f32 to vector<8x64xf32>
    %226 = arith.divf %222, %225 : vector<8x64xf32>
    %227 = math.erf %226 : vector<8x64xf32>
    %cst_95 = arith.constant 1.000000e+00 : f32
    %228 = vector.broadcast %cst_95 : f32 to vector<8x64xf32>
    %229 = arith.addf %228, %227 : vector<8x64xf32>
    %230 = arith.mulf %224, %229 : vector<8x64xf32>
    %c1_96 = arith.constant 1 : index
    %c0_97 = arith.constant 0 : index
    %c0_98 = arith.constant 0 : index
    %231 = vector.load %arg6[%c1_96, %c0_97, %c0_98] : memref<4x64x32xf32, #tpu.memory_space<vmem>>, vector<1x64x32xf32>
    %232 = vector.shape_cast %231 : vector<1x64x32xf32> to vector<64x32xf32>
    %cst_99 = arith.constant dense<0.000000e+00> : vector<8x32xf32>
    %233 = tpu.matmul %230, %232, %cst_99 {dimension_numbers = #tpu.dot_dimension_numbers<[1], [0], [0], [1], [0, 0, 1, 1], [], []>} : vector<8x64xf32>, vector<64x32xf32>, vector<8x32xf32> -> vector<8x32xf32>
    %234 = vector.broadcast %141 : vector<1x32xf32> to vector<8x32xf32>
    %235 = arith.addf %233, %234 : vector<8x32xf32>
    %236 = arith.addf %235, %195 : vector<8x32xf32>
    %cst_100 = arith.constant dense<0.000000e+00> : vector<8xf32>
    %237 = vector.multi_reduction <add>, %236, %cst_100 [1] : vector<8x32xf32> to vector<8xf32>
    %238 = vector.shape_cast %237 : vector<8xf32> to vector<8x1xf32>
    %cst_101 = arith.constant 3.200000e+01 : f32
    %239 = vector.broadcast %cst_101 : f32 to vector<8x1xf32>
    %240 = arith.divf %238, %239 : vector<8x1xf32>
    %241 = vector.broadcast %240 : vector<8x1xf32> to vector<8x32xf32>
    %242 = arith.subf %236, %241 : vector<8x32xf32>
    %243 = arith.mulf %242, %242 : vector<8x32xf32>
    %cst_102 = arith.constant dense<0.000000e+00> : vector<8xf32>
    %244 = vector.multi_reduction <add>, %243, %cst_102 [1] : vector<8x32xf32> to vector<8xf32>
    %245 = vector.shape_cast %244 : vector<8xf32> to vector<8x1xf32>
    %cst_103 = arith.constant 3.200000e+01 : f32
    %246 = vector.broadcast %cst_103 : f32 to vector<8x1xf32>
    %247 = arith.divf %245, %246 : vector<8x1xf32>
    %248 = vector.broadcast %240 : vector<8x1xf32> to vector<8x32xf32>
    %249 = arith.subf %236, %248 : vector<8x32xf32>
    %cst_104 = arith.constant 9.99999974E-6 : f32
    %250 = vector.broadcast %cst_104 : f32 to vector<8x1xf32>
    %251 = arith.addf %247, %250 : vector<8x1xf32>
    %252 = math.rsqrt %251 : vector<8x1xf32>
    %253 = vector.broadcast %252 : vector<8x1xf32> to vector<8x32xf32>
    %254 = arith.mulf %249, %253 : vector<8x32xf32>
    %255 = vector.broadcast %138 : vector<1x32xf32> to vector<8x32xf32>
    %256 = arith.mulf %254, %255 : vector<8x32xf32>
    %257 = vector.broadcast %139 : vector<1x32xf32> to vector<8x32xf32>
    %258 = arith.addf %256, %257 : vector<8x32xf32>
    %259 = arith.addf %258, %3 : vector<8x32xf32>
    %c2_105 = arith.constant 2 : index
    %c0_106 = arith.constant 0 : index
    %c0_107 = arith.constant 0 : index
    %260 = vector.load %arg7[%c2_105, %c0_106, %c0_107] : memref<4x8x32xf32, #tpu.memory_space<vmem>>, vector<1x8x32xf32>
    %261 = vector.shape_cast %260 : vector<1x8x32xf32> to vector<8x32xf32>
    %262 = vector.extract_strided_slice %261 {offsets = [0, 0], sizes = [1, 32], strides = [1, 1]} : vector<8x32xf32> to vector<1x32xf32>
    %263 = vector.extract_strided_slice %261 {offsets = [1, 0], sizes = [1, 32], strides = [1, 1]} : vector<8x32xf32> to vector<1x32xf32>
    %264 = vector.extract_strided_slice %261 {offsets = [2, 0], sizes = [1, 32], strides = [1, 1]} : vector<8x32xf32> to vector<1x32xf32>
    %265 = vector.extract_strided_slice %261 {offsets = [3, 0], sizes = [1, 32], strides = [1, 1]} : vector<8x32xf32> to vector<1x32xf32>
    %266 = vector.extract_strided_slice %261 {offsets = [4, 0], sizes = [1, 32], strides = [1, 1]} : vector<8x32xf32> to vector<1x32xf32>
    %267 = vector.extract_strided_slice %261 {offsets = [5, 0], sizes = [1, 32], strides = [1, 1]} : vector<8x32xf32> to vector<1x32xf32>
    %268 = vector.extract_strided_slice %261 {offsets = [6, 0], sizes = [1, 32], strides = [1, 1]} : vector<8x32xf32> to vector<1x32xf32>
    %269 = vector.extract_strided_slice %261 {offsets = [7, 0], sizes = [1, 32], strides = [1, 1]} : vector<8x32xf32> to vector<1x32xf32>
    %c2_108 = arith.constant 2 : index
    %c0_109 = arith.constant 0 : index
    %c0_110 = arith.constant 0 : index
    %270 = vector.load %arg8[%c2_108, %c0_109, %c0_110] : memref<4x1x64xf32, #tpu.memory_space<vmem>>, vector<1x1x64xf32>
    %271 = vector.shape_cast %270 : vector<1x1x64xf32> to vector<1x64xf32>
    %c4 = arith.constant 4 : index
    %c0_111 = arith.constant 0 : index
    %c0_112 = arith.constant 0 : index
    %c0_113 = arith.constant 0 : index
    %272 = vector.load %arg3[%c4, %c0_111, %c0_112, %c0_113] : memref<8x4x8x32xf32, #tpu.memory_space<vmem>>, vector<1x4x8x32xf32>
    %273 = vector.shape_cast %272 : vector<1x4x8x32xf32> to vector<4x8x32xf32>
    %c5 = arith.constant 5 : index
    %c0_114 = arith.constant 0 : index
    %c0_115 = arith.constant 0 : index
    %c0_116 = arith.constant 0 : index
    %274 = vector.load %arg3[%c5, %c0_114, %c0_115, %c0_116] : memref<8x4x8x32xf32, #tpu.memory_space<vmem>>, vector<1x4x8x32xf32>
    %275 = vector.shape_cast %274 : vector<1x4x8x32xf32> to vector<4x8x32xf32>
    %c2_117 = arith.constant 2 : index
    %c0_118 = arith.constant 0 : index
    %c0_119 = arith.constant 0 : index
    %c0_120 = arith.constant 0 : index
    %276 = vector.load %arg4[%c2_117, %c0_118, %c0_119, %c0_120] : memref<4x8x8x32xf32, #tpu.memory_space<vmem>>, vector<1x8x8x32xf32>
    %277 = vector.shape_cast %276 : vector<1x8x8x32xf32> to vector<8x8x32xf32>
    %cst_121 = arith.constant dense<0.000000e+00> : vector<8xf32>
    %278 = vector.multi_reduction <add>, %131, %cst_121 [1] : vector<8x32xf32> to vector<8xf32>
    %279 = vector.shape_cast %278 : vector<8xf32> to vector<8x1xf32>
    %cst_122 = arith.constant 3.200000e+01 : f32
    %280 = vector.broadcast %cst_122 : f32 to vector<8x1xf32>
    %281 = arith.divf %279, %280 : vector<8x1xf32>
    %282 = vector.broadcast %281 : vector<8x1xf32> to vector<8x32xf32>
    %283 = arith.subf %131, %282 : vector<8x32xf32>
    %284 = arith.mulf %283, %283 : vector<8x32xf32>
    %cst_123 = arith.constant dense<0.000000e+00> : vector<8xf32>
    %285 = vector.multi_reduction <add>, %284, %cst_123 [1] : vector<8x32xf32> to vector<8xf32>
    %286 = vector.shape_cast %285 : vector<8xf32> to vector<8x1xf32>
    %cst_124 = arith.constant 3.200000e+01 : f32
    %287 = vector.broadcast %cst_124 : f32 to vector<8x1xf32>
    %288 = arith.divf %286, %287 : vector<8x1xf32>
    %289 = vector.broadcast %281 : vector<8x1xf32> to vector<8x32xf32>
    %290 = arith.subf %131, %289 : vector<8x32xf32>
    %cst_125 = arith.constant 9.99999974E-6 : f32
    %291 = vector.broadcast %cst_125 : f32 to vector<8x1xf32>
    %292 = arith.addf %288, %291 : vector<8x1xf32>
    %293 = math.rsqrt %292 : vector<8x1xf32>
    %294 = vector.broadcast %293 : vector<8x1xf32> to vector<8x32xf32>
    %295 = arith.mulf %290, %294 : vector<8x32xf32>
    %296 = vector.broadcast %262 : vector<1x32xf32> to vector<8x32xf32>
    %297 = arith.mulf %295, %296 : vector<8x32xf32>
    %298 = vector.broadcast %263 : vector<1x32xf32> to vector<8x32xf32>
    %299 = arith.addf %297, %298 : vector<8x32xf32>
    %300 = vector.shape_cast %299 : vector<8x32xf32> to vector<1x8x32xf32>
    %301 = vector.broadcast %300 : vector<1x8x32xf32> to vector<4x8x32xf32>
    %302 = vector.shape_cast %259 : vector<8x32xf32> to vector<1x8x32xf32>
    %303 = vector.broadcast %302 : vector<1x8x32xf32> to vector<8x8x32xf32>
    "tpu.trace_start"() <{level = 10 : i32, message = "hnD,hdD->hnd"}> : () -> ()
    %cst_126 = arith.constant dense<0.000000e+00> : vector<4x8x8xf32>
    %304 = tpu.matmul %301, %273, %cst_126 {dimension_numbers = #tpu.dot_dimension_numbers<[2], [2], [1], [1], [0, 0, 0, 1, 1, 1], [0], [0]>} : vector<4x8x32xf32>, vector<4x8x32xf32>, vector<4x8x8xf32> -> vector<4x8x8xf32>
    "tpu.trace_stop"() : () -> ()
    "tpu.trace_start"() <{level = 10 : i32, message = "hmD,hdD->hmd"}> : () -> ()
    %cst_127 = arith.constant dense<0.000000e+00> : vector<8x8x8xf32>
    %305 = tpu.matmul %303, %277, %cst_127 {dimension_numbers = #tpu.dot_dimension_numbers<[2], [2], [1], [1], [0, 0, 0, 1, 1, 1], [0], [0]>} : vector<8x8x32xf32>, vector<8x8x32xf32>, vector<8x8x8xf32> -> vector<8x8x8xf32>
    "tpu.trace_stop"() : () -> ()
    %306 = vector.extract_strided_slice %305 {offsets = [0, 0, 0], sizes = [4, 8, 8], strides = [1, 1, 1]} : vector<8x8x8xf32> to vector<4x8x8xf32>
    %307 = vector.extract_strided_slice %305 {offsets = [4, 0, 0], sizes = [4, 8, 8], strides = [1, 1, 1]} : vector<8x8x8xf32> to vector<4x8x8xf32>
    "tpu.trace_start"() <{level = 10 : i32, message = "hnd,hmd->hnm"}> : () -> ()
    %cst_128 = arith.constant dense<0.000000e+00> : vector<4x8x8xf32>
    %308 = tpu.matmul %304, %306, %cst_128 {dimension_numbers = #tpu.dot_dimension_numbers<[2], [2], [1], [1], [0, 0, 0, 1, 1, 1], [0], [0]>} : vector<4x8x8xf32>, vector<4x8x8xf32>, vector<4x8x8xf32> -> vector<4x8x8xf32>
    "tpu.trace_stop"() : () -> ()
    %cst_129 = arith.constant dense<0xFF800000> : vector<4x8xf32>
    %309 = vector.multi_reduction <maximumf>, %308, %cst_129 [2] : vector<4x8x8xf32> to vector<4x8xf32>
    %310 = vector.shape_cast %309 : vector<4x8xf32> to vector<4x8x1xf32>
    %311 = vector.broadcast %310 : vector<4x8x1xf32> to vector<4x8x8xf32>
    %312 = arith.subf %308, %311 : vector<4x8x8xf32>
    %313 = math.exp %312 : vector<4x8x8xf32>
    %cst_130 = arith.constant dense<0.000000e+00> : vector<4x8xf32>
    %314 = vector.multi_reduction <add>, %313, %cst_130 [2] : vector<4x8x8xf32> to vector<4x8xf32>
    %315 = vector.shape_cast %314 : vector<4x8xf32> to vector<4x8x1xf32>
    %316 = vector.broadcast %315 : vector<4x8x1xf32> to vector<4x8x8xf32>
    %317 = arith.divf %313, %316 : vector<4x8x8xf32>
    "tpu.trace_start"() <{level = 10 : i32, message = "hnm,hmd->hnd"}> : () -> ()
    %cst_131 = arith.constant dense<0.000000e+00> : vector<4x8x8xf32>
    %318 = tpu.matmul %317, %307, %cst_131 {dimension_numbers = #tpu.dot_dimension_numbers<[2], [1], [1], [2], [0, 0, 0, 1, 1, 2], [0], [0]>} : vector<4x8x8xf32>, vector<4x8x8xf32>, vector<4x8x8xf32> -> vector<4x8x8xf32>
    "tpu.trace_stop"() : () -> ()
    "tpu.trace_start"() <{level = 10 : i32, message = "hnd,hdD->hnD"}> : () -> ()
    %cst_132 = arith.constant dense<0.000000e+00> : vector<4x8x32xf32>
    %319 = tpu.matmul %318, %275, %cst_132 {dimension_numbers = #tpu.dot_dimension_numbers<[2], [1], [1], [2], [0, 0, 0, 1, 1, 2], [0], [0]>} : vector<4x8x8xf32>, vector<4x8x32xf32>, vector<4x8x32xf32> -> vector<4x8x32xf32>
    "tpu.trace_stop"() : () -> ()
    %cst_133 = arith.constant dense<0.000000e+00> : vector<8x32xf32>
    %320 = vector.multi_reduction <add>, %319, %cst_133 [0] : vector<4x8x32xf32> to vector<8x32xf32>
    %321 = vector.broadcast %268 : vector<1x32xf32> to vector<8x32xf32>
    %322 = arith.addf %320, %321 : vector<8x32xf32>
    %323 = arith.addf %322, %131 : vector<8x32xf32>
    %cst_134 = arith.constant dense<0.000000e+00> : vector<8xf32>
    %324 = vector.multi_reduction <add>, %323, %cst_134 [1] : vector<8x32xf32> to vector<8xf32>
    %325 = vector.shape_cast %324 : vector<8xf32> to vector<8x1xf32>
    %cst_135 = arith.constant 3.200000e+01 : f32
    %326 = vector.broadcast %cst_135 : f32 to vector<8x1xf32>
    %327 = arith.divf %325, %326 : vector<8x1xf32>
    %328 = vector.broadcast %327 : vector<8x1xf32> to vector<8x32xf32>
    %329 = arith.subf %323, %328 : vector<8x32xf32>
    %330 = arith.mulf %329, %329 : vector<8x32xf32>
    %cst_136 = arith.constant dense<0.000000e+00> : vector<8xf32>
    %331 = vector.multi_reduction <add>, %330, %cst_136 [1] : vector<8x32xf32> to vector<8xf32>
    %332 = vector.shape_cast %331 : vector<8xf32> to vector<8x1xf32>
    %cst_137 = arith.constant 3.200000e+01 : f32
    %333 = vector.broadcast %cst_137 : f32 to vector<8x1xf32>
    %334 = arith.divf %332, %333 : vector<8x1xf32>
    %335 = vector.broadcast %327 : vector<8x1xf32> to vector<8x32xf32>
    %336 = arith.subf %323, %335 : vector<8x32xf32>
    %cst_138 = arith.constant 9.99999974E-6 : f32
    %337 = vector.broadcast %cst_138 : f32 to vector<8x1xf32>
    %338 = arith.addf %334, %337 : vector<8x1xf32>
    %339 = math.rsqrt %338 : vector<8x1xf32>
    %340 = vector.broadcast %339 : vector<8x1xf32> to vector<8x32xf32>
    %341 = arith.mulf %336, %340 : vector<8x32xf32>
    %342 = vector.broadcast %264 : vector<1x32xf32> to vector<8x32xf32>
    %343 = arith.mulf %341, %342 : vector<8x32xf32>
    %344 = vector.broadcast %265 : vector<1x32xf32> to vector<8x32xf32>
    %345 = arith.addf %343, %344 : vector<8x32xf32>
    %c2_139 = arith.constant 2 : index
    %c0_140 = arith.constant 0 : index
    %c0_141 = arith.constant 0 : index
    %346 = vector.load %arg5[%c2_139, %c0_140, %c0_141] : memref<4x32x64xf32, #tpu.memory_space<vmem>>, vector<1x32x64xf32>
    %347 = vector.shape_cast %346 : vector<1x32x64xf32> to vector<32x64xf32>
    %cst_142 = arith.constant dense<0.000000e+00> : vector<8x64xf32>
    %348 = tpu.matmul %345, %347, %cst_142 {dimension_numbers = #tpu.dot_dimension_numbers<[1], [0], [0], [1], [0, 0, 1, 1], [], []>} : vector<8x32xf32>, vector<32x64xf32>, vector<8x64xf32> -> vector<8x64xf32>
    %349 = vector.broadcast %271 : vector<1x64xf32> to vector<8x64xf32>
    %350 = arith.addf %348, %349 : vector<8x64xf32>
    %cst_143 = arith.constant 5.000000e-01 : f32
    %351 = vector.broadcast %cst_143 : f32 to vector<8x64xf32>
    %352 = arith.mulf %351, %350 : vector<8x64xf32>
    %cst_144 = arith.constant 1.41421354 : f32
    %353 = vector.broadcast %cst_144 : f32 to vector<8x64xf32>
    %354 = arith.divf %350, %353 : vector<8x64xf32>
    %355 = math.erf %354 : vector<8x64xf32>
    %cst_145 = arith.constant 1.000000e+00 : f32
    %356 = vector.broadcast %cst_145 : f32 to vector<8x64xf32>
    %357 = arith.addf %356, %355 : vector<8x64xf32>
    %358 = arith.mulf %352, %357 : vector<8x64xf32>
    %c2_146 = arith.constant 2 : index
    %c0_147 = arith.constant 0 : index
    %c0_148 = arith.constant 0 : index
    %359 = vector.load %arg6[%c2_146, %c0_147, %c0_148] : memref<4x64x32xf32, #tpu.memory_space<vmem>>, vector<1x64x32xf32>
    %360 = vector.shape_cast %359 : vector<1x64x32xf32> to vector<64x32xf32>
    %cst_149 = arith.constant dense<0.000000e+00> : vector<8x32xf32>
    %361 = tpu.matmul %358, %360, %cst_149 {dimension_numbers = #tpu.dot_dimension_numbers<[1], [0], [0], [1], [0, 0, 1, 1], [], []>} : vector<8x64xf32>, vector<64x32xf32>, vector<8x32xf32> -> vector<8x32xf32>
    %362 = vector.broadcast %269 : vector<1x32xf32> to vector<8x32xf32>
    %363 = arith.addf %361, %362 : vector<8x32xf32>
    %364 = arith.addf %363, %323 : vector<8x32xf32>
    %cst_150 = arith.constant dense<0.000000e+00> : vector<8xf32>
    %365 = vector.multi_reduction <add>, %364, %cst_150 [1] : vector<8x32xf32> to vector<8xf32>
    %366 = vector.shape_cast %365 : vector<8xf32> to vector<8x1xf32>
    %cst_151 = arith.constant 3.200000e+01 : f32
    %367 = vector.broadcast %cst_151 : f32 to vector<8x1xf32>
    %368 = arith.divf %366, %367 : vector<8x1xf32>
    %369 = vector.broadcast %368 : vector<8x1xf32> to vector<8x32xf32>
    %370 = arith.subf %364, %369 : vector<8x32xf32>
    %371 = arith.mulf %370, %370 : vector<8x32xf32>
    %cst_152 = arith.constant dense<0.000000e+00> : vector<8xf32>
    %372 = vector.multi_reduction <add>, %371, %cst_152 [1] : vector<8x32xf32> to vector<8xf32>
    %373 = vector.shape_cast %372 : vector<8xf32> to vector<8x1xf32>
    %cst_153 = arith.constant 3.200000e+01 : f32
    %374 = vector.broadcast %cst_153 : f32 to vector<8x1xf32>
    %375 = arith.divf %373, %374 : vector<8x1xf32>
    %376 = vector.broadcast %368 : vector<8x1xf32> to vector<8x32xf32>
    %377 = arith.subf %364, %376 : vector<8x32xf32>
    %cst_154 = arith.constant 9.99999974E-6 : f32
    %378 = vector.broadcast %cst_154 : f32 to vector<8x1xf32>
    %379 = arith.addf %375, %378 : vector<8x1xf32>
    %380 = math.rsqrt %379 : vector<8x1xf32>
    %381 = vector.broadcast %380 : vector<8x1xf32> to vector<8x32xf32>
    %382 = arith.mulf %377, %381 : vector<8x32xf32>
    %383 = vector.broadcast %266 : vector<1x32xf32> to vector<8x32xf32>
    %384 = arith.mulf %382, %383 : vector<8x32xf32>
    %385 = vector.broadcast %267 : vector<1x32xf32> to vector<8x32xf32>
    %386 = arith.addf %384, %385 : vector<8x32xf32>
    %387 = arith.addf %386, %131 : vector<8x32xf32>
    %c3_155 = arith.constant 3 : index
    %c0_156 = arith.constant 0 : index
    %c0_157 = arith.constant 0 : index
    %388 = vector.load %arg7[%c3_155, %c0_156, %c0_157] : memref<4x8x32xf32, #tpu.memory_space<vmem>>, vector<1x8x32xf32>
    %389 = vector.shape_cast %388 : vector<1x8x32xf32> to vector<8x32xf32>
    %390 = vector.extract_strided_slice %389 {offsets = [0, 0], sizes = [1, 32], strides = [1, 1]} : vector<8x32xf32> to vector<1x32xf32>
    %391 = vector.extract_strided_slice %389 {offsets = [1, 0], sizes = [1, 32], strides = [1, 1]} : vector<8x32xf32> to vector<1x32xf32>
    %392 = vector.extract_strided_slice %389 {offsets = [2, 0], sizes = [1, 32], strides = [1, 1]} : vector<8x32xf32> to vector<1x32xf32>
    %393 = vector.extract_strided_slice %389 {offsets = [3, 0], sizes = [1, 32], strides = [1, 1]} : vector<8x32xf32> to vector<1x32xf32>
    %394 = vector.extract_strided_slice %389 {offsets = [4, 0], sizes = [1, 32], strides = [1, 1]} : vector<8x32xf32> to vector<1x32xf32>
    %395 = vector.extract_strided_slice %389 {offsets = [5, 0], sizes = [1, 32], strides = [1, 1]} : vector<8x32xf32> to vector<1x32xf32>
    %396 = vector.extract_strided_slice %389 {offsets = [6, 0], sizes = [1, 32], strides = [1, 1]} : vector<8x32xf32> to vector<1x32xf32>
    %397 = vector.extract_strided_slice %389 {offsets = [7, 0], sizes = [1, 32], strides = [1, 1]} : vector<8x32xf32> to vector<1x32xf32>
    %c3_158 = arith.constant 3 : index
    %c0_159 = arith.constant 0 : index
    %c0_160 = arith.constant 0 : index
    %398 = vector.load %arg8[%c3_158, %c0_159, %c0_160] : memref<4x1x64xf32, #tpu.memory_space<vmem>>, vector<1x1x64xf32>
    %399 = vector.shape_cast %398 : vector<1x1x64xf32> to vector<1x64xf32>
    %c6 = arith.constant 6 : index
    %c0_161 = arith.constant 0 : index
    %c0_162 = arith.constant 0 : index
    %c0_163 = arith.constant 0 : index
    %400 = vector.load %arg3[%c6, %c0_161, %c0_162, %c0_163] : memref<8x4x8x32xf32, #tpu.memory_space<vmem>>, vector<1x4x8x32xf32>
    %401 = vector.shape_cast %400 : vector<1x4x8x32xf32> to vector<4x8x32xf32>
    %c7 = arith.constant 7 : index
    %c0_164 = arith.constant 0 : index
    %c0_165 = arith.constant 0 : index
    %c0_166 = arith.constant 0 : index
    %402 = vector.load %arg3[%c7, %c0_164, %c0_165, %c0_166] : memref<8x4x8x32xf32, #tpu.memory_space<vmem>>, vector<1x4x8x32xf32>
    %403 = vector.shape_cast %402 : vector<1x4x8x32xf32> to vector<4x8x32xf32>
    %c3_167 = arith.constant 3 : index
    %c0_168 = arith.constant 0 : index
    %c0_169 = arith.constant 0 : index
    %c0_170 = arith.constant 0 : index
    %404 = vector.load %arg4[%c3_167, %c0_168, %c0_169, %c0_170] : memref<4x8x8x32xf32, #tpu.memory_space<vmem>>, vector<1x8x8x32xf32>
    %405 = vector.shape_cast %404 : vector<1x8x8x32xf32> to vector<8x8x32xf32>
    %cst_171 = arith.constant dense<0.000000e+00> : vector<8xf32>
    %406 = vector.multi_reduction <add>, %259, %cst_171 [1] : vector<8x32xf32> to vector<8xf32>
    %407 = vector.shape_cast %406 : vector<8xf32> to vector<8x1xf32>
    %cst_172 = arith.constant 3.200000e+01 : f32
    %408 = vector.broadcast %cst_172 : f32 to vector<8x1xf32>
    %409 = arith.divf %407, %408 : vector<8x1xf32>
    %410 = vector.broadcast %409 : vector<8x1xf32> to vector<8x32xf32>
    %411 = arith.subf %259, %410 : vector<8x32xf32>
    %412 = arith.mulf %411, %411 : vector<8x32xf32>
    %cst_173 = arith.constant dense<0.000000e+00> : vector<8xf32>
    %413 = vector.multi_reduction <add>, %412, %cst_173 [1] : vector<8x32xf32> to vector<8xf32>
    %414 = vector.shape_cast %413 : vector<8xf32> to vector<8x1xf32>
    %cst_174 = arith.constant 3.200000e+01 : f32
    %415 = vector.broadcast %cst_174 : f32 to vector<8x1xf32>
    %416 = arith.divf %414, %415 : vector<8x1xf32>
    %417 = vector.broadcast %409 : vector<8x1xf32> to vector<8x32xf32>
    %418 = arith.subf %259, %417 : vector<8x32xf32>
    %cst_175 = arith.constant 9.99999974E-6 : f32
    %419 = vector.broadcast %cst_175 : f32 to vector<8x1xf32>
    %420 = arith.addf %416, %419 : vector<8x1xf32>
    %421 = math.rsqrt %420 : vector<8x1xf32>
    %422 = vector.broadcast %421 : vector<8x1xf32> to vector<8x32xf32>
    %423 = arith.mulf %418, %422 : vector<8x32xf32>
    %424 = vector.broadcast %390 : vector<1x32xf32> to vector<8x32xf32>
    %425 = arith.mulf %423, %424 : vector<8x32xf32>
    %426 = vector.broadcast %391 : vector<1x32xf32> to vector<8x32xf32>
    %427 = arith.addf %425, %426 : vector<8x32xf32>
    %428 = vector.shape_cast %427 : vector<8x32xf32> to vector<1x8x32xf32>
    %429 = vector.broadcast %428 : vector<1x8x32xf32> to vector<4x8x32xf32>
    %430 = vector.shape_cast %387 : vector<8x32xf32> to vector<1x8x32xf32>
    %431 = vector.broadcast %430 : vector<1x8x32xf32> to vector<8x8x32xf32>
    "tpu.trace_start"() <{level = 10 : i32, message = "hnD,hdD->hnd"}> : () -> ()
    %cst_176 = arith.constant dense<0.000000e+00> : vector<4x8x8xf32>
    %432 = tpu.matmul %429, %401, %cst_176 {dimension_numbers = #tpu.dot_dimension_numbers<[2], [2], [1], [1], [0, 0, 0, 1, 1, 1], [0], [0]>} : vector<4x8x32xf32>, vector<4x8x32xf32>, vector<4x8x8xf32> -> vector<4x8x8xf32>
    "tpu.trace_stop"() : () -> ()
    "tpu.trace_start"() <{level = 10 : i32, message = "hmD,hdD->hmd"}> : () -> ()
    %cst_177 = arith.constant dense<0.000000e+00> : vector<8x8x8xf32>
    %433 = tpu.matmul %431, %405, %cst_177 {dimension_numbers = #tpu.dot_dimension_numbers<[2], [2], [1], [1], [0, 0, 0, 1, 1, 1], [0], [0]>} : vector<8x8x32xf32>, vector<8x8x32xf32>, vector<8x8x8xf32> -> vector<8x8x8xf32>
    "tpu.trace_stop"() : () -> ()
    %434 = vector.extract_strided_slice %433 {offsets = [0, 0, 0], sizes = [4, 8, 8], strides = [1, 1, 1]} : vector<8x8x8xf32> to vector<4x8x8xf32>
    %435 = vector.extract_strided_slice %433 {offsets = [4, 0, 0], sizes = [4, 8, 8], strides = [1, 1, 1]} : vector<8x8x8xf32> to vector<4x8x8xf32>
    "tpu.trace_start"() <{level = 10 : i32, message = "hnd,hmd->hnm"}> : () -> ()
    %cst_178 = arith.constant dense<0.000000e+00> : vector<4x8x8xf32>
    %436 = tpu.matmul %432, %434, %cst_178 {dimension_numbers = #tpu.dot_dimension_numbers<[2], [2], [1], [1], [0, 0, 0, 1, 1, 1], [0], [0]>} : vector<4x8x8xf32>, vector<4x8x8xf32>, vector<4x8x8xf32> -> vector<4x8x8xf32>
    "tpu.trace_stop"() : () -> ()
    %cst_179 = arith.constant dense<0xFF800000> : vector<4x8xf32>
    %437 = vector.multi_reduction <maximumf>, %436, %cst_179 [2] : vector<4x8x8xf32> to vector<4x8xf32>
    %438 = vector.shape_cast %437 : vector<4x8xf32> to vector<4x8x1xf32>
    %439 = vector.broadcast %438 : vector<4x8x1xf32> to vector<4x8x8xf32>
    %440 = arith.subf %436, %439 : vector<4x8x8xf32>
    %441 = math.exp %440 : vector<4x8x8xf32>
    %cst_180 = arith.constant dense<0.000000e+00> : vector<4x8xf32>
    %442 = vector.multi_reduction <add>, %441, %cst_180 [2] : vector<4x8x8xf32> to vector<4x8xf32>
    %443 = vector.shape_cast %442 : vector<4x8xf32> to vector<4x8x1xf32>
    %444 = vector.broadcast %443 : vector<4x8x1xf32> to vector<4x8x8xf32>
    %445 = arith.divf %441, %444 : vector<4x8x8xf32>
    "tpu.trace_start"() <{level = 10 : i32, message = "hnm,hmd->hnd"}> : () -> ()
    %cst_181 = arith.constant dense<0.000000e+00> : vector<4x8x8xf32>
    %446 = tpu.matmul %445, %435, %cst_181 {dimension_numbers = #tpu.dot_dimension_numbers<[2], [1], [1], [2], [0, 0, 0, 1, 1, 2], [0], [0]>} : vector<4x8x8xf32>, vector<4x8x8xf32>, vector<4x8x8xf32> -> vector<4x8x8xf32>
    "tpu.trace_stop"() : () -> ()
    "tpu.trace_start"() <{level = 10 : i32, message = "hnd,hdD->hnD"}> : () -> ()
    %cst_182 = arith.constant dense<0.000000e+00> : vector<4x8x32xf32>
    %447 = tpu.matmul %446, %403, %cst_182 {dimension_numbers = #tpu.dot_dimension_numbers<[2], [1], [1], [2], [0, 0, 0, 1, 1, 2], [0], [0]>} : vector<4x8x8xf32>, vector<4x8x32xf32>, vector<4x8x32xf32> -> vector<4x8x32xf32>
    "tpu.trace_stop"() : () -> ()
    %cst_183 = arith.constant dense<0.000000e+00> : vector<8x32xf32>
    %448 = vector.multi_reduction <add>, %447, %cst_183 [0] : vector<4x8x32xf32> to vector<8x32xf32>
    %449 = vector.broadcast %396 : vector<1x32xf32> to vector<8x32xf32>
    %450 = arith.addf %448, %449 : vector<8x32xf32>
    %451 = arith.addf %450, %259 : vector<8x32xf32>
    %cst_184 = arith.constant dense<0.000000e+00> : vector<8xf32>
    %452 = vector.multi_reduction <add>, %451, %cst_184 [1] : vector<8x32xf32> to vector<8xf32>
    %453 = vector.shape_cast %452 : vector<8xf32> to vector<8x1xf32>
    %cst_185 = arith.constant 3.200000e+01 : f32
    %454 = vector.broadcast %cst_185 : f32 to vector<8x1xf32>
    %455 = arith.divf %453, %454 : vector<8x1xf32>
    %456 = vector.broadcast %455 : vector<8x1xf32> to vector<8x32xf32>
    %457 = arith.subf %451, %456 : vector<8x32xf32>
    %458 = arith.mulf %457, %457 : vector<8x32xf32>
    %cst_186 = arith.constant dense<0.000000e+00> : vector<8xf32>
    %459 = vector.multi_reduction <add>, %458, %cst_186 [1] : vector<8x32xf32> to vector<8xf32>
    %460 = vector.shape_cast %459 : vector<8xf32> to vector<8x1xf32>
    %cst_187 = arith.constant 3.200000e+01 : f32
    %461 = vector.broadcast %cst_187 : f32 to vector<8x1xf32>
    %462 = arith.divf %460, %461 : vector<8x1xf32>
    %463 = vector.broadcast %455 : vector<8x1xf32> to vector<8x32xf32>
    %464 = arith.subf %451, %463 : vector<8x32xf32>
    %cst_188 = arith.constant 9.99999974E-6 : f32
    %465 = vector.broadcast %cst_188 : f32 to vector<8x1xf32>
    %466 = arith.addf %462, %465 : vector<8x1xf32>
    %467 = math.rsqrt %466 : vector<8x1xf32>
    %468 = vector.broadcast %467 : vector<8x1xf32> to vector<8x32xf32>
    %469 = arith.mulf %464, %468 : vector<8x32xf32>
    %470 = vector.broadcast %392 : vector<1x32xf32> to vector<8x32xf32>
    %471 = arith.mulf %469, %470 : vector<8x32xf32>
    %472 = vector.broadcast %393 : vector<1x32xf32> to vector<8x32xf32>
    %473 = arith.addf %471, %472 : vector<8x32xf32>
    %c3_189 = arith.constant 3 : index
    %c0_190 = arith.constant 0 : index
    %c0_191 = arith.constant 0 : index
    %474 = vector.load %arg5[%c3_189, %c0_190, %c0_191] : memref<4x32x64xf32, #tpu.memory_space<vmem>>, vector<1x32x64xf32>
    %475 = vector.shape_cast %474 : vector<1x32x64xf32> to vector<32x64xf32>
    %cst_192 = arith.constant dense<0.000000e+00> : vector<8x64xf32>
    %476 = tpu.matmul %473, %475, %cst_192 {dimension_numbers = #tpu.dot_dimension_numbers<[1], [0], [0], [1], [0, 0, 1, 1], [], []>} : vector<8x32xf32>, vector<32x64xf32>, vector<8x64xf32> -> vector<8x64xf32>
    %477 = vector.broadcast %399 : vector<1x64xf32> to vector<8x64xf32>
    %478 = arith.addf %476, %477 : vector<8x64xf32>
    %cst_193 = arith.constant 5.000000e-01 : f32
    %479 = vector.broadcast %cst_193 : f32 to vector<8x64xf32>
    %480 = arith.mulf %479, %478 : vector<8x64xf32>
    %cst_194 = arith.constant 1.41421354 : f32
    %481 = vector.broadcast %cst_194 : f32 to vector<8x64xf32>
    %482 = arith.divf %478, %481 : vector<8x64xf32>
    %483 = math.erf %482 : vector<8x64xf32>
    %cst_195 = arith.constant 1.000000e+00 : f32
    %484 = vector.broadcast %cst_195 : f32 to vector<8x64xf32>
    %485 = arith.addf %484, %483 : vector<8x64xf32>
    %486 = arith.mulf %480, %485 : vector<8x64xf32>
    %c3_196 = arith.constant 3 : index
    %c0_197 = arith.constant 0 : index
    %c0_198 = arith.constant 0 : index
    %487 = vector.load %arg6[%c3_196, %c0_197, %c0_198] : memref<4x64x32xf32, #tpu.memory_space<vmem>>, vector<1x64x32xf32>
    %488 = vector.shape_cast %487 : vector<1x64x32xf32> to vector<64x32xf32>
    %cst_199 = arith.constant dense<0.000000e+00> : vector<8x32xf32>
    %489 = tpu.matmul %486, %488, %cst_199 {dimension_numbers = #tpu.dot_dimension_numbers<[1], [0], [0], [1], [0, 0, 1, 1], [], []>} : vector<8x64xf32>, vector<64x32xf32>, vector<8x32xf32> -> vector<8x32xf32>
    %490 = vector.broadcast %397 : vector<1x32xf32> to vector<8x32xf32>
    %491 = arith.addf %489, %490 : vector<8x32xf32>
    %492 = arith.addf %491, %451 : vector<8x32xf32>
    %cst_200 = arith.constant dense<0.000000e+00> : vector<8xf32>
    %493 = vector.multi_reduction <add>, %492, %cst_200 [1] : vector<8x32xf32> to vector<8xf32>
    %494 = vector.shape_cast %493 : vector<8xf32> to vector<8x1xf32>
    %cst_201 = arith.constant 3.200000e+01 : f32
    %495 = vector.broadcast %cst_201 : f32 to vector<8x1xf32>
    %496 = arith.divf %494, %495 : vector<8x1xf32>
    %497 = vector.broadcast %496 : vector<8x1xf32> to vector<8x32xf32>
    %498 = arith.subf %492, %497 : vector<8x32xf32>
    %499 = arith.mulf %498, %498 : vector<8x32xf32>
    %cst_202 = arith.constant dense<0.000000e+00> : vector<8xf32>
    %500 = vector.multi_reduction <add>, %499, %cst_202 [1] : vector<8x32xf32> to vector<8xf32>
    %501 = vector.shape_cast %500 : vector<8xf32> to vector<8x1xf32>
    %cst_203 = arith.constant 3.200000e+01 : f32
    %502 = vector.broadcast %cst_203 : f32 to vector<8x1xf32>
    %503 = arith.divf %501, %502 : vector<8x1xf32>
    %504 = vector.broadcast %496 : vector<8x1xf32> to vector<8x32xf32>
    %505 = arith.subf %492, %504 : vector<8x32xf32>
    %cst_204 = arith.constant 9.99999974E-6 : f32
    %506 = vector.broadcast %cst_204 : f32 to vector<8x1xf32>
    %507 = arith.addf %503, %506 : vector<8x1xf32>
    %508 = math.rsqrt %507 : vector<8x1xf32>
    %509 = vector.broadcast %508 : vector<8x1xf32> to vector<8x32xf32>
    %510 = arith.mulf %505, %509 : vector<8x32xf32>
    %511 = vector.broadcast %394 : vector<1x32xf32> to vector<8x32xf32>
    %512 = arith.mulf %510, %511 : vector<8x32xf32>
    %513 = vector.broadcast %395 : vector<1x32xf32> to vector<8x32xf32>
    %514 = arith.addf %512, %513 : vector<8x32xf32>
    %515 = arith.addf %514, %259 : vector<8x32xf32>
    %cst_205 = arith.constant dense<0.000000e+00> : vector<32xf32>
    %516 = vector.multi_reduction <add>, %387, %cst_205 [0] : vector<8x32xf32> to vector<32xf32>
    %517 = vector.shape_cast %516 : vector<32xf32> to vector<1x32xf32>
    %cst_206 = arith.constant 8.000000e+00 : f32
    %518 = vector.broadcast %cst_206 : f32 to vector<1x32xf32>
    %519 = arith.divf %517, %518 : vector<1x32xf32>
    %cst_207 = arith.constant dense<0.000000e+00> : vector<32xf32>
    %520 = vector.multi_reduction <add>, %515, %cst_207 [0] : vector<8x32xf32> to vector<32xf32>
    %521 = vector.shape_cast %520 : vector<32xf32> to vector<1x32xf32>
    %cst_208 = arith.constant 8.000000e+00 : f32
    %522 = vector.broadcast %cst_208 : f32 to vector<1x32xf32>
    %523 = arith.divf %521, %522 : vector<1x32xf32>
    %cst_209 = arith.constant dense<0xFF800000> : vector<32xf32>
    %524 = vector.multi_reduction <maximumf>, %387, %cst_209 [0] : vector<8x32xf32> to vector<32xf32>
    %525 = vector.shape_cast %524 : vector<32xf32> to vector<1x32xf32>
    %cst_210 = arith.constant dense<0xFF800000> : vector<32xf32>
    %526 = vector.multi_reduction <maximumf>, %515, %cst_210 [0] : vector<8x32xf32> to vector<32xf32>
    %527 = vector.shape_cast %526 : vector<32xf32> to vector<1x32xf32>
    %528 = tpu.concatenate %519, %523, %525, %527 in 1 : vector<1x32xf32>, vector<1x32xf32>, vector<1x32xf32>, vector<1x32xf32> -> vector<1x128xf32>
    %c0_211 = arith.constant 0 : index
    %c0_212 = arith.constant 0 : index
    %c0_213 = arith.constant 0 : index
    %529 = vector.load %arg9[%c0_211, %c0_212, %c0_213] : memref<1x1x128xf32, #tpu.memory_space<vmem>>, vector<1x1x128xf32>
    %530 = vector.shape_cast %529 : vector<1x1x128xf32> to vector<1x128xf32>
    %531 = vector.shape_cast %528 : vector<1x128xf32> to vector<1x1x128xf32>
    tpu.vector_store %arg9[%c0_211, %c0_212, %c0_213], %531 {strides = array<i32>} : memref<1x1x128xf32, #tpu.memory_space<vmem>>, vector<1x1x128xf32>,
    return
  }
  func.func @transform_0(%arg0: i32) -> (i32, i32, i32) {
    %c0_i32 = arith.constant 0 : i32
    %c0_i32_0 = arith.constant 0 : i32
    %c0_i32_1 = arith.constant 0 : i32
    return %arg0, %c0_i32, %c0_i32_0 : i32, i32, i32
  }
  func.func @transform_1(%arg0: i32) -> (i32, i32, i32) {
    %c0_i32 = arith.constant 0 : i32
    %c0_i32_0 = arith.constant 0 : i32
    %c0_i32_1 = arith.constant 0 : i32
    return %arg0, %c0_i32, %c0_i32_0 : i32, i32, i32
  }
  func.func @transform_2(%arg0: i32) -> (i32, i32, i32, i32) {
    %c0_i32 = arith.constant 0 : i32
    %c0_i32_0 = arith.constant 0 : i32
    %c0_i32_1 = arith.constant 0 : i32
    %c0_i32_2 = arith.constant 0 : i32
    %c0_i32_3 = arith.constant 0 : i32
    return %c0_i32, %c0_i32_0, %c0_i32_1, %c0_i32_2 : i32, i32, i32, i32
  }
  func.func @transform_3(%arg0: i32) -> (i32, i32, i32, i32) {
    %c0_i32 = arith.constant 0 : i32
    %c0_i32_0 = arith.constant 0 : i32
    %c0_i32_1 = arith.constant 0 : i32
    %c0_i32_2 = arith.constant 0 : i32
    %c0_i32_3 = arith.constant 0 : i32
    return %c0_i32, %c0_i32_0, %c0_i32_1, %c0_i32_2 : i32, i32, i32, i32
  }
  func.func @transform_4(%arg0: i32) -> (i32, i32, i32) {
    %c0_i32 = arith.constant 0 : i32
    %c0_i32_0 = arith.constant 0 : i32
    %c0_i32_1 = arith.constant 0 : i32
    %c0_i32_2 = arith.constant 0 : i32
    return %c0_i32, %c0_i32_0, %c0_i32_1 : i32, i32, i32
  }
  func.func @transform_5(%arg0: i32) -> (i32, i32, i32) {
    %c0_i32 = arith.constant 0 : i32
    %c0_i32_0 = arith.constant 0 : i32
    %c0_i32_1 = arith.constant 0 : i32
    %c0_i32_2 = arith.constant 0 : i32
    return %c0_i32, %c0_i32_0, %c0_i32_1 : i32, i32, i32
  }
  func.func @transform_6(%arg0: i32) -> (i32, i32, i32) {
    %c0_i32 = arith.constant 0 : i32
    %c0_i32_0 = arith.constant 0 : i32
    %c0_i32_1 = arith.constant 0 : i32
    %c0_i32_2 = arith.constant 0 : i32
    return %c0_i32, %c0_i32_0, %c0_i32_1 : i32, i32, i32
  }
  func.func @transform_7(%arg0: i32) -> (i32, i32, i32) {
    %c0_i32 = arith.constant 0 : i32
    %c0_i32_0 = arith.constant 0 : i32
    %c0_i32_1 = arith.constant 0 : i32
    %c0_i32_2 = arith.constant 0 : i32
    return %c0_i32, %c0_i32_0, %c0_i32_1 : i32, i32, i32
  }
  func.func @transform_8(%arg0: i32) -> (i32, i32, i32) {
    %c0_i32 = arith.constant 0 : i32
    %c0_i32_0 = arith.constant 0 : i32
    %c0_i32_1 = arith.constant 0 : i32
    return %arg0, %c0_i32, %c0_i32_0 : i32, i32, i32
  }
}

</mosaic_0001>

<bundles_post_ra>
// kernel: cross_transformer_mod_avg.1
= control target key start
LH: loop header
LB: loop body
LE: loop exit
PB: predicated region body
PF: predicated region fallthrough
CT: control target
= control target key end

     0   :  { %s11768_s0 = inlined_call_operand.hbm [shape: f32[2,8,32], index: 0, kind: input, shape index: {}]   ;;  %s11769_s1 = inlined_call_operand.hbm [shape: f32[2,8,32], index: 1, kind: input, shape index: {}]   ;;  %s11770_s2 = inlined_call_operand.vmem [shape: f32[8,4,8,32], index: 2, kind: input, shape index: {}]   ;;  %s11771_s3 = inlined_call_operand.hbm [shape: f32[4,8,8,32], index: 3, kind: input, shape index: {}]   ;;  %s11772_s4 = inlined_call_operand.vmem [shape: f32[4,32,64], index: 4, kind: input, shape index: {}]   ;;  %s11773_s5 = inlined_call_operand.vmem [shape: f32[4,64,32], index: 5, kind: input, shape index: {}]   ;;  %s11774_s6 = inlined_call_operand.hbm [shape: f32[4,8,32], index: 6, kind: input, shape index: {}]   ;;  %s11775_s7 = inlined_call_operand.vmem [shape: f32[4,1,64], index: 7, kind: input, shape index: {}]   ;;  %s11776_s8 = inlined_call_operand.hbm [shape: f32[2,1,128], index: 8, kind: output, shape index: {}]  }
   0x1   :  { %11784 = sst [smem:[#allocation19_spill]] %s11771_s3 }
   0x2   :  { %11785 = sst [smem:[#allocation20_spill]] %s11774_s6 }
   0x3   :  { %13 = vsyncpa [#allocation3], 0 }
   0x4   :  { %15 = vsyncpa [#allocation3 + $0x1], 0 }
   0x5   :  { %16 = vsyncpa [#allocation6], 0 }
   0x6   :  { %18 = vsyncpa [#allocation6 + $0x1], 0 }
   0x7   :  { %19 = vsyncpa [#allocation9], 0 }
   0x8   :  { %20 = vsyncpa [#allocation4], 0 }
   0x9   :  { %22 = vsyncpa [#allocation4 + $0x1], 0  ;;  %s10463_s27 = smov 0   ;;  %s10465_s28 = smov 0  }
   0xa   :  { %s10467_s29 = smov 0   ;;  %s10469_s30 = smov 0  }
   0xb LB: > { %11786 = sst [smem:[#allocation16_spill]] %s10400_s29  ;;  %s10484_s9 = sadd.s32 4294967295, %s10404_s30   ;;  %s10404_s30 = sphi %s10469_s30, %s11807_s30   ;;  %s10400_s29 = sphi %s10467_s29, %s11809_s29   ;;  %s10396_s28 = sphi %s10465_s28, %s11811_s28   ;;  %s10392_s27 = sphi %s10463_s27, %s11810_s27  }
   0xc   : > { %s8940_s10 = sadd.s32 4294967294, %s10404_s30   ;;  %p48_p0 = scmp.ne.s32.totalorder %s10396_s28, %s10392_s27 }
   0xd   : > { %p11777_p1 = scmp.eq.s32.totalorder %s10484_s9, 0  ;;  %p230_p3 = scmp.eq.s32.totalorder %s8940_s10, 1 }
   0xe   : > { %p8941_p5 = scmp.ge.s32.totalorder %s10404_s30, 1  ;;  %p237_p7 = scmp.lt.s32.totalorder %s10404_s30, 3 }
   0xf   : > { %p10493_p4 = por %p11777_p1, %p48_p0  ;;  %p10498_p6 = por %p230_p3, %p48_p0 }
  0x10   : > { %p10503_p8 = pnand %p8941_p5, %p237_p7  ;;  %s10406_s14 = smov [#allocation7]  }
  0x11   : > { %s11787_s11 = scalar_select %p10493_p4, 1, 0 }
  0x12   : > { %s11788_s12 = scalar_select %p10498_p6, 1, 0 }
  0x13   : > { %s11789_s13 = scalar_select %p10503_p8, 1, 0 }
  0x14   : > { %s252_s15 = sshll.u32 %s10406_s14, 4  ;;  %p10058_p9 = pneg %p10503_p8  ;;  %s253_s15 = int_to_ptr.vmem [resolvable:$true] %s252_s15 }
  0x15   : > { %s10407_s17 = smov [#allocation8]   ;;  %s10231_s19 = scalar_lea.vmem %s253_s15, 4096 }
  0x16   : > { %p10512_p11 = pnand %p10058_p9, %p11777_p1  ;;  %s271_s18 = sshll.u32 %s10407_s17, 4  ;;  %s272_s18 = int_to_ptr.vmem [resolvable:$true] %s271_s18 }
  0x17   : > { %p10232_p13 = scmp.ne.s32.totalorder %s253_s15, %s10231_s19  ;;  %p10239_p5 = scmp.lt.s32.totalorder %s253_s15, %s253_s15 }
  0x18   : > { %p10222_p12 = pneg %p10512_p11  ;;  %p10240_p7 = scmp.lt.s32.totalorder %s10231_s19, %s10231_s19 }
  0x1a   : > { %p10234_p0 = pnand %p10232_p13, %p10222_p12  ;;  %p10241_p10 = por %p10240_p7, %p10239_p5 }
  0x1c   : > { %p10235_p3 = pneg %p10234_p0 }
  0x1e   : > { %p10242_p9 = pnand %p10241_p10, %p10235_p3 }
  0x20   : > { %10245 = shalt.err (!%p10242_p9)
}
  0x21   : > { %s10408_s20 = smov 128   ;;  %s10409_s21 = smov 8  }
  0x22   : > { %s11791_s3 = sld [smem:[#allocation19_spill]]  ;;  %s10257_s24 = scalar_lea.vmem %s272_s18, 512 }
  0x23   : > { %p10258_p1 = scmp.ne.s32.totalorder %s272_s18, %s10257_s24  ;;  %p10265_p2 = scmp.lt.s32.totalorder %s272_s18, %s272_s18 }
  0x24   : > { %p10266_p6 = scmp.lt.s32.totalorder %s10257_s24, %s10257_s24 }
  0x25   : > { %p10260_p13 = pnand %p10258_p1, %p10222_p12 }
  0x26   : > { %p10267_p5 = por %p10266_p6, %p10265_p2 }
  0x27   : > { %p10261_p0 = pneg %p10260_p13 }
  0x28   : > { %10061 = dma.hbm_to_vmem [thread:$0]  (!%p10512_p11), %s11791_s3, 4096, %s253_s15, [#allocation6], %s10408_s20, %s10408_s20, %s10409_s21  }
  0x29   : > { %p10268_p10 = pnand %p10267_p5, %p10261_p0 }
  0x2b   : > { %10271 = shalt.err (!%p10268_p10)
}
  0x2c   : > { %s11792_s6 = sld [smem:[#allocation20_spill]]  ;;  %s10535_s10 = sadd.s32 1, %s10404_s30  }
  0x2d   : > { %11793 = sst [smem:[#allocation17_spill]] %s10535_s10  ;;  %s35_s14 = sadd.s32 1, %s10400_s29 }
  0x2e   : > { %s32_s15 = ssub.s32 %s10404_s30, %s10535_s10  ;;  %p42_p1 = scmp.ne.s32.totalorder %s10400_s29, %s10396_s28 }
  0x2f   : > { %p33_p2 = scmp.eq.s32.totalorder %s32_s15, 0  ;;  %p43_p6 = scmp.eq.s32.totalorder %s10404_s30, 0 }
  0x30   : > { %p11794_p12 = scmp.eq.s32.totalorder %s10484_s9, 1  ;;  %p10078_p7 = scmp.lt.s32.totalorder %s10404_s30, 2 }
  0x31   : > { %s10551_s17 = scalar_select %p33_p2, %s10400_s29, %s35_s14  }
  0x32   : > { %10064 = dma.hbm_to_vmem [thread:$0]  (!%p10512_p11), %s11792_s6, 512, %s272_s18, [#allocation9], %s10408_s20, %s10408_s20, %s10409_s21  }
  0x33   : > { %p10545_p3 = por %p11794_p12, %p42_p1  ;;  %11796 = sst [smem:[#allocation18_spill]] %s10551_s17 }
  0x34   : > { %p44_p9 = por %p43_p6, %p42_p1  ;;  %s288_s19 = sand.u32 1, %s10400_s29  }
  0x35   : > { %s11795_s16 = scalar_select %p10545_p3, 1, 0 }
  0x36   : > { %s10554_s18 = sshll.u32 %s288_s19, 3  ;;  %s8946_s20 = sshll.u32 %s10404_s30, 7 }
  0x37   : > { %s10560_s23 = scalar_lea.hbm %s11768_s0, %s8946_s20  ;;  %s292_s24 = scalar_lea.vmem [#allocation2], %s10554_s18 }
  0x38   : > { %s299_s25 = sshll.u32 %s292_s24, 4  ;;  %p10565_p11 = pnand %p10078_p7, %p44_p9  ;;  %s10563_s25 = int_to_ptr.vmem [resolvable:$true] %s299_s25 }
  0x39   : > { %s10572_s3 = scalar_lea.hbm %s11769_s1, %s8946_s20  ;;  %s306_s21 = sand.u32 1, %s10404_s30  }
  0x3a   : > { %s289_s22 = scalar_lea.sflag [#allocation3], %s288_s19  ;;  %s10272_s6 = scalar_lea.hbm %s10560_s23, 128 }
  0x3b   : > { %p10273_p13 = scmp.ne.s32.totalorder %s10560_s23, %s10272_s6  ;;  %p10274_p0 = pneg %p10565_p11 }
  0x3c   : > { %s10277_s29 = scalar_lea.hbm %s11768_s0, 256  ;;  %p10278_p1 = scmp.lt.s32.totalorder %s10560_s23, %s11768_s0 }
  0x3d   : > { %p10275_p5 = pnand %p10274_p0, %p10273_p13  ;;  %p10279_p2 = scmp.lt.s32.totalorder %s10277_s29, %s10272_s6 }
  0x3f   : > { %p10276_p10 = pneg %p10275_p5  ;;  %p10280_p6 = por %p10279_p2, %p10278_p1 }
  0x41   : > { %p10281_p12 = pnand %p10280_p6, %p10276_p10 }
  0x43   : > { %10284 = shalt.err (!%p10281_p12)
}
  0x44   : > { %s10285_s19 = scalar_lea.vmem %s10563_s25, 128  ;;  %s10410_s17 = smov [#allocation2]  }
  0x45   : > { %p10286_p7 = scmp.ne.s32.totalorder %s10563_s25, %s10285_s19  ;;  %s10290_s20 = sshll.u32 %s10410_s17, 4  ;;  %s10291_s20 = int_to_ptr.vmem [resolvable:$false] %s10290_s20 }
  0x46   : > { %s10292_s15 = scalar_lea.vmem %s10291_s20, 256  ;;  %p10293_p5 = scmp.lt.s32.totalorder %s10563_s25, %s10291_s20 }
  0x47   : > { %p10288_p9 = pnand %p10286_p7, %p10274_p0  ;;  %p10294_p3 = scmp.lt.s32.totalorder %s10292_s15, %s10285_s19 }
  0x49   : > { %p10289_p13 = pneg %p10288_p9  ;;  %p10295_p4 = por %p10294_p3, %p10293_p5 }
  0x4b   : > { %p10296_p1 = pnand %p10295_p4, %p10289_p13 }
  0x4d   : > { %10299 = shalt.err (!%p10296_p1)
}
  0x4e   : > { %10068 = dma.hbm_to_vmem [thread:$0]  (!%p10565_p11), %s10560_s23, 128, %s10563_s25, %s289_s22  }
  0x4f   : > { %s310_s6 = scalar_lea.vmem [#allocation5], %s10554_s18  ;;  %s307_s10 = scalar_lea.sflag [#allocation6], %s306_s21 }
  0x50   : > { %s317_s29 = sshll.u32 %s310_s6, 4  ;;  %s10300_s24 = scalar_lea.hbm %s10572_s3, 128  ;;  %s318_s29 = int_to_ptr.vmem [resolvable:$true] %s317_s29 }
  0x51   : > { %p10301_p3 = scmp.ne.s32.totalorder %s10572_s3, %s10300_s24  ;;  %s10305_s17 = scalar_lea.hbm %s11769_s1, 256 }
  0x52   : > { %p10306_p2 = scmp.lt.s32.totalorder %s10572_s3, %s11769_s1  ;;  %p10307_p6 = scmp.lt.s32.totalorder %s10305_s17, %s10300_s24 }
  0x53   : > { %p10303_p4 = pnand %p10301_p3, %p10274_p0 }
  0x54   : > { %p10308_p12 = por %p10307_p6, %p10306_p2 }
  0x55   : > { %p10304_p10 = pneg %p10303_p4 }
  0x57   : > { %p10309_p7 = pnand %p10308_p12, %p10304_p10 }
  0x59   : > { %10312 = shalt.err (!%p10309_p7)
}
  0x5a   : > { %s10313_s18 = scalar_lea.vmem %s318_s29, 128  ;;  %s10411_s23 = smov [#allocation5]  }
  0x5b   : > { %p10314_p9 = scmp.ne.s32.totalorder %s318_s29, %s10313_s18  ;;  %s10318_s25 = sshll.u32 %s10411_s23, 4  ;;  %s10319_s25 = int_to_ptr.vmem [resolvable:$false] %s10318_s25 }
  0x5c   : > { %s10320_s21 = scalar_lea.vmem %s10319_s25, 256  ;;  %p10321_p1 = scmp.lt.s32.totalorder %s318_s29, %s10319_s25 }
  0x5d   : > { %p10316_p13 = pnand %p10314_p9, %p10274_p0  ;;  %p10322_p3 = scmp.lt.s32.totalorder %s10320_s21, %s10313_s18 }
  0x5f   : > { %p10317_p5 = pneg %p10316_p13  ;;  %p10323_p4 = por %p10322_p3, %p10321_p1 }
  0x61   : > { %p10324_p8 = pnand %p10323_p4, %p10317_p5 }
  0x63   : > { %10327 = shalt.err (!%p10324_p8)
}
  0x64   : > { %10071 = dma.hbm_to_vmem [thread:$0]  (!%p10565_p11), %s10572_s3, 128, %s318_s29, %s307_s10  }
  0x65   : > { %p11798_p10 = scmp.ne.s32.totalorder %s11789_s13, 0 }
  0x66   : > { %s10623_s22 = sand.u32 (!%p11798_p10), 1, %s10396_s28   ;;  %p11799_p0 = scmp.ne.s32.totalorder (!%p11798_p10), %s11787_s11, 0 }
  0x67   : > { %326 = sbr.rel (%p11798_p10) target bundleno = 9110 (0x2396), region = 52  ;;  %s8950_s6 = sshll.u32 (!%p11798_p10), %s10623_s22, 3 }
  0x68   : > { %s329_s24 = scalar_lea.sflag (!%p11798_p10), [#allocation3], %s10623_s22  ;;  %s332_s14 = scalar_lea.vmem (!%p11798_p10), [#allocation2], %s8950_s6 }
  0x6c   : > { %10371 = dma.done.wait (%p11799_p0), %s329_s24, 128  }
  0x6d   : > { %10373 = vsyncadd (%p11799_p0), %s329_s24, 4294967168  ;;  %s337_s3 = sand.u32 1, %s10484_s9   ;;  %s10632_s13 = scalar_lea.vmem [#allocation5], %s8950_s6 }
  0x6e   : > { %s338_s26 = scalar_lea.sflag [#allocation6], %s337_s3 }
  0x6f   : > { %10375 = dma.done.wait (%p11799_p0), %s338_s26, 128  }
  0x70   : > { %10377 = vsyncadd (%p11799_p0), %s338_s26, 4294967168  ;;  %p11800_p8 = scmp.eq.s32.totalorder %s10484_s9, 0 }
  0x72   : > { %10379 = dma.done.wait (%p11800_p8), [#allocation6], 4096   ;;  %p11801_p11 = pmov %p11800_p8 }
  0x73   : > { %p11802_p2 = pmov %p11800_p8 }
  0x74   : > { %10381 = vsyncadd (%p11801_p11), [#allocation6], 4294963200 }
  0x75   : > { %10383 = dma.done.wait (%p11802_p2), [#allocation9], 512   ;;  %p11803_p6 = pmov %p11802_p2 }
  0x76   : > { %vm407_vm0 = vcmask 261120   ;;  %v10646_v0 = vld [vmem:[%s332_s14] sm:$0xff]  ;;  %v393_v8 = vld [vmem:[%s11770_s2 + $0x18] sm:$0xff]  ;;  %v10412_v9 = vmov 0.0   ;;  %vm10413_vm1 = vmmov 0   ;;  %v422_v13 = vlaneseq  ;;  %v392_v27 = vld [vmem:[%s11770_s2 + $0x10] sm:$0xff] }
  0x77   : > { %10385 = vsyncadd (%p11803_p6), [#allocation9], 4294966784  ;;  %v408_v1 = vsel %vm407_vm0, %v10646_v0, 0.0  ;;  %v390_v7 = vld [vmem:[%s11770_s2] sm:$0xff]  ;;  %9444 = vmatprep.subr.mxu0 %v10412_v9  ;;  %9459 = vmatprep.subr.mxu1 %v10412_v9  ;;  %v391_v24 = vld [vmem:[%s11770_s2 + $0x8] sm:$0xff]  ;;  %vm1314_vm2 = vcmask 64512  }
  0x78   : > { %409 = vadd.xlane.f32.xlu0 %v408_v1  ;;  %9445 = vmatpush3.xpose.msk.msra.mxu0 %vm407_vm0, %v390_v7  ;;  %v10668_v14 = vshrl.u32 %v422_v13, 7  ;;  %v10673_v16 = vld [vmem:[#allocation8] sm:$0xff]  ;;  %v400_v25 = vld [vmem:[#allocation7 + $0x8] sm:$0xff]  ;;  %v10690_v26 = vld [vmem:[%s10632_s13] sm:$0xff]  ;;  %vm2384_vm3 = vcmask 523264   ;;  %s10414_s29 = smov 64  }
  0x79   : > { %9460 = vmatpush3.xpose.msk.msra.mxu1 %vm407_vm0, %v393_v8  ;;  %9446 = vmatprep.mubr.msk.f32.mxu0 %vm10413_vm1, %v10412_v9  ;;  %v402_v28 = vld [vmem:[#allocation7 + $0x18] sm:$0xff]  ;;  %v399_v29 = vld [vmem:[#allocation7] sm:$0xff]  ;;  %v404_v30 = vld [vmem:[#allocation7 + $0x28] sm:$0xff]  ;;  %s10415_s10 = smov 96   ;;  %s10416_s19 = smov 32   ;;  %vm8816_vm4 = vcmask 785408  }
  0x7a   : > { %9461 = vmatprep.mubr.msk.f32.mxu1 %vm10413_vm1, %v10412_v9  ;;  %9449 = vmatprep.subr.mxu0 %v10412_v9  ;;  %v10671_v15 = vsub.s32 0, %v10668_v14  ;;  %v10676_v17 = vsub.s32 1, %v10668_v14  ;;  %v401_v31 = vld [vmem:[#allocation7 + $0x10] sm:$0xff]  ;;  %v406_v32 = vld [vmem:[#allocation7 + $0x38] sm:$0xff]  ;;  %v403_v33 = vld [vmem:[#allocation7 + $0x20] sm:$0xff]  ;;  %s9193_s17 = sshll.u32 %s10484_s9, 4 }
  0x7b   : > { %9469 = vmatprep.subr.mxu1 %v10412_v9  ;;  %v405_v34 = vld [vmem:[#allocation7 + $0x30] sm:$0xff]  ;;  %s385_s20 = scalar_lea.vmem [#allocation10], %s10623_s22  ;;  %s11731_s25 = scalar_lea.hbm %s11776_s8, %s9193_s17 }
  0x7c   : > { %v425_v18 = vrot.slane %v10673_v16, %v10671_v15  ;;  %v430_v21 = vrot.slane %v10673_v16, %v10676_v17  ;;  %s8832_s15 = sshll.u32 %s385_s20, 4  ;;  %p11804_p7 = scmp.ne.s32.totalorder %s11795_s16, 0  ;;  %s8833_s15 = int_to_ptr.vmem [resolvable:$true] %s8832_s15 }
  0x7d   : > { %s10328_s21 = scalar_lea.vmem %s8833_s15, 16  ;;  %s10417_s9 = smov [#allocation10]  }
  0x7e   : > { %p10329_p12 = scmp.ne.s32.totalorder %s8833_s15, %s10328_s21  ;;  %s10332_s6 = sshll.u32 %s10417_s9, 4  ;;  %s10333_s6 = int_to_ptr.vmem [resolvable:$false] %s10332_s6 }
  0x7f   : > { %s10334_s24 = scalar_lea.vmem %s10333_s6, 32  ;;  %p10335_p5 = scmp.lt.s32.totalorder %s8833_s15, %s10333_s6 }
  0x80   : > { %p10330_p9 = pnand %p10329_p12, %p11804_p7  ;;  %p10336_p1 = scmp.lt.s32.totalorder %s10334_s24, %s10328_s21 }
  0x82   : > { %p10331_p13 = pneg %p10330_p9  ;;  %p10337_p3 = por %p10336_p1, %p10335_p5 }
  0x84   : > { %p10338_p4 = pnand %p10337_p3, %p10331_p13 }
 0x101   : > { %v410_v2 = vpop.xlane.xlu0 %409 }
 0x102   : > { %v412_v3 = vmul.f32 0.03125, %v410_v2 }
 0x104   : > { %v413_v4 = vsub.f32 %v10646_v0, %v412_v3 }
 0x106   : > { %v414_v5 = vmul.f32 %v413_v4, %v413_v4 }
 0x108   : > { %v415_v6 = vsel %vm407_vm0, %v414_v5, 0.0 }
 0x109   : > { %416 = vadd.xlane.f32.xlu0 %v415_v6 }
 0x192   : > { %v417_v10 = vpop.xlane.xlu0 %416 }
 0x193   : > { %v418_v11 = vmul.f32 0.03125, %v417_v10 }
 0x195   : > { %v419_v12 = vadd.f32 1e-05, %v418_v11 }
 0x197   : > { %10123 = vrsqrt.f32 %v419_v12 }
 0x1a4   : > { %v10124_v19 = vpop.eup %10123 }
 0x1a5   : > { %v421_v20 = vmul.f32 %v10124_v19, %v413_v4 }
 0x1a7   : > { %v426_v22 = vmul.f32 %v425_v18, %v421_v20 }
 0x1a9   : > { %v431_v23 = vadd.f32 %v430_v21, %v426_v22 }
 0x1ab   : > { %9447 = vmatmul.mubr.msk.f32.vlgmr.msra.gmra.mxu0 %vm407_vm0, %v431_v23  ;;  %9462 = vmatmul.mubr.msk.f32.vlgmr.msra.gmra.mxu1 %vm407_vm0, %v431_v23 }
 0x1ac   : > { %9450 = vmatpush3.xpose.msk.msra.mxu0 %vm407_vm0, %v391_v24  ;;  %9470 = vmatpush3.xpose.msk.msra.mxu1 %vm407_vm0, %v400_v25 }
 0x1ad   : > { %9451 = vmatprep.mubr.msk.f32.mxu0 %vm10413_vm1, %v10412_v9  ;;  %9471 = vmatprep.mubr.msk.f32.mxu1 %vm10413_vm1, %v10412_v9 }
 0x1ae   : > { %9454 = vmatprep.subr.mxu0 %v10412_v9  ;;  %9479 = vmatprep.subr.mxu1 %v10412_v9 }
 0x1af   : > { %9452 = vmatmul.mubr.msk.f32.vlgmr.msra.gmra.mxu0 %vm407_vm0, %v431_v23  ;;  %9472 = vmatmul.mubr.msk.f32.vlgmr.msra.gmra.mxu1 %vm407_vm0, %v10690_v26 }
 0x1b0   : > { %9455 = vmatpush3.xpose.msk.msra.mxu0 %vm407_vm0, %v392_v27  ;;  %9480 = vmatpush3.xpose.msk.msra.mxu1 %vm407_vm0, %v402_v28 }
 0x1b1   : > { %9456 = vmatprep.mubr.msk.f32.mxu0 %vm10413_vm1, %v10412_v9  ;;  %9481 = vmatprep.mubr.msk.f32.mxu1 %vm10413_vm1, %v10412_v9 }
 0x1b2   : > { %9464 = vmatprep.subr.mxu0 %v10412_v9  ;;  %9489 = vmatprep.subr.mxu1 %v10412_v9 }
 0x1b3   : > { %9457 = vmatmul.mubr.msk.f32.vlgmr.msra.gmra.mxu0 %vm407_vm0, %v431_v23  ;;  %9482 = vmatmul.mubr.msk.f32.vlgmr.msra.gmra.mxu1 %vm407_vm0, %v10690_v26 }
 0x1b4   : > { %9465 = vmatpush3.xpose.msk.msra.mxu0 %vm407_vm0, %v399_v29  ;;  %9466 = vmatprep.mubr.msk.f32.mxu0 %vm10413_vm1, %v10412_v9 }
 0x1b5   : > { %9474 = vmatprep.subr.mxu0 %v10412_v9  ;;  %9490 = vmatpush3.xpose.msk.msra.mxu1 %vm407_vm0, %v404_v30 }
 0x1b6   : > { %9491 = vmatprep.mubr.msk.f32.mxu1 %vm10413_vm1, %v10412_v9  ;;  %9499 = vmatprep.subr.mxu1 %v10412_v9 }
 0x1b7   : > { %9467 = vmatmul.mubr.msk.f32.vlgmr.msra.gmra.mxu0 %vm407_vm0, %v10690_v26 }
 0x1b8   : > { %9475 = vmatpush3.xpose.msk.msra.mxu0 %vm407_vm0, %v401_v31  ;;  %9476 = vmatprep.mubr.msk.f32.mxu0 %vm10413_vm1, %v10412_v9 }
 0x1b9   : > { %9492 = vmatmul.mubr.msk.f32.vlgmr.msra.gmra.mxu1 %vm407_vm0, %v10690_v26  ;;  %9484 = vmatprep.subr.mxu0 %v10412_v9 }
 0x1ba   : > { %9501 = vmatprep.mubr.msk.f32.mxu1 %vm10413_vm1, %v10412_v9  ;;  %9500 = vmatpush3.xpose.msk.msra.mxu1 %vm407_vm0, %v406_v32 }
 0x1bb   : > { %9477 = vmatmul.mubr.msk.f32.vlgmr.msra.gmra.mxu0 %vm407_vm0, %v10690_v26  ;;  %9509 = vmatprep.subr.mxu1 %v10412_v9 }
 0x1bc   : > { %9486 = vmatprep.mubr.msk.f32.mxu0 %vm10413_vm1, %v10412_v9  ;;  %9485 = vmatpush3.xpose.msk.msra.mxu0 %vm407_vm0, %v403_v33 }
 0x1bd   : > { %9502 = vmatmul.mubr.msk.f32.vlgmr.msra.gmra.mxu1 %vm407_vm0, %v10690_v26  ;;  %9494 = vmatprep.subr.mxu0 %v10412_v9 }
 0x1be   : > { %9511 = vmatprep.mubr.msk.f32.mxu1 %vm10413_vm1, %v10412_v9 }
 0x1bf   : > { %9487 = vmatmul.mubr.msk.f32.vlgmr.msra.gmra.mxu0 %vm407_vm0, %v10690_v26 }
 0x1c0   : > { %9495 = vmatpush3.xpose.msk.msra.mxu0 %vm407_vm0, %v405_v34  ;;  %9496 = vmatprep.mubr.msk.f32.mxu0 %vm10413_vm1, %v10412_v9 }
 0x1c1   : > { %9504 = vmatprep.subr.mxu0 %v10412_v9 }
 0x1c3   : > { %9497 = vmatmul.mubr.msk.f32.vlgmr.msra.gmra.mxu0 %vm407_vm0, %v10690_v26 }
 0x1c4   : > { %9506 = vmatprep.mubr.msk.f32.mxu0 %vm10413_vm1, %v10412_v9 }
 0x26b   : > { %v504_v35 = vpop.f32.mrf.mxu0  ;;  %v723_v36 = vpop.f32.mrf.mxu1 }
 0x26d   : > { %v9448_v37 = vpop.f32.mrf.mxu0  ;;  %v9463_v38 = vpop.f32.mrf.mxu1 }
 0x26f   : > { %v577_v39 = vpop.f32.mrf.mxu0  ;;  %v872_v40 = vpop.f32.mrf.mxu1 }
 0x270   : > { %9510 = vmatpush3.xpose.msk.msra.mxu1 %vm1314_vm2, %v872_v40 }
 0x271   : > { %v9453_v41 = vpop.f32.mrf.mxu0  ;;  %v9473_v42 = vpop.f32.mrf.mxu1  ;;  %9519 = vmatprep.subr.mxu1 %v10412_v9 }
 0x273   : > { %v650_v43 = vpop.f32.mrf.mxu0  ;;  %v1018_v44 = vpop.f32.mrf.mxu1  ;;  %9512 = vmatmul.mubr.msk.f32.vlgmr.msra.gmra.mxu1 %vm1314_vm2, %v577_v39 }
 0x274   : > { %9520 = vmatpush3.xpose.msk.msra.mxu1 %vm1314_vm2, %v1018_v44  ;;  %9521 = vmatprep.mubr.msk.f32.mxu1 %vm10413_vm1, %v10412_v9 }
 0x275   : > { %v9458_v45 = vpop.f32.mrf.mxu0  ;;  %v9483_v46 = vpop.f32.mrf.mxu1  ;;  %9529 = vmatprep.subr.mxu1 %v10412_v9 }
 0x276   : > { %v8954_v46 = vld [vmem:[%s11770_s2 + $0x20] sm:$0xff] }
 0x277   : > { %v799_v47 = vpop.f32.mrf.mxu0  ;;  %9522 = vmatmul.mubr.msk.f32.vlgmr.msra.gmra.mxu1 %vm1314_vm2, %v723_v36 }
 0x278   : > { %9505 = vmatpush3.xpose.msk.msra.mxu0 %vm1314_vm2, %v799_v47  ;;  %9531 = vmatprep.mubr.msk.f32.mxu1 %vm10413_vm1, %v10412_v9  ;;  %v8955_v47 = vld [vmem:[%s11770_s2 + $0x28] sm:$0xff] }
 0x279   : > { %v9468_v48 = vpop.f32.mrf.mxu0  ;;  %9514 = vmatprep.subr.mxu0 %v10412_v9  ;;  %v1164_v49 = vpop.f32.mrf.mxu1 }
 0x27a   : > { %9530 = vmatpush3.msra.mxu1 %v1164_v49  ;;  %v8956_v48 = vld [vmem:[%s11770_s2 + $0x30] sm:$0xff] }
 0x27b   : > { %v945_v50 = vpop.f32.mrf.mxu0  ;;  %9507 = vmatmul.mubr.msk.f32.vlgmr.msra.gmra.mxu0 %vm1314_vm2, %v504_v35  ;;  %v9493_v51 = vpop.f32.mrf.mxu1  ;;  %9539 = vmatprep.subr.mxu1 %v10412_v9 }
 0x27c   : > { %9515 = vmatpush3.xpose.msk.msra.mxu0 %vm1314_vm2, %v945_v50  ;;  %9516 = vmatprep.mubr.msk.f32.mxu0 %vm10413_vm1, %v10412_v9  ;;  %v8957_v51 = vld [vmem:[%s11770_s2 + $0x38] sm:$0xff] }
 0x27d   : > { %v9478_v52 = vpop.f32.mrf.mxu0  ;;  %9524 = vmatprep.subr.mxu0 %v10412_v9  ;;  %v10776_v53 = vpop.f32.mrf.mxu1 }
 0x27f   : > { %9517 = vmatmul.mubr.msk.f32.vlgmr.msra.gmra.mxu0 %vm1314_vm2, %v650_v43  ;;  %v1091_v54 = vpop.f32.mrf.mxu0  ;;  %v9503_v55 = vpop.f32.mrf.mxu1 }
 0x280   : > { %9526 = vmatprep.mubr.msk.f32.mxu0 %vm10413_vm1, %v10412_v9  ;;  %9525 = vmatpush3.msra.mxu0 %v1091_v54 }
 0x281   : > { %v9488_v56 = vpop.f32.mrf.mxu0  ;;  %9534 = vmatprep.subr.mxu0 %v10412_v9 }
 0x283   : > { %v1237_v57 = vpop.f32.mrf.mxu0 }
 0x285   : > { %v9498_v58 = vpop.f32.mrf.mxu0 }
 0x333   : > { %v1463_v59 = vpop.f32.mrf.mxu1 }
 0x334   : > { %v1622_v4 = vsel %vm1314_vm2, %v1463_v59, -inf }
 0x335   : > { %v9513_v60 = vpop.f32.mrf.mxu1 }
 0x337   : > { %v1615_v61 = vpop.f32.mrf.mxu1 }
 0x338   : > { %v1628_v7 = vsel %vm1314_vm2, %v1615_v61, -inf }
 0x339   : > { %v9523_v62 = vpop.f32.mrf.mxu1 }
 0x33b   : > { %v1387_v63 = vpop.f32.mrf.mxu0 }
 0x33c   : > { %v1619_v1 = vsel %vm1314_vm2, %v1387_v63, -inf }
 0x33d   : > { %1620 = vmax.xlane.f32.xlu1 %v1619_v1  ;;  %v9508_v2 = vpop.f32.mrf.mxu0 }
 0x33f   : > { %v1539_v3 = vpop.f32.mrf.mxu0 }
 0x340   : > { %v1625_v5 = vsel %vm1314_vm2, %v1539_v3, -inf }
 0x341   : > { %1623 = vmax.xlane.f32.xlu1 %v1622_v4  ;;  %1626 = vmax.xlane.f32.xlu0 %v1625_v5  ;;  %v9518_v6 = vpop.f32.mrf.mxu0 }
 0x345   : > { %1629 = vmax.xlane.f32.xlu1 %v1628_v7 }
 0x3c6   : > { %v1621_v8 = vpop.xlane.xlu1 %1620 }
 0x3c7   : > { %v1631_v10 = vsub.f32 %v1387_v63, %v1621_v8 }
 0x3c9   : > { %v1635_v11 = vmul.f32 1.442695, %v1631_v10 }
 0x3ca   : > { %v1624_v12 = vpop.xlane.xlu1 %1623  ;;  %v1627_v13 = vpop.xlane.xlu0 %1626 }
 0x3cb   : > { %10125 = vpow2.f32 %v1635_v11  ;;  %v1632_v18 = vsub.f32 %v1463_v59, %v1624_v12  ;;  %v1633_v19 = vsub.f32 %v1539_v3, %v1627_v13 }
 0x3cd   : > { %v1637_v20 = vmul.f32 1.442695, %v1632_v18  ;;  %v1639_v21 = vmul.f32 1.442695, %v1633_v19 }
 0x3ce   : > { %v1630_v22 = vpop.xlane.xlu1 %1629 }
 0x3cf   : > { %10127 = vpow2.f32 %v1637_v20  ;;  %v1634_v23 = vsub.f32 %v1615_v61, %v1630_v22  ;;  %v10831_v61 = vsub.s32 6, %v10668_v14 }
 0x3d0   : > { %10129 = vpow2.f32 %v1639_v21 }
 0x3d1   : > { %v1641_v24 = vmul.f32 1.442695, %v1634_v23  ;;  %v2257_v8 = vrot.slane %v10673_v16, %v10831_v61 }
 0x3d3   : > { %10131 = vpow2.f32 %v1641_v24 }
 0x3d8   : > { %v10126_v25 = vpop.eup %10125 }
 0x3d9   : > { %v1643_v27 = vsel %vm1314_vm2, %v10126_v25, 0.0 }
 0x3da   : > { %1644 = vadd.xlane.f32.xlu0 %v1643_v27  ;;  %v2285_v27 = vld [vmem:[%s11772_s4 + $0x10] sm:$0xff] }
 0x3dc   : > { %v10128_v28 = vpop.eup %10127 }
 0x3dd   : > { %v10130_v29 = vpop.eup %10129  ;;  %v1646_v30 = vsel %vm1314_vm2, %v10128_v28, 0.0 }
 0x3de   : > { %1647 = vadd.xlane.f32.xlu1 %v1646_v30  ;;  %v1649_v31 = vsel %vm1314_vm2, %v10130_v29, 0.0 }
 0x3df   : > { %1650 = vadd.xlane.f32.xlu0 %v1649_v31 }
 0x3e0   : > { %v10132_v32 = vpop.eup %10131 }
 0x3e1   : > { %v1652_v33 = vsel %vm1314_vm2, %v10132_v32, 0.0 }
 0x3e2   : > { %1653 = vadd.xlane.f32.xlu1 %v1652_v33  ;;  %v10863_v33 = vsub.s32 2, %v10668_v14 }
 0x463   : > { %v1645_v34 = vpop.xlane.xlu0 %1644 }
 0x464   : > { %10133 = vrcp.f32 %v1645_v34  ;;  %v10866_v34 = vsub.s32 3, %v10668_v14 }
 0x467   : > { %v1648_v35 = vpop.xlane.xlu1 %1647 }
 0x468   : > { %10135 = vrcp.f32 %v1648_v35  ;;  %v1651_v36 = vpop.xlane.xlu0 %1650  ;;  %v2276_v35 = vrot.slane %v10673_v16, %v10863_v33 }
 0x469   : > { %10137 = vrcp.f32 %v1651_v36 }
 0x46b   : > { %v1654_v37 = vpop.xlane.xlu1 %1653 }
 0x46c   : > { %10139 = vrcp.f32 %v1654_v37 }
 0x471   : > { %v10134_v38 = vpop.eup %10133 }
 0x472   : > { %v1656_v39 = vmul.f32 %v10134_v38, %v10126_v25  ;;  %v2286_v25 = vld [vmem:[%s11772_s4 + $0x18] sm:$0xff]  ;;  %v2281_v38 = vrot.slane %v10673_v16, %v10866_v34 }
 0x474   : > { %9527 = vmatmul.mubr.msk.f32.vlgmr.msra.gmra.mxu0 %vm1314_vm2, %v1656_v39 }
 0x475   : > { %v10136_v40 = vpop.eup %10135  ;;  %9535 = vmatpush3.msra.mxu0 %v1237_v57  ;;  %9536 = vmatprep.mubr.msk.f32.mxu0 %vm10413_vm1, %v10412_v9 }
 0x476   : > { %v10138_v41 = vpop.eup %10137  ;;  %v1658_v42 = vmul.f32 %v10136_v40, %v10128_v28  ;;  %9544 = vmatprep.subr.mxu0 %v10412_v9  ;;  %v2284_v28 = vld [vmem:[%s11772_s4 + $0x8] sm:$0xff] }
 0x477   : > { %v1660_v43 = vmul.f32 %v10138_v41, %v10130_v29  ;;  %v2283_v29 = vld [vmem:[%s11772_s4] sm:$0xff]  ;;  %v2379_v41 = vld [vmem:[%s11773_s5 + $0x38] sm:$0xff] }
 0x478   : > { %9532 = vmatmul.mubr.msk.f32.vlgmr.msra.gmra.mxu1 %vm1314_vm2, %v1658_v42  ;;  %v2378_v42 = vld [vmem:[%s11773_s5 + $0x30] sm:$0xff] }
 0x479   : > { %v10140_v44 = vpop.eup %10139  ;;  %9537 = vmatmul.mubr.msk.f32.vlgmr.msra.gmra.mxu0 %vm1314_vm2, %v1660_v43  ;;  %9540 = vmatpush3.msra.mxu1 %v10776_v53  ;;  %v2377_v43 = vld [vmem:[%s11773_s5 + $0x28] sm:$0xff] }
 0x47a   : > { %9541 = vmatprep.mubr.msk.f32.mxu1 %vm10413_vm1, %v10412_v9  ;;  %v1662_v45 = vmul.f32 %v10140_v44, %v10132_v32  ;;  %9546 = vmatprep.mubr.msk.f32.mxu0 %vm10413_vm1, %v10412_v9  ;;  %v2376_v44 = vld [vmem:[%s11773_s5 + $0x20] sm:$0xff] }
 0x47b   : > { %9549 = vmatprep.subr.mxu1 %v10412_v9  ;;  %9545 = vmatpush3.msra.mxu0 %v8954_v46  ;;  %v2374_v46 = vld [vmem:[%s11773_s5 + $0x10] sm:$0xff] }
 0x47c   : > { %9542 = vmatmul.mubr.msk.f32.vlgmr.msra.gmra.mxu1 %vm1314_vm2, %v1662_v45  ;;  %9554 = vmatprep.subr.mxu0 %v10412_v9  ;;  %v2375_v45 = vld [vmem:[%s11773_s5 + $0x18] sm:$0xff] }
 0x47d   : > { %9551 = vmatprep.mubr.msk.f32.mxu1 %vm10413_vm1, %v10412_v9  ;;  %9550 = vmatpush3.msra.mxu1 %v8955_v47  ;;  %v2373_v47 = vld [vmem:[%s11773_s5 + $0x8] sm:$0xff] }
 0x47e   : > { %9559 = vmatprep.subr.mxu1 %v10412_v9 }
 0x534   : > { %v1732_v49 = vpop.f32.mrf.mxu0 }
 0x535   : > { %9547 = vmatmul.mubr.msk.f32.vlgmr.msra.gmra.mxu0 %vm1314_vm2, %v1732_v49  ;;  %v2506_v49 = vsel %vm407_vm0, %v10690_v26, 0.0 }
 0x536   : > { %v9528_v50 = vpop.f32.mrf.mxu0  ;;  %9555 = vmatpush3.msra.mxu0 %v8956_v48  ;;  %9556 = vmatprep.mubr.msk.f32.mxu0 %vm10413_vm1, %v10412_v9  ;;  %v2372_v48 = vld [vmem:[%s11773_s5] sm:$0xff] }
 0x537   : > { %9564 = vmatprep.subr.mxu0 %v10412_v9  ;;  %v8998_v50 = vld [vmem:[%s11775_s7] ss:$0 sm:$0xff] }
 0x538   : > { %v1805_v52 = vpop.f32.mrf.mxu1 }
 0x539   : > { %v1878_v53 = vpop.f32.mrf.mxu0  ;;  %9552 = vmatmul.mubr.msk.f32.vlgmr.msra.gmra.mxu1 %vm1314_vm2, %v1805_v52 }
 0x53a   : > { %9557 = vmatmul.mubr.msk.f32.vlgmr.msra.gmra.mxu0 %vm1314_vm2, %v1878_v53  ;;  %v9533_v54 = vpop.f32.mrf.mxu1  ;;  %9560 = vmatpush3.msra.mxu1 %v8957_v51 }
 0x53b   : > { %v9538_v55 = vpop.f32.mrf.mxu0  ;;  %9561 = vmatprep.mubr.msk.f32.mxu1 %vm10413_vm1, %v10412_v9  ;;  %9572 = vmatprep.mubr.msk.f32.mxu0 %vm10413_vm1, %v10412_v9 }
 0x53c   : > { %v1951_v56 = vpop.f32.mrf.mxu1  ;;  %9575 = vmatprep.subr.mxu1 %v10412_v9  ;;  %9565 = vmatpush3.msra.mxu0 %v2286_v25 }
 0x53d   : > { %9562 = vmatmul.mubr.msk.f32.vlgmr.msra.gmra.mxu1 %vm1314_vm2, %v1951_v56  ;;  %9566 = vmatprep.subr.mxu0 %v10412_v9 }
 0x53e   : > { %v9543_v57 = vpop.f32.mrf.mxu1  ;;  %9591 = vmatprep.mubr.msk.f32.mxu1 %vm10413_vm1, %v10412_v9  ;;  %9567 = vmatpush3.msra.mxu0 %v2285_v27 }
 0x53f   : > { %9568 = vmatprep.subr.mxu0 %v10412_v9  ;;  %9576 = vmatpush3.msra.mxu1 %v2379_v41 }
 0x540   : > { %9569 = vmatpush3.msra.mxu0 %v2284_v28  ;;  %9577 = vmatprep.subr.mxu1 %v10412_v9 }
 0x541   : > { %9570 = vmatprep.subr.mxu0 %v10412_v9  ;;  %9578 = vmatpush3.msra.mxu1 %v2378_v42 }
 0x542   : > { %9571 = vmatpush3.msra.mxu0 %v2283_v29  ;;  %9579 = vmatprep.subr.mxu1 %v10412_v9 }
 0x543   : > { %9594 = vmatprep.subr.mxu0 %v10412_v9  ;;  %9580 = vmatpush3.msra.mxu1 %v2377_v43 }
 0x544   : > { %9581 = vmatprep.subr.mxu1 %v10412_v9 }
 0x545   : > { %9582 = vmatpush3.msra.mxu1 %v2376_v44 }
 0x546   : > { %9583 = vmatprep.subr.mxu1 %v10412_v9 }
 0x547   : > { %9584 = vmatpush3.msra.mxu1 %v2375_v45 }
 0x548   : > { %9585 = vmatprep.subr.mxu1 %v10412_v9 }
 0x549   : > { %9586 = vmatpush3.msra.mxu1 %v2374_v46 }
 0x54a   : > { %9587 = vmatprep.subr.mxu1 %v10412_v9 }
 0x54b   : > { %9588 = vmatpush3.msra.mxu1 %v2373_v47 }
 0x54c   : > { %9589 = vmatprep.subr.mxu1 %v10412_v9 }
 0x54d   : > { %9590 = vmatpush3.msra.mxu1 %v2372_v48  ;;  %v10976_v48 = vsub.s32 4, %v10668_v14 }
 0x54e   : > { %9609 = vmatprep.subr.mxu1 %v10412_v9 }
 0x5f5   : > { %v2024_v58 = vpop.f32.mrf.mxu0 }
 0x5f6   : > { %v2247_v62 = vsel %vm407_vm0, %v2024_v58, 0.0 }
 0x5f7   : > { %v9548_v59 = vpop.f32.mrf.mxu0 }
 0x5f9   : > { %v2097_v60 = vpop.f32.mrf.mxu1 }
 0x5fa   : > { %v2248_v63 = vsel %vm407_vm0, %v2097_v60, 0.0  ;;  %v2170_v1 = vpop.f32.mrf.mxu0 }
 0x5fb   : > { %v2249_v2 = vadd.f32 %v2248_v63, %v2247_v62  ;;  %v9553_v3 = vpop.f32.mrf.mxu1  ;;  %v2250_v4 = vsel %vm407_vm0, %v2170_v1, 0.0 }
 0x5fc   : > { %v9558_v5 = vpop.f32.mrf.mxu0  ;;  %v9005_v3 = vld [vmem:[%s11770_s2 + $0x58] sm:$0xff] }
 0x5fd   : > { %v2251_v6 = vadd.f32 %v2250_v4, %v2249_v2  ;;  %v2243_v7 = vpop.f32.mrf.mxu1  ;;  %v9002_v2 = vld [vmem:[%s11770_s2 + $0x40] sm:$0xff] }
 0x5fe   : > { %v2252_v10 = vsel %vm407_vm0, %v2243_v7, 0.0 }
 0x5ff   : > { %v2253_v11 = vadd.f32 %v2252_v10, %v2251_v6  ;;  %v9563_v12 = vpop.f32.mrf.mxu1  ;;  %v10927_v6 = vld [vmem:[#allocation8 + $0x8] sm:$0xff] }
 0x600   : > { %v2522_v7 = vrot.slane %v10927_v6, %v10671_v15 }
 0x601   : > { %v2258_v13 = vadd.f32 %v2257_v8, %v2253_v11  ;;  %v2527_v11 = vrot.slane %v10927_v6, %v10676_v17 }
 0x603   : > { %v10840_v18 = vadd.f32 %v2258_v13, %v10646_v0 }
 0x605   : > { %v2260_v19 = vsel %vm407_vm0, %v10840_v18, 0.0 }
 0x606   : > { %2261 = vadd.xlane.f32.xlu0 %v2260_v19  ;;  %v9003_v19 = vld [vmem:[%s11770_s2 + $0x48] sm:$0xff] }
 0x60a   : > { %2507 = vadd.xlane.f32.xlu0 %v2506_v49  ;;  %v10979_v49 = vsub.s32 5, %v10668_v14 }
 0x68f   : > { %v2262_v20 = vpop.xlane.xlu0 %2261 }
 0x690   : > { %v2263_v21 = vmul.f32 0.03125, %v2262_v20  ;;  %v9004_v20 = vld [vmem:[%s11770_s2 + $0x50] sm:$0xff] }
 0x692   : > { %v2264_v22 = vsub.f32 %v10840_v18, %v2263_v21  ;;  %v10949_v21 = vsub.s32 7, %v10668_v14  ;;  %v2503_v14 = vld [vmem:[#allocation7 + $0x68] sm:$0xff] }
 0x693   : > { %v2508_v59 = vpop.xlane.xlu0 %2507 }
 0x694   : > { %v2265_v23 = vmul.f32 %v2264_v22, %v2264_v22  ;;  %v2509_v60 = vmul.f32 0.03125, %v2508_v59  ;;  %v2505_v59 = vld [vmem:[#allocation7 + $0x78] sm:$0xff] }
 0x696   : > { %v2266_v24 = vsel %vm407_vm0, %v2265_v23, 0.0  ;;  %v2510_v62 = vsub.f32 %v10690_v26, %v2509_v60 }
 0x697   : > { %2267 = vadd.xlane.f32.xlu1 %v2266_v24 }
 0x698   : > { %v2511_v63 = vmul.f32 %v2510_v62, %v2510_v62 }
 0x69a   : > { %v2512_v1 = vsel %vm407_vm0, %v2511_v63, 0.0 }
 0x69b   : > { %2513 = vadd.xlane.f32.xlu0 %v2512_v1 }
 0x720   : > { %v2268_v30 = vpop.xlane.xlu1 %2267 }
 0x721   : > { %v2269_v31 = vmul.f32 0.03125, %v2268_v30 }
 0x723   : > { %v2270_v32 = vadd.f32 1e-05, %v2269_v31 }
 0x724   : > { %v2514_v26 = vpop.xlane.xlu0 %2513 }
 0x725   : > { %10141 = vrsqrt.f32 %v2270_v32  ;;  %v2515_v4 = vmul.f32 0.03125, %v2514_v26 }
 0x727   : > { %v2516_v5 = vadd.f32 1e-05, %v2515_v4 }
 0x732   : > { %v10142_v36 = vpop.eup %10141 }
 0x733   : > { %v2272_v37 = vmul.f32 %v10142_v36, %v2264_v22  ;;  %v2383_v22 = vrot.slane %v10673_v16, %v10949_v21  ;;  %v2498_v36 = vld [vmem:[#allocation7 + $0x40] sm:$0xff] }
 0x735   : > { %v2277_v39 = vmul.f32 %v2276_v35, %v2272_v37  ;;  %v2499_v37 = vld [vmem:[#allocation7 + $0x48] sm:$0xff] }
 0x737   : > { %v2282_v40 = vadd.f32 %v2281_v38, %v2277_v39 }
 0x739   : > { %9573 = vmatmul.mubr.msk.f32.vlgmr.msra.gmra.mxu0 %vm407_vm0, %v2282_v40 }
 0x73a   : > { %9596 = vmatprep.mubr.msk.f32.mxu0 %vm10413_vm1, %v10412_v9  ;;  %9595 = vmatpush3.xpose.msk.msra.mxu0 %vm407_vm0, %v9002_v2 }
 0x73b   : > { %9599 = vmatprep.subr.mxu0 %v10412_v9 }
 0x7f9   : > { %v2362_v51 = vpop.f32.mrf.mxu0 }
 0x7fa   : > { %v2363_v52 = vadd.f32 %v8998_v50, %v2362_v51  ;;  %v2475_v50 = vrot.slane %v10673_v16, %v10976_v48 }
 0x7fb   : > { %v9574_v53 = vpop.f32.mrf.mxu0 }
 0x7fc   : > { %v2368_v54 = vmul.f32 0.70710677, %v2363_v52  ;;  %v2366_v56 = vmul.f32 0.5, %v2363_v52  ;;  %v2480_v52 = vrot.slane %v10673_v16, %v10979_v49  ;;  %v2504_v16 = vld [vmem:[#allocation7 + $0x70] sm:$0xff] }
 0x7fe   : > { %10143 = verf.f32 %v2368_v54 }
 0x7ff   : > { %10145 = vrsqrt.f32 %v2516_v5 }
 0x80b   : > { %v10144_v55 = vpop.eup %10143 }
 0x80c   : > { %v2370_v57 = vadd.f32 1.0, %v10144_v55  ;;  %v10146_v8 = vpop.eup %10145 }
 0x80d   : > { %v2518_v10 = vmul.f32 %v10146_v8, %v2510_v62 }
 0x80e   : > { %v2371_v58 = vmul.f32 %v2370_v57, %v2366_v56  ;;  %v2500_v57 = vld [vmem:[#allocation7 + $0x50] sm:$0xff] }
 0x80f   : > { %v2523_v12 = vmul.f32 %v2522_v7, %v2518_v10 }
 0x810   : > { %9592 = vmatmul.mubr.msk.f32.vlgmr.msra.gmra.mxu1 %vm2384_vm3, %v2371_v58  ;;  %v2501_v58 = vld [vmem:[#allocation7 + $0x58] sm:$0xff] }
 0x811   : > { %9611 = vmatprep.mubr.msk.f32.mxu1 %vm10413_vm1, %v10412_v9  ;;  %9610 = vmatpush3.xpose.msk.msra.mxu1 %vm407_vm0, %v9005_v3  ;;  %v2528_v13 = vadd.f32 %v2527_v11, %v2523_v12 }
 0x812   : > { %9619 = vmatprep.subr.mxu1 %v10412_v9 }
 0x813   : > { %9597 = vmatmul.mubr.msk.f32.vlgmr.msra.gmra.mxu0 %vm407_vm0, %v2528_v13 }
 0x814   : > { %9612 = vmatmul.mubr.msk.f32.vlgmr.msra.gmra.mxu1 %vm407_vm0, %v2528_v13  ;;  %9600 = vmatpush3.xpose.msk.msra.mxu0 %vm407_vm0, %v9003_v19 }
 0x815   : > { %9601 = vmatprep.mubr.msk.f32.mxu0 %vm10413_vm1, %v10412_v9  ;;  %9604 = vmatprep.subr.mxu0 %v10412_v9 }
 0x816   : > { %9621 = vmatprep.mubr.msk.f32.mxu1 %vm10413_vm1, %v10412_v9  ;;  %9620 = vmatpush3.xpose.msk.msra.mxu1 %vm407_vm0, %v2499_v37 }
 0x817   : > { %9602 = vmatmul.mubr.msk.f32.vlgmr.msra.gmra.mxu0 %vm407_vm0, %v2528_v13  ;;  %9629 = vmatprep.subr.mxu1 %v10412_v9 }
 0x818   : > { %9605 = vmatpush3.xpose.msk.msra.mxu0 %vm407_vm0, %v9004_v20  ;;  %9606 = vmatprep.mubr.msk.f32.mxu0 %vm10413_vm1, %v10412_v9 }
 0x819   : > { %9614 = vmatprep.subr.mxu0 %v10412_v9 }
 0x81b   : > { %9607 = vmatmul.mubr.msk.f32.vlgmr.msra.gmra.mxu0 %vm407_vm0, %v2528_v13 }
 0x81c   : > { %9616 = vmatprep.mubr.msk.f32.mxu0 %vm10413_vm1, %v10412_v9  ;;  %9615 = vmatpush3.xpose.msk.msra.mxu0 %vm407_vm0, %v2498_v36 }
 0x81d   : > { %9624 = vmatprep.subr.mxu0 %v10412_v9 }
 0x8d0   : > { %v2454_v23 = vpop.f32.mrf.mxu1 }
 0x8d1   : > { %v2455_v24 = vadd.f32 %v2454_v23, %v2383_v22 }
 0x8d2   : > { %v9593_v25 = vpop.f32.mrf.mxu1 }
 0x8d3   : > { %v2458_v27 = vadd.f32 %v2455_v24, %v10840_v18  ;;  %v10967_v18 = vpop.f32.mrf.mxu0 }
 0x8d4   : > { %v10969_v39 = vpop.f32.mrf.mxu1 }
 0x8d5   : > { %v2459_v28 = vsel %vm407_vm0, %v2458_v27, 0.0  ;;  %v9598_v38 = vpop.f32.mrf.mxu0 }
 0x8d6   : > { %2460 = vadd.xlane.f32.xlu1 %v2459_v28  ;;  %v9613_v41 = vpop.f32.mrf.mxu1 }
 0x8d7   : > { %v10971_v40 = vpop.f32.mrf.mxu0 }
 0x8d9   : > { %v9603_v42 = vpop.f32.mrf.mxu0 }
 0x8db   : > { %v10973_v43 = vpop.f32.mrf.mxu0 }
 0x8dd   : > { %v9608_v44 = vpop.f32.mrf.mxu0 }
 0x95f   : > { %v2461_v29 = vpop.xlane.xlu1 %2460 }
 0x960   : > { %v2462_v30 = vmul.f32 0.03125, %v2461_v29 }
 0x962   : > { %v2463_v31 = vsub.f32 %v2458_v27, %v2462_v30 }
 0x964   : > { %v2464_v32 = vmul.f32 %v2463_v31, %v2463_v31 }
 0x966   : > { %v2465_v35 = vsel %vm407_vm0, %v2464_v32, 0.0 }
 0x967   : > { %2466 = vadd.xlane.f32.xlu1 %v2465_v35 }
 0x9f0   : > { %v2467_v45 = vpop.xlane.xlu1 %2466 }
 0x9f1   : > { %v2468_v46 = vmul.f32 0.03125, %v2467_v45 }
 0x9f3   : > { %v2469_v47 = vadd.f32 1e-05, %v2468_v46 }
 0x9f5   : > { %10147 = vrsqrt.f32 %v2469_v47 }
 0xa02   : > { %v10148_v51 = vpop.eup %10147 }
 0xa03   : > { %v2471_v53 = vmul.f32 %v10148_v51, %v2463_v31 }
 0xa05   : > { %v2476_v54 = vmul.f32 %v2475_v50, %v2471_v53 }
 0xa07   : > { %v2481_v55 = vadd.f32 %v2480_v52, %v2476_v54 }
 0xa09   : > { %v10986_v56 = vadd.f32 %v2481_v55, %v10646_v0  ;;  %v2502_v0 = vld [vmem:[#allocation7 + $0x60] sm:$0xff] }
 0xa0b   : > { %9617 = vmatmul.mubr.msk.f32.vlgmr.msra.gmra.mxu0 %vm407_vm0, %v10986_v56  ;;  %9622 = vmatmul.mubr.msk.f32.vlgmr.msra.gmra.mxu1 %vm407_vm0, %v10986_v56 }
 0xa0c   : > { %9625 = vmatpush3.xpose.msk.msra.mxu0 %vm407_vm0, %v2500_v57  ;;  %9630 = vmatpush3.xpose.msk.msra.mxu1 %vm407_vm0, %v2501_v58 }
 0xa0d   : > { %9626 = vmatprep.mubr.msk.f32.mxu0 %vm10413_vm1, %v10412_v9  ;;  %9631 = vmatprep.mubr.msk.f32.mxu1 %vm10413_vm1, %v10412_v9 }
 0xa0e   : > { %9634 = vmatprep.subr.mxu0 %v10412_v9  ;;  %9639 = vmatprep.subr.mxu1 %v10412_v9 }
 0xa0f   : > { %9627 = vmatmul.mubr.msk.f32.vlgmr.msra.gmra.mxu0 %vm407_vm0, %v10986_v56  ;;  %9632 = vmatmul.mubr.msk.f32.vlgmr.msra.gmra.mxu1 %vm407_vm0, %v10986_v56 }
 0xa10   : > { %9635 = vmatpush3.xpose.msk.msra.mxu0 %vm407_vm0, %v2502_v0  ;;  %9640 = vmatpush3.xpose.msk.msra.mxu1 %vm407_vm0, %v2503_v14 }
 0xa11   : > { %9636 = vmatprep.mubr.msk.f32.mxu0 %vm10413_vm1, %v10412_v9  ;;  %9641 = vmatprep.mubr.msk.f32.mxu1 %vm10413_vm1, %v10412_v9 }
 0xa12   : > { %9644 = vmatprep.subr.mxu0 %v10412_v9  ;;  %9649 = vmatprep.subr.mxu1 %v10412_v9 }
 0xa13   : > { %9637 = vmatmul.mubr.msk.f32.vlgmr.msra.gmra.mxu0 %vm407_vm0, %v10986_v56  ;;  %9642 = vmatmul.mubr.msk.f32.vlgmr.msra.gmra.mxu1 %vm407_vm0, %v10986_v56 }
 0xa14   : > { %9645 = vmatpush3.xpose.msk.msra.mxu0 %vm407_vm0, %v2504_v16  ;;  %9650 = vmatpush3.xpose.msk.msra.mxu1 %vm407_vm0, %v2505_v59 }
 0xa15   : > { %9646 = vmatprep.mubr.msk.f32.mxu0 %vm10413_vm1, %v10412_v9  ;;  %9651 = vmatprep.mubr.msk.f32.mxu1 %vm10413_vm1, %v10412_v9 }
 0xa16   : > { %9654 = vmatprep.subr.mxu0 %v10412_v9  ;;  %9659 = vmatprep.subr.mxu1 %v10412_v9 }
 0xa17   : > { %9647 = vmatmul.mubr.msk.f32.vlgmr.msra.gmra.mxu0 %vm407_vm0, %v10986_v56  ;;  %9652 = vmatmul.mubr.msk.f32.vlgmr.msra.gmra.mxu1 %vm407_vm0, %v10986_v56 }
 0xa18   : > { %9656 = vmatprep.mubr.msk.f32.mxu0 %vm10413_vm1, %v10412_v9  ;;  %9661 = vmatprep.mubr.msk.f32.mxu1 %vm10413_vm1, %v10412_v9 }
 0xacb   : > { %v2896_v60 = vpop.f32.mrf.mxu0  ;;  %v2969_v62 = vpop.f32.mrf.mxu1 }
 0xacc   : > { %9655 = vmatpush3.xpose.msk.msra.mxu0 %vm1314_vm2, %v2896_v60  ;;  %9660 = vmatpush3.xpose.msk.msra.mxu1 %vm1314_vm2, %v2969_v62 }
 0xacd   : > { %v9618_v63 = vpop.f32.mrf.mxu0  ;;  %v9623_v1 = vpop.f32.mrf.mxu1  ;;  %9664 = vmatprep.subr.mxu0 %v10412_v9  ;;  %9669 = vmatprep.subr.mxu1 %v10412_v9 }
 0xacf   : > { %v3042_v2 = vpop.f32.mrf.mxu0  ;;  %v3115_v3 = vpop.f32.mrf.mxu1  ;;  %9657 = vmatmul.mubr.msk.f32.vlgmr.msra.gmra.mxu0 %vm1314_vm2, %v10967_v18  ;;  %9662 = vmatmul.mubr.msk.f32.vlgmr.msra.gmra.mxu1 %vm1314_vm2, %v10971_v40 }
 0xad0   : > { %9665 = vmatpush3.xpose.msk.msra.mxu0 %vm1314_vm2, %v3042_v2  ;;  %9670 = vmatpush3.xpose.msk.msra.mxu1 %vm1314_vm2, %v3115_v3 }
 0xad1   : > { %v9628_v26 = vpop.f32.mrf.mxu0  ;;  %v9633_v4 = vpop.f32.mrf.mxu1  ;;  %9666 = vmatprep.mubr.msk.f32.mxu0 %vm10413_vm1, %v10412_v9  ;;  %9671 = vmatprep.mubr.msk.f32.mxu1 %vm10413_vm1, %v10412_v9 }
 0xad2   : > { %9674 = vmatprep.subr.mxu0 %v10412_v9  ;;  %9679 = vmatprep.subr.mxu1 %v10412_v9  ;;  %v9006_v4 = vld [vmem:[%s11770_s2 + $0x60] sm:$0xff] }
 0xad3   : > { %v3188_v5 = vpop.f32.mrf.mxu0  ;;  %v3261_v7 = vpop.f32.mrf.mxu1  ;;  %9667 = vmatmul.mubr.msk.f32.vlgmr.msra.gmra.mxu0 %vm1314_vm2, %v10973_v43  ;;  %9672 = vmatmul.mubr.msk.f32.vlgmr.msra.gmra.mxu1 %vm1314_vm2, %v10969_v39 }
 0xad4   : > { %9675 = vmatpush3.msra.mxu0 %v3188_v5  ;;  %9680 = vmatpush3.msra.mxu1 %v3261_v7  ;;  %v9007_v5 = vld [vmem:[%s11770_s2 + $0x68] sm:$0xff]  ;;  %v9009_v7 = vld [vmem:[%s11770_s2 + $0x78] sm:$0xff] }
 0xad5   : > { %v9638_v8 = vpop.f32.mrf.mxu0  ;;  %v9643_v10 = vpop.f32.mrf.mxu1  ;;  %9676 = vmatprep.mubr.msk.f32.mxu0 %vm10413_vm1, %v10412_v9  ;;  %9681 = vmatprep.mubr.msk.f32.mxu1 %vm10413_vm1, %v10412_v9 }
 0xad6   : > { %9684 = vmatprep.subr.mxu0 %v10412_v9  ;;  %9689 = vmatprep.subr.mxu1 %v10412_v9  ;;  %v9008_v10 = vld [vmem:[%s11770_s2 + $0x70] sm:$0xff] }
 0xad7   : > { %v11058_v11 = vpop.f32.mrf.mxu0  ;;  %v3407_v12 = vpop.f32.mrf.mxu1 }
 0xad9   : > { %v9648_v13 = vpop.f32.mrf.mxu0  ;;  %v9653_v19 = vpop.f32.mrf.mxu1 }
 0xb8f   : > { %v3483_v20 = vpop.f32.mrf.mxu0  ;;  %v3559_v22 = vpop.f32.mrf.mxu1 }
 0xb90   : > { %v3718_v23 = vsel %vm1314_vm2, %v3559_v22, -inf  ;;  %v3715_v24 = vsel %vm1314_vm2, %v3483_v20, -inf }
 0xb91   : > { %3719 = vmax.xlane.f32.xlu1 %v3718_v23  ;;  %v9663_v25 = vpop.f32.mrf.mxu1  ;;  %3716 = vmax.xlane.f32.xlu0 %v3715_v24  ;;  %v9658_v27 = vpop.f32.mrf.mxu0 }
 0xb93   : > { %v3635_v28 = vpop.f32.mrf.mxu0  ;;  %v3711_v29 = vpop.f32.mrf.mxu1 }
 0xb94   : > { %v3724_v30 = vsel %vm1314_vm2, %v3711_v29, -inf  ;;  %v3721_v31 = vsel %vm1314_vm2, %v3635_v28, -inf }
 0xb95   : > { %3725 = vmax.xlane.f32.xlu1 %v3724_v30  ;;  %v9673_v32 = vpop.f32.mrf.mxu1  ;;  %3722 = vmax.xlane.f32.xlu0 %v3721_v31  ;;  %v9668_v35 = vpop.f32.mrf.mxu0 }
 0xc1a   : > { %v3720_v36 = vpop.xlane.xlu1 %3719  ;;  %v3717_v37 = vpop.xlane.xlu0 %3716 }
 0xc1b   : > { %v3728_v18 = vsub.f32 %v3559_v22, %v3720_v36  ;;  %v3727_v38 = vsub.f32 %v3483_v20, %v3717_v37 }
 0xc1d   : > { %v3733_v39 = vmul.f32 1.442695, %v3728_v18  ;;  %v3731_v40 = vmul.f32 1.442695, %v3727_v38  ;;  %v4353_v38 = vrot.slane %v10927_v6, %v10831_v61 }
 0xc1e   : > { %v3726_v41 = vpop.xlane.xlu1 %3725  ;;  %v3723_v42 = vpop.xlane.xlu0 %3722 }
 0xc1f   : > { %10149 = vpow2.f32 %v3733_v39  ;;  %v3730_v43 = vsub.f32 %v3711_v29, %v3726_v41  ;;  %v3729_v44 = vsub.f32 %v3635_v28, %v3723_v42 }
 0xc20   : > { %10151 = vpow2.f32 %v3731_v40 }
 0xc21   : > { %v3737_v45 = vmul.f32 1.442695, %v3730_v43  ;;  %v3735_v46 = vmul.f32 1.442695, %v3729_v44  ;;  %v11118_v43 = vld [vmem:[%s10632_s13] sm:$0xff]  ;;  %s8820_s13 = scalar_lea.sflag [#allocation4], %s10623_s22 }
 0xc23   : > { %10153 = vpow2.f32 %v3737_v45 }
 0xc24   : > { %10155 = vpow2.f32 %v3735_v46  ;;  %v4602_v46 = vsel %vm407_vm0, %v10986_v56, 0.0 }
 0xc2c   : > { %v10150_v47 = vpop.eup %10149 }
 0xc2d   : > { %v10152_v50 = vpop.eup %10151  ;;  %v3742_v51 = vsel %vm1314_vm2, %v10150_v47, 0.0 }
 0xc2e   : > { %3743 = vadd.xlane.f32.xlu1 %v3742_v51  ;;  %v3739_v52 = vsel %vm1314_vm2, %v10152_v50, 0.0 }
 0xc2f   : > { %3740 = vadd.xlane.f32.xlu0 %v3739_v52 }
 0xc30   : > { %v10154_v53 = vpop.eup %10153 }
 0xc31   : > { %v10156_v54 = vpop.eup %10155  ;;  %v3748_v55 = vsel %vm1314_vm2, %v10154_v53, 0.0 }
 0xc32   : > { %3749 = vadd.xlane.f32.xlu1 %v3748_v55  ;;  %v3745_v57 = vsel %vm1314_vm2, %v10156_v54, 0.0 }
 0xc33   : > { %3746 = vadd.xlane.f32.xlu0 %v3745_v57 }
 0xcb7   : > { %v3744_v58 = vpop.xlane.xlu1 %3743 }
 0xcb8   : > { %10157 = vrcp.f32 %v3744_v58  ;;  %v3741_v0 = vpop.xlane.xlu0 %3740 }
 0xcb9   : > { %10159 = vrcp.f32 %v3741_v0 }
 0xcbb   : > { %v3750_v14 = vpop.xlane.xlu1 %3749 }
 0xcbc   : > { %10161 = vrcp.f32 %v3750_v14  ;;  %v3747_v16 = vpop.xlane.xlu0 %3746  ;;  %v9053_v14 = vld [vmem:[%s11772_s4 + $0x38] sm:$0xff] }
 0xcbd   : > { %10163 = vrcp.f32 %v3747_v16  ;;  %v9052_v16 = vld [vmem:[%s11772_s4 + $0x30] sm:$0xff] }
 0xcc5   : > { %v10158_v59 = vpop.eup %10157 }
 0xcc6   : > { %v10160_v60 = vpop.eup %10159  ;;  %v3754_v62 = vmul.f32 %v10158_v59, %v10150_v47  ;;  %v9051_v59 = vld [vmem:[%s11772_s4 + $0x28] sm:$0xff] }
 0xcc7   : > { %v3752_v63 = vmul.f32 %v10160_v60, %v10152_v50  ;;  %v9050_v60 = vld [vmem:[%s11772_s4 + $0x20] sm:$0xff] }
 0xcc8   : > { %9682 = vmatmul.mubr.msk.f32.vlgmr.msra.gmra.mxu1 %vm1314_vm2, %v3754_v62 }
 0xcc9   : > { %v10162_v1 = vpop.eup %10161  ;;  %9677 = vmatmul.mubr.msk.f32.vlgmr.msra.gmra.mxu0 %vm1314_vm2, %v3752_v63  ;;  %9690 = vmatpush3.msra.mxu1 %v3407_v12 }
 0xcca   : > { %v10164_v2 = vpop.eup %10163  ;;  %9685 = vmatpush3.msra.mxu0 %v11058_v11  ;;  %9686 = vmatprep.mubr.msk.f32.mxu0 %vm10413_vm1, %v10412_v9  ;;  %v3758_v3 = vmul.f32 %v10162_v1, %v10154_v53 }
 0xccb   : > { %9691 = vmatprep.mubr.msk.f32.mxu1 %vm10413_vm1, %v10412_v9  ;;  %v3756_v26 = vmul.f32 %v10164_v2, %v10156_v54  ;;  %9694 = vmatprep.subr.mxu0 %v10412_v9 }
 0xccc   : > { %9692 = vmatmul.mubr.msk.f32.vlgmr.msra.gmra.mxu1 %vm1314_vm2, %v3758_v3  ;;  %9699 = vmatprep.subr.mxu1 %v10412_v9 }
 0xccd   : > { %9687 = vmatmul.mubr.msk.f32.vlgmr.msra.gmra.mxu0 %vm1314_vm2, %v3756_v26  ;;  %9701 = vmatprep.mubr.msk.f32.mxu1 %vm10413_vm1, %v10412_v9 }
 0xcce   : > { %9695 = vmatpush3.msra.mxu0 %v9006_v4  ;;  %9696 = vmatprep.mubr.msk.f32.mxu0 %vm10413_vm1, %v10412_v9  ;;  %v4372_v4 = vrot.slane %v10927_v6, %v10863_v33 }
 0xccf   : > { %9704 = vmatprep.subr.mxu0 %v10412_v9  ;;  %9700 = vmatpush3.msra.mxu1 %v9007_v5 }
 0xcd0   : > { %9709 = vmatprep.subr.mxu1 %v10412_v9 }
 0xd88   : > { %v3901_v8 = vpop.f32.mrf.mxu1 }
 0xd89   : > { %v3828_v11 = vpop.f32.mrf.mxu0  ;;  %9702 = vmatmul.mubr.msk.f32.vlgmr.msra.gmra.mxu1 %vm1314_vm2, %v3901_v8 }
 0xd8a   : > { %9697 = vmatmul.mubr.msk.f32.vlgmr.msra.gmra.mxu0 %vm1314_vm2, %v3828_v11  ;;  %v9683_v12 = vpop.f32.mrf.mxu1  ;;  %9710 = vmatpush3.msra.mxu1 %v9009_v7  ;;  %v11149_v7 = vld [vmem:[#allocation8 + $0x10] sm:$0xff] }
 0xd8b   : > { %v9678_v13 = vpop.f32.mrf.mxu0  ;;  %9705 = vmatpush3.msra.mxu0 %v9008_v10  ;;  %9706 = vmatprep.mubr.msk.f32.mxu0 %vm10413_vm1, %v10412_v9  ;;  %v4377_v10 = vrot.slane %v10927_v6, %v10866_v34  ;;  %v4618_v12 = vrot.slane %v11149_v7, %v10671_v15 }
 0xd8c   : > { %v4047_v19 = vpop.f32.mrf.mxu1  ;;  %9711 = vmatprep.mubr.msk.f32.mxu1 %vm10413_vm1, %v10412_v9  ;;  %9714 = vmatprep.subr.mxu0 %v10412_v9 }
 0xd8d   : > { %v3974_v20 = vpop.f32.mrf.mxu0  ;;  %9712 = vmatmul.mubr.msk.f32.vlgmr.msra.gmra.mxu1 %vm1314_vm2, %v4047_v19  ;;  %9725 = vmatprep.subr.mxu1 %v10412_v9 }
 0xd8e   : > { %9707 = vmatmul.mubr.msk.f32.vlgmr.msra.gmra.mxu0 %vm1314_vm2, %v3974_v20  ;;  %v9693_v22 = vpop.f32.mrf.mxu1  ;;  %9741 = vmatprep.mubr.msk.f32.mxu1 %vm10413_vm1, %v10412_v9 }
 0xd8f   : > { %v9688_v23 = vpop.f32.mrf.mxu0  ;;  %9722 = vmatprep.mubr.msk.f32.mxu0 %vm10413_vm1, %v10412_v9  ;;  %9715 = vmatpush3.msra.mxu0 %v9053_v14  ;;  %v9066_v22 = vld [vmem:[%s11770_s2 + $0x80] sm:$0xff] }
 0xd90   : > { %9716 = vmatprep.subr.mxu0 %v10412_v9  ;;  %v4623_v23 = vrot.slane %v11149_v7, %v10676_v17 }
 0xd91   : > { %9717 = vmatpush3.msra.mxu0 %v9052_v16 }
 0xd92   : > { %9718 = vmatprep.subr.mxu0 %v10412_v9 }
 0xd93   : > { %9719 = vmatpush3.msra.mxu0 %v9051_v59 }
 0xd94   : > { %9720 = vmatprep.subr.mxu0 %v10412_v9 }
 0xd95   : > { %9721 = vmatpush3.msra.mxu0 %v9050_v60 }
 0xd96   : > { %9744 = vmatprep.subr.mxu0 %v10412_v9 }
 0xe49   : > { %v4193_v24 = vpop.f32.mrf.mxu1 }
 0xe4a   : > { %v4120_v25 = vpop.f32.mrf.mxu0  ;;  %v4344_v28 = vsel %vm407_vm0, %v4193_v24, 0.0 }
 0xe4b   : > { %v4343_v27 = vsel %vm407_vm0, %v4120_v25, 0.0  ;;  %v9703_v29 = vpop.f32.mrf.mxu1 }
 0xe4c   : > { %v9698_v30 = vpop.f32.mrf.mxu0  ;;  %v4345_v32 = vadd.f32 %v4344_v28, %v4343_v27  ;;  %v9067_v27 = vld [vmem:[%s11770_s2 + $0x88] sm:$0xff]  ;;  %v9068_v28 = vld [vmem:[%s11770_s2 + $0x90] sm:$0xff]  ;;  %v9063_v29 = vld [vmem:[%s11773_s5 + $0x78] sm:$0xff] }
 0xe4d   : > { %v4339_v31 = vpop.f32.mrf.mxu1  ;;  %9726 = vmatpush3.msra.mxu1 %v9063_v29  ;;  %v9062_v30 = vld [vmem:[%s11773_s5 + $0x70] sm:$0xff] }
 0xe4e   : > { %v4266_v35 = vpop.f32.mrf.mxu0  ;;  %v4348_v40 = vsel %vm407_vm0, %v4339_v31, 0.0  ;;  %9727 = vmatprep.subr.mxu1 %v10412_v9  ;;  %v9061_v31 = vld [vmem:[%s11773_s5 + $0x68] sm:$0xff]  ;;  %v4600_v29 = vld [vmem:[#allocation7 + $0xb0] sm:$0xff] }
 0xe4f   : > { %v4346_v36 = vsel %vm407_vm0, %v4266_v35, 0.0  ;;  %v9713_v37 = vpop.f32.mrf.mxu1  ;;  %9728 = vmatpush3.msra.mxu1 %v9062_v30  ;;  %v9059_v35 = vld [vmem:[%s11773_s5 + $0x58] sm:$0xff] }
 0xe50   : > { %v4347_v18 = vadd.f32 %v4346_v36, %v4345_v32  ;;  %v9708_v39 = vpop.f32.mrf.mxu0  ;;  %9729 = vmatprep.subr.mxu1 %v10412_v9  ;;  %v9060_v32 = vld [vmem:[%s11773_s5 + $0x60] sm:$0xff]  ;;  %v9058_v36 = vld [vmem:[%s11773_s5 + $0x50] sm:$0xff]  ;;  %v9057_v37 = vld [vmem:[%s11773_s5 + $0x48] sm:$0xff] }
 0xe51   : > { %9730 = vmatpush3.msra.mxu1 %v9061_v31  ;;  %v4601_v30 = vld [vmem:[#allocation7 + $0xb8] sm:$0xff] }
 0xe52   : > { %v4349_v41 = vadd.f32 %v4348_v40, %v4347_v18  ;;  %9731 = vmatprep.subr.mxu1 %v10412_v9  ;;  %v9056_v18 = vld [vmem:[%s11773_s5 + $0x40] sm:$0xff] }
 0xe53   : > { %9732 = vmatpush3.msra.mxu1 %v9060_v32 }
 0xe54   : > { %v4354_v42 = vadd.f32 %v4353_v38, %v4349_v41  ;;  %9733 = vmatprep.subr.mxu1 %v10412_v9  ;;  %v9054_v38 = vld [vmem:[%s11775_s7 + $0x1] ss:$0 sm:$0xff] }
 0xe55   : > { %9734 = vmatpush3.msra.mxu1 %v9059_v35 }
 0xe56   : > { %v11121_v44 = vadd.f32 %v11118_v43, %v4354_v42  ;;  %9735 = vmatprep.subr.mxu1 %v10412_v9 }
 0xe57   : > { %9736 = vmatpush3.msra.mxu1 %v9058_v36 }
 0xe58   : > { %v4356_v45 = vsel %vm407_vm0, %v11121_v44, 0.0  ;;  %9737 = vmatprep.subr.mxu1 %v10412_v9 }
 0xe59   : > { %4357 = vadd.xlane.f32.xlu0 %v4356_v45  ;;  %9738 = vmatpush3.msra.mxu1 %v9057_v37 }
 0xe5a   : > { %9739 = vmatprep.subr.mxu1 %v10412_v9 }
 0xe5b   : > { %9740 = vmatpush3.msra.mxu1 %v9056_v18 }
 0xe5c   : > { %9759 = vmatprep.subr.mxu1 %v10412_v9 }
 0xe5d   : > { %4603 = vadd.xlane.f32.xlu0 %v4602_v46 }
 0xee2   : > { %v4358_v47 = vpop.xlane.xlu0 %4357 }
 0xee3   : > { %v4359_v50 = vmul.f32 0.03125, %v4358_v47 }
 0xee5   : > { %v4360_v51 = vsub.f32 %v11121_v44, %v4359_v50 }
 0xee6   : > { %v4604_v52 = vpop.xlane.xlu0 %4603 }
 0xee7   : > { %v4605_v53 = vmul.f32 0.03125, %v4604_v52  ;;  %v4361_v54 = vmul.f32 %v4360_v51, %v4360_v51 }
 0xee9   : > { %v4606_v55 = vsub.f32 %v10986_v56, %v4605_v53  ;;  %v4362_v57 = vsel %vm407_vm0, %v4361_v54, 0.0 }
 0xeea   : > { %4363 = vadd.xlane.f32.xlu1 %v4362_v57 }
 0xeeb   : > { %v4607_v58 = vmul.f32 %v4606_v55, %v4606_v55 }
 0xeed   : > { %v4608_v0 = vsel %vm407_vm0, %v4607_v58, 0.0  ;;  %v9069_v58 = vld [vmem:[%s11770_s2 + $0x98] sm:$0xff] }
 0xeee   : > { %4609 = vadd.xlane.f32.xlu0 %v4608_v0  ;;  %v4480_v0 = vrot.slane %v10927_v6, %v10949_v21 }
 0xf73   : > { %v4364_v62 = vpop.xlane.xlu1 %4363 }
 0xf74   : > { %v4365_v63 = vmul.f32 0.03125, %v4364_v62 }
 0xf76   : > { %v4366_v1 = vadd.f32 1e-05, %v4365_v63 }
 0xf77   : > { %v4610_v2 = vpop.xlane.xlu0 %4609 }
 0xf78   : > { %10165 = vrsqrt.f32 %v4366_v1  ;;  %v4611_v3 = vmul.f32 0.03125, %v4610_v2 }
 0xf7a   : > { %v4612_v26 = vadd.f32 1e-05, %v4611_v3 }
 0xf7c   : > { %10167 = vrsqrt.f32 %v4612_v26 }
 0xf85   : > { %v10166_v5 = vpop.eup %10165 }
 0xf86   : > { %v4368_v8 = vmul.f32 %v10166_v5, %v4360_v51 }
 0xf88   : > { %v4373_v11 = vmul.f32 %v4372_v4, %v4368_v8  ;;  %v4594_v8 = vld [vmem:[#allocation7 + $0x80] sm:$0xff] }
 0xf89   : > { %v10168_v13 = vpop.eup %10167 }
 0xf8a   : > { %v4614_v19 = vmul.f32 %v10168_v13, %v4606_v55  ;;  %v4378_v20 = vadd.f32 %v4377_v10, %v4373_v11  ;;  %v4595_v10 = vld [vmem:[#allocation7 + $0x88] sm:$0xff]  ;;  %v4571_v13 = vrot.slane %v10927_v6, %v10976_v48 }
 0xf8c   : > { %9723 = vmatmul.mubr.msk.f32.vlgmr.msra.gmra.mxu0 %vm407_vm0, %v4378_v20  ;;  %v4619_v24 = vmul.f32 %v4618_v12, %v4614_v19  ;;  %v4576_v20 = vrot.slane %v10927_v6, %v10979_v49  ;;  %v4598_v6 = vld [vmem:[#allocation7 + $0xa0] sm:$0xff] }
 0xf8d   : > { %9745 = vmatpush3.xpose.msk.msra.mxu0 %vm407_vm0, %v9066_v22  ;;  %9746 = vmatprep.mubr.msk.f32.mxu0 %vm10413_vm1, %v10412_v9 }
 0xf8e   : > { %v4624_v25 = vadd.f32 %v4623_v23, %v4619_v24  ;;  %9749 = vmatprep.subr.mxu0 %v10412_v9 }
 0xf90   : > { %9747 = vmatmul.mubr.msk.f32.vlgmr.msra.gmra.mxu0 %vm407_vm0, %v4624_v25 }
 0xf91   : > { %9750 = vmatpush3.xpose.msk.msra.mxu0 %vm407_vm0, %v9067_v27  ;;  %9751 = vmatprep.mubr.msk.f32.mxu0 %vm10413_vm1, %v10412_v9  ;;  %v4596_v27 = vld [vmem:[#allocation7 + $0x90] sm:$0xff] }
 0xf92   : > { %9754 = vmatprep.subr.mxu0 %v10412_v9 }
 0xf94   : > { %9752 = vmatmul.mubr.msk.f32.vlgmr.msra.gmra.mxu0 %vm407_vm0, %v4624_v25 }
 0xf95   : > { %9755 = vmatpush3.xpose.msk.msra.mxu0 %vm407_vm0, %v9068_v28  ;;  %9756 = vmatprep.mubr.msk.f32.mxu0 %vm10413_vm1, %v10412_v9  ;;  %v4597_v28 = vld [vmem:[#allocation7 + $0x98] sm:$0xff] }
 0xf96   : > { %9764 = vmatprep.subr.mxu0 %v10412_v9 }
 0xf98   : > { %9757 = vmatmul.mubr.msk.f32.vlgmr.msra.gmra.mxu0 %vm407_vm0, %v4624_v25 }
 0xf99   : > { %9766 = vmatprep.mubr.msk.f32.mxu0 %vm10413_vm1, %v10412_v9  ;;  %9765 = vmatpush3.xpose.msk.msra.mxu0 %vm407_vm0, %v4594_v8 }
 0xf9a   : > { %9774 = vmatprep.subr.mxu0 %v10412_v9 }
0x104c   : > { %v4459_v39 = vpop.f32.mrf.mxu0 }
0x104d   : > { %v4460_v40 = vadd.f32 %v9054_v38, %v4459_v39 }
0x104e   : > { %v9724_v41 = vpop.f32.mrf.mxu0 }
0x104f   : > { %v4464_v42 = vmul.f32 0.70710677, %v4460_v40  ;;  %v4463_v54 = vmul.f32 0.5, %v4460_v40 }
0x1050   : > { %v11219_v45 = vpop.f32.mrf.mxu0 }
0x1051   : > { %10169 = verf.f32 %v4464_v42 }
0x1052   : > { %v9748_v46 = vpop.f32.mrf.mxu0 }
0x1054   : > { %v11221_v47 = vpop.f32.mrf.mxu0 }
0x1056   : > { %v9753_v50 = vpop.f32.mrf.mxu0 }
0x1058   : > { %v11223_v51 = vpop.f32.mrf.mxu0 }
0x105a   : > { %v9758_v52 = vpop.f32.mrf.mxu0 }
0x105e   : > { %v10170_v53 = vpop.eup %10169 }
0x105f   : > { %v4466_v55 = vadd.f32 1.0, %v10170_v53 }
0x1061   : > { %v4467_v57 = vmul.f32 %v4466_v55, %v4463_v54 }
0x1063   : > { %9742 = vmatmul.mubr.msk.f32.vlgmr.msra.gmra.mxu1 %vm2384_vm3, %v4467_v57 }
0x1064   : > { %9760 = vmatpush3.xpose.msk.msra.mxu1 %vm407_vm0, %v9069_v58  ;;  %9761 = vmatprep.mubr.msk.f32.mxu1 %vm10413_vm1, %v10412_v9 }
0x1065   : > { %9769 = vmatprep.subr.mxu1 %v10412_v9 }
0x1067   : > { %9762 = vmatmul.mubr.msk.f32.vlgmr.msra.gmra.mxu1 %vm407_vm0, %v4624_v25 }
0x1068   : > { %9771 = vmatprep.mubr.msk.f32.mxu1 %vm10413_vm1, %v10412_v9  ;;  %9770 = vmatpush3.xpose.msk.msra.mxu1 %vm407_vm0, %v4595_v10 }
0x1069   : > { %9779 = vmatprep.subr.mxu1 %v10412_v9 }
0x1123   : > { %v4550_v14 = vpop.f32.mrf.mxu1 }
0x1124   : > { %v4551_v16 = vadd.f32 %v4550_v14, %v4480_v0 }
0x1125   : > { %v9743_v59 = vpop.f32.mrf.mxu1 }
0x1126   : > { %v4554_v60 = vadd.f32 %v4551_v16, %v11121_v44 }
0x1127   : > { %v11239_v62 = vpop.f32.mrf.mxu1 }
0x1128   : > { %v4555_v63 = vsel %vm407_vm0, %v4554_v60, 0.0 }
0x1129   : > { %4556 = vadd.xlane.f32.xlu1 %v4555_v63  ;;  %v9763_v1 = vpop.f32.mrf.mxu1 }
0x11b2   : > { %v4557_v2 = vpop.xlane.xlu1 %4556 }
0x11b3   : > { %v4558_v3 = vmul.f32 0.03125, %v4557_v2 }
0x11b5   : > { %v4559_v26 = vsub.f32 %v4554_v60, %v4558_v3 }
0x11b7   : > { %v4560_v4 = vmul.f32 %v4559_v26, %v4559_v26 }
0x11b9   : > { %v4561_v5 = vsel %vm407_vm0, %v4560_v4, 0.0 }
0x11ba   : > { %4562 = vadd.xlane.f32.xlu1 %v4561_v5 }
0x1243   : > { %v4563_v44 = vpop.xlane.xlu1 %4562 }
0x1244   : > { %v4564_v11 = vmul.f32 0.03125, %v4563_v44 }
0x1246   : > { %v4565_v12 = vadd.f32 1e-05, %v4564_v11 }
0x1248   : > { %10171 = vrsqrt.f32 %v4565_v12 }
0x1255   : > { %v10172_v19 = vpop.eup %10171 }
0x1256   : > { %v4567_v22 = vmul.f32 %v10172_v19, %v4559_v26 }
0x1258   : > { %v4572_v23 = vmul.f32 %v4571_v13, %v4567_v22 }
0x125a   : > { %v4577_v24 = vadd.f32 %v4576_v20, %v4572_v23 }
0x125c   : > { %v11252_v25 = vadd.f32 %v11118_v43, %v4577_v24  ;;  %v4599_v43 = vld [vmem:[#allocation7 + $0xa8] sm:$0xff] }
0x125e   : > { %9767 = vmatmul.mubr.msk.f32.vlgmr.msra.gmra.mxu0 %vm407_vm0, %v11252_v25  ;;  %9772 = vmatmul.mubr.msk.f32.vlgmr.msra.gmra.mxu1 %vm407_vm0, %v11252_v25 }
0x125f   : > { %9775 = vmatpush3.xpose.msk.msra.mxu0 %vm407_vm0, %v4596_v27  ;;  %9780 = vmatpush3.xpose.msk.msra.mxu1 %vm407_vm0, %v4597_v28 }
0x1260   : > { %9776 = vmatprep.mubr.msk.f32.mxu0 %vm10413_vm1, %v10412_v9  ;;  %9781 = vmatprep.mubr.msk.f32.mxu1 %vm10413_vm1, %v10412_v9 }
0x1261   : > { %9784 = vmatprep.subr.mxu0 %v10412_v9  ;;  %9789 = vmatprep.subr.mxu1 %v10412_v9 }
0x1262   : > { %9777 = vmatmul.mubr.msk.f32.vlgmr.msra.gmra.mxu0 %vm407_vm0, %v11252_v25  ;;  %9782 = vmatmul.mubr.msk.f32.vlgmr.msra.gmra.mxu1 %vm407_vm0, %v11252_v25 }
0x1263   : > { %9785 = vmatpush3.xpose.msk.msra.mxu0 %vm407_vm0, %v4598_v6  ;;  %9790 = vmatpush3.xpose.msk.msra.mxu1 %vm407_vm0, %v4599_v43 }
0x1264   : > { %9786 = vmatprep.mubr.msk.f32.mxu0 %vm10413_vm1, %v10412_v9  ;;  %9791 = vmatprep.mubr.msk.f32.mxu1 %vm10413_vm1, %v10412_v9 }
0x1265   : > { %9794 = vmatprep.subr.mxu0 %v10412_v9  ;;  %9799 = vmatprep.subr.mxu1 %v10412_v9 }
0x1266   : > { %9787 = vmatmul.mubr.msk.f32.vlgmr.msra.gmra.mxu0 %vm407_vm0, %v11252_v25  ;;  %9792 = vmatmul.mubr.msk.f32.vlgmr.msra.gmra.mxu1 %vm407_vm0, %v11252_v25 }
0x1267   : > { %9795 = vmatpush3.xpose.msk.msra.mxu0 %vm407_vm0, %v4600_v29  ;;  %9800 = vmatpush3.xpose.msk.msra.mxu1 %vm407_vm0, %v4601_v30 }
0x1268   : > { %9796 = vmatprep.mubr.msk.f32.mxu0 %vm10413_vm1, %v10412_v9  ;;  %9801 = vmatprep.mubr.msk.f32.mxu1 %vm10413_vm1, %v10412_v9 }
0x1269   : > { %9804 = vmatprep.subr.mxu0 %v10412_v9  ;;  %9809 = vmatprep.subr.mxu1 %v10412_v9 }
0x126a   : > { %9797 = vmatmul.mubr.msk.f32.vlgmr.msra.gmra.mxu0 %vm407_vm0, %v11252_v25  ;;  %9802 = vmatmul.mubr.msk.f32.vlgmr.msra.gmra.mxu1 %vm407_vm0, %v11252_v25 }
0x126b   : > { %9806 = vmatprep.mubr.msk.f32.mxu0 %vm10413_vm1, %v10412_v9  ;;  %9811 = vmatprep.mubr.msk.f32.mxu1 %vm10413_vm1, %v10412_v9 }
0x131e   : > { %v4992_v31 = vpop.f32.mrf.mxu0  ;;  %v5065_v32 = vpop.f32.mrf.mxu1 }
0x131f   : > { %9805 = vmatpush3.xpose.msk.msra.mxu0 %vm1314_vm2, %v4992_v31  ;;  %9810 = vmatpush3.xpose.msk.msra.mxu1 %vm1314_vm2, %v5065_v32 }
0x1320   : > { %v9768_v35 = vpop.f32.mrf.mxu0  ;;  %v9773_v36 = vpop.f32.mrf.mxu1  ;;  %9814 = vmatprep.subr.mxu0 %v10412_v9  ;;  %9819 = vmatprep.subr.mxu1 %v10412_v9 }
0x1322   : > { %v5138_v37 = vpop.f32.mrf.mxu0  ;;  %v5211_v18 = vpop.f32.mrf.mxu1  ;;  %9807 = vmatmul.mubr.msk.f32.vlgmr.msra.gmra.mxu0 %vm1314_vm2, %v11219_v45  ;;  %9812 = vmatmul.mubr.msk.f32.vlgmr.msra.gmra.mxu1 %vm1314_vm2, %v11221_v47 }
0x1323   : > { %9815 = vmatpush3.xpose.msk.msra.mxu0 %vm1314_vm2, %v5138_v37  ;;  %9820 = vmatpush3.xpose.msk.msra.mxu1 %vm1314_vm2, %v5211_v18 }
0x1324   : > { %v9778_v38 = vpop.f32.mrf.mxu0  ;;  %v9783_v39 = vpop.f32.mrf.mxu1  ;;  %9816 = vmatprep.mubr.msk.f32.mxu0 %vm10413_vm1, %v10412_v9  ;;  %9821 = vmatprep.mubr.msk.f32.mxu1 %vm10413_vm1, %v10412_v9 }
0x1325   : > { %9824 = vmatprep.subr.mxu0 %v10412_v9  ;;  %9829 = vmatprep.subr.mxu1 %v10412_v9 }
0x1326   : > { %v5284_v40 = vpop.f32.mrf.mxu0  ;;  %v5357_v41 = vpop.f32.mrf.mxu1  ;;  %9817 = vmatmul.mubr.msk.f32.vlgmr.msra.gmra.mxu0 %vm1314_vm2, %v11223_v51  ;;  %9822 = vmatmul.mubr.msk.f32.vlgmr.msra.gmra.mxu1 %vm1314_vm2, %v11239_v62 }
0x1327   : > { %9825 = vmatpush3.msra.mxu0 %v5284_v40  ;;  %9830 = vmatpush3.msra.mxu1 %v5357_v41  ;;  %v9070_v40 = vld [vmem:[%s11770_s2 + $0xa0] sm:$0xff]  ;;  %v9071_v41 = vld [vmem:[%s11770_s2 + $0xa8] sm:$0xff] }
0x1328   : > { %v9788_v42 = vpop.f32.mrf.mxu0  ;;  %v9793_v45 = vpop.f32.mrf.mxu1  ;;  %9826 = vmatprep.mubr.msk.f32.mxu0 %vm10413_vm1, %v10412_v9  ;;  %9831 = vmatprep.mubr.msk.f32.mxu1 %vm10413_vm1, %v10412_v9 }
0x1329   : > { %9834 = vmatprep.subr.mxu0 %v10412_v9  ;;  %9839 = vmatprep.subr.mxu1 %v10412_v9  ;;  %v9073_v42 = vld [vmem:[%s11770_s2 + $0xb8] sm:$0xff] }
0x132a   : > { %v11324_v46 = vpop.f32.mrf.mxu0  ;;  %v5503_v47 = vpop.f32.mrf.mxu1 }
0x132c   : > { %v9798_v50 = vpop.f32.mrf.mxu0  ;;  %v9803_v51 = vpop.f32.mrf.mxu1 }
0x13e2   : > { %v5579_v52 = vpop.f32.mrf.mxu0  ;;  %v5655_v53 = vpop.f32.mrf.mxu1 }
0x13e3   : > { %v5814_v54 = vsel %vm1314_vm2, %v5655_v53, -inf  ;;  %v5811_v55 = vsel %vm1314_vm2, %v5579_v52, -inf }
0x13e4   : > { %5815 = vmax.xlane.f32.xlu1 %v5814_v54  ;;  %v9813_v57 = vpop.f32.mrf.mxu1  ;;  %5812 = vmax.xlane.f32.xlu0 %v5811_v55  ;;  %v9808_v58 = vpop.f32.mrf.mxu0 }
0x13e6   : > { %v5731_v0 = vpop.f32.mrf.mxu0  ;;  %v5807_v14 = vpop.f32.mrf.mxu1 }
0x13e7   : > { %v5820_v16 = vsel %vm1314_vm2, %v5807_v14, -inf  ;;  %v5817_v59 = vsel %vm1314_vm2, %v5731_v0, -inf }
0x13e8   : > { %5821 = vmax.xlane.f32.xlu1 %v5820_v16  ;;  %v9823_v60 = vpop.f32.mrf.mxu1  ;;  %5818 = vmax.xlane.f32.xlu0 %v5817_v59  ;;  %v9818_v62 = vpop.f32.mrf.mxu0 }
0x146d   : > { %v5816_v63 = vpop.xlane.xlu1 %5815  ;;  %v5813_v1 = vpop.xlane.xlu0 %5812 }
0x146e   : > { %v5824_v2 = vsub.f32 %v5655_v53, %v5816_v63  ;;  %v5823_v3 = vsub.f32 %v5579_v52, %v5813_v1 }
0x1470   : > { %v5829_v26 = vmul.f32 1.442695, %v5824_v2  ;;  %v5827_v4 = vmul.f32 1.442695, %v5823_v3 }
0x1471   : > { %v5822_v5 = vpop.xlane.xlu1 %5821  ;;  %v5819_v8 = vpop.xlane.xlu0 %5818 }
0x1472   : > { %10173 = vpow2.f32 %v5829_v26  ;;  %v5826_v10 = vsub.f32 %v5807_v14, %v5822_v5  ;;  %v5825_v44 = vsub.f32 %v5731_v0, %v5819_v8  ;;  %v6449_v26 = vrot.slane %v11149_v7, %v10831_v61 }
0x1473   : > { %10175 = vpow2.f32 %v5827_v4 }
0x1474   : > { %v5833_v11 = vmul.f32 1.442695, %v5826_v10  ;;  %v5831_v12 = vmul.f32 1.442695, %v5825_v44 }
0x1476   : > { %10177 = vpow2.f32 %v5833_v11 }
0x1477   : > { %10179 = vpow2.f32 %v5831_v12  ;;  %v6698_v12 = vsel %vm407_vm0, %v11252_v25, 0.0 }
0x147f   : > { %v10174_v13 = vpop.eup %10173 }
0x1480   : > { %v10176_v19 = vpop.eup %10175  ;;  %v5838_v20 = vsel %vm1314_vm2, %v10174_v13, 0.0 }
0x1481   : > { %5839 = vadd.xlane.f32.xlu1 %v5838_v20  ;;  %v5835_v22 = vsel %vm1314_vm2, %v10176_v19, 0.0 }
0x1482   : > { %5836 = vadd.xlane.f32.xlu0 %v5835_v22 }
0x1483   : > { %v10178_v23 = vpop.eup %10177 }
0x1484   : > { %v10180_v24 = vpop.eup %10179  ;;  %v5844_v27 = vsel %vm1314_vm2, %v10178_v23, 0.0 }
0x1485   : > { %5845 = vadd.xlane.f32.xlu1 %v5844_v27  ;;  %v5841_v28 = vsel %vm1314_vm2, %v10180_v24, 0.0 }
0x1486   : > { %5842 = vadd.xlane.f32.xlu0 %v5841_v28 }
0x150a   : > { %v5840_v6 = vpop.xlane.xlu1 %5839 }
0x150b   : > { %10181 = vrcp.f32 %v5840_v6  ;;  %v5837_v43 = vpop.xlane.xlu0 %5836 }
0x150c   : > { %10183 = vrcp.f32 %v5837_v43 }
0x150e   : > { %v5846_v29 = vpop.xlane.xlu1 %5845 }
0x150f   : > { %10185 = vrcp.f32 %v5846_v29  ;;  %v5843_v30 = vpop.xlane.xlu0 %5842  ;;  %v9117_v29 = vld [vmem:[%s11772_s4 + $0x58] sm:$0xff] }
0x1510   : > { %10187 = vrcp.f32 %v5843_v30  ;;  %v9116_v30 = vld [vmem:[%s11772_s4 + $0x50] sm:$0xff] }
0x1518   : > { %v10182_v31 = vpop.eup %10181 }
0x1519   : > { %v10184_v32 = vpop.eup %10183  ;;  %v5850_v35 = vmul.f32 %v10182_v31, %v10174_v13  ;;  %v9115_v31 = vld [vmem:[%s11772_s4 + $0x48] sm:$0xff] }
0x151a   : > { %v5848_v36 = vmul.f32 %v10184_v32, %v10176_v19  ;;  %v9114_v32 = vld [vmem:[%s11772_s4 + $0x40] sm:$0xff] }
0x151b   : > { %9832 = vmatmul.mubr.msk.f32.vlgmr.msra.gmra.mxu1 %vm1314_vm2, %v5850_v35 }
0x151c   : > { %v10186_v37 = vpop.eup %10185  ;;  %9827 = vmatmul.mubr.msk.f32.vlgmr.msra.gmra.mxu0 %vm1314_vm2, %v5848_v36  ;;  %9840 = vmatpush3.msra.mxu1 %v5503_v47 }
0x151d   : > { %v10188_v18 = vpop.eup %10187  ;;  %9835 = vmatpush3.msra.mxu0 %v11324_v46  ;;  %9836 = vmatprep.mubr.msk.f32.mxu0 %vm10413_vm1, %v10412_v9  ;;  %v5854_v38 = vmul.f32 %v10186_v37, %v10178_v23  ;;  %v9072_v46 = vld [vmem:[%s11770_s2 + $0xb0] sm:$0xff] }
0x151e   : > { %9841 = vmatprep.mubr.msk.f32.mxu1 %vm10413_vm1, %v10412_v9  ;;  %v5852_v39 = vmul.f32 %v10188_v18, %v10180_v24  ;;  %9844 = vmatprep.subr.mxu0 %v10412_v9 }
0x151f   : > { %9842 = vmatmul.mubr.msk.f32.vlgmr.msra.gmra.mxu1 %vm1314_vm2, %v5854_v38  ;;  %9849 = vmatprep.subr.mxu1 %v10412_v9 }
0x1520   : > { %9837 = vmatmul.mubr.msk.f32.vlgmr.msra.gmra.mxu0 %vm1314_vm2, %v5852_v39  ;;  %9851 = vmatprep.mubr.msk.f32.mxu1 %vm10413_vm1, %v10412_v9 }
0x1521   : > { %9845 = vmatpush3.msra.mxu0 %v9070_v40  ;;  %9846 = vmatprep.mubr.msk.f32.mxu0 %vm10413_vm1, %v10412_v9  ;;  %v6468_v40 = vrot.slane %v11149_v7, %v10863_v33 }
0x1522   : > { %9854 = vmatprep.subr.mxu0 %v10412_v9  ;;  %9850 = vmatpush3.msra.mxu1 %v9071_v41 }
0x1523   : > { %9859 = vmatprep.subr.mxu1 %v10412_v9 }
0x15db   : > { %v5997_v45 = vpop.f32.mrf.mxu1 }
0x15dc   : > { %v5924_v47 = vpop.f32.mrf.mxu0  ;;  %9852 = vmatmul.mubr.msk.f32.vlgmr.msra.gmra.mxu1 %vm1314_vm2, %v5997_v45 }
0x15dd   : > { %9847 = vmatmul.mubr.msk.f32.vlgmr.msra.gmra.mxu0 %vm1314_vm2, %v5924_v47  ;;  %v9833_v50 = vpop.f32.mrf.mxu1  ;;  %9860 = vmatpush3.msra.mxu1 %v9073_v42  ;;  %v11412_v42 = vld [vmem:[#allocation8 + $0x18] sm:$0xff] }
0x15de   : > { %v9828_v51 = vpop.f32.mrf.mxu0  ;;  %9855 = vmatpush3.msra.mxu0 %v9072_v46  ;;  %9856 = vmatprep.mubr.msk.f32.mxu0 %vm10413_vm1, %v10412_v9  ;;  %v6473_v46 = vrot.slane %v11149_v7, %v10866_v34  ;;  %v6714_v50 = vrot.slane %v11412_v42, %v10671_v15  ;;  %v9131_v15 = vld [vmem:[%s11770_s2 + $0xc8] sm:$0xff] }
0x15df   : > { %v6143_v52 = vpop.f32.mrf.mxu1  ;;  %9861 = vmatprep.mubr.msk.f32.mxu1 %vm10413_vm1, %v10412_v9  ;;  %9864 = vmatprep.subr.mxu0 %v10412_v9 }
0x15e0   : > { %v6070_v53 = vpop.f32.mrf.mxu0  ;;  %9862 = vmatmul.mubr.msk.f32.vlgmr.msra.gmra.mxu1 %vm1314_vm2, %v6143_v52  ;;  %9875 = vmatprep.subr.mxu1 %v10412_v9 }
0x15e1   : > { %9857 = vmatmul.mubr.msk.f32.vlgmr.msra.gmra.mxu0 %vm1314_vm2, %v6070_v53  ;;  %v9843_v54 = vpop.f32.mrf.mxu1  ;;  %9891 = vmatprep.mubr.msk.f32.mxu1 %vm10413_vm1, %v10412_v9 }
0x15e2   : > { %v9838_v55 = vpop.f32.mrf.mxu0  ;;  %9872 = vmatprep.mubr.msk.f32.mxu0 %vm10413_vm1, %v10412_v9  ;;  %9865 = vmatpush3.msra.mxu0 %v9117_v29  ;;  %v9130_v54 = vld [vmem:[%s11770_s2 + $0xc0] sm:$0xff] }
0x15e3   : > { %9866 = vmatprep.subr.mxu0 %v10412_v9  ;;  %v6719_v55 = vrot.slane %v11412_v42, %v10676_v17  ;;  %v9132_v17 = vld [vmem:[%s11770_s2 + $0xd0] sm:$0xff] }
0x15e4   : > { %9867 = vmatpush3.msra.mxu0 %v9116_v30 }
0x15e5   : > { %9868 = vmatprep.subr.mxu0 %v10412_v9 }
0x15e6   : > { %9869 = vmatpush3.msra.mxu0 %v9115_v31 }
0x15e7   : > { %9870 = vmatprep.subr.mxu0 %v10412_v9 }
0x15e8   : > { %9871 = vmatpush3.msra.mxu0 %v9114_v32 }
0x15e9   : > { %9894 = vmatprep.subr.mxu0 %v10412_v9 }
0x169c   : > { %v6289_v57 = vpop.f32.mrf.mxu1 }
0x169d   : > { %v6216_v58 = vpop.f32.mrf.mxu0  ;;  %v6440_v14 = vsel %vm407_vm0, %v6289_v57, 0.0 }
0x169e   : > { %v6439_v0 = vsel %vm407_vm0, %v6216_v58, 0.0  ;;  %v9853_v16 = vpop.f32.mrf.mxu1 }
0x169f   : > { %v9848_v59 = vpop.f32.mrf.mxu0  ;;  %v6441_v62 = vadd.f32 %v6440_v14, %v6439_v0  ;;  %v9127_v0 = vld [vmem:[%s11773_s5 + $0xb8] sm:$0xff]  ;;  %v9126_v14 = vld [vmem:[%s11773_s5 + $0xb0] sm:$0xff]  ;;  %v9125_v16 = vld [vmem:[%s11773_s5 + $0xa8] sm:$0xff] }
0x16a0   : > { %v6435_v60 = vpop.f32.mrf.mxu1  ;;  %9876 = vmatpush3.msra.mxu1 %v9127_v0  ;;  %v9124_v59 = vld [vmem:[%s11773_s5 + $0xa0] sm:$0xff] }
0x16a1   : > { %v6362_v63 = vpop.f32.mrf.mxu0  ;;  %v6444_v5 = vsel %vm407_vm0, %v6435_v60, 0.0  ;;  %9877 = vmatprep.subr.mxu1 %v10412_v9  ;;  %v9123_v60 = vld [vmem:[%s11773_s5 + $0x98] sm:$0xff] }
0x16a2   : > { %v6442_v1 = vsel %vm407_vm0, %v6362_v63, 0.0  ;;  %v9863_v2 = vpop.f32.mrf.mxu1  ;;  %9878 = vmatpush3.msra.mxu1 %v9126_v14  ;;  %v9121_v63 = vld [vmem:[%s11773_s5 + $0x88] sm:$0xff] }
0x16a3   : > { %v6443_v3 = vadd.f32 %v6442_v1, %v6441_v62  ;;  %v9858_v4 = vpop.f32.mrf.mxu0  ;;  %9879 = vmatprep.subr.mxu1 %v10412_v9  ;;  %v9122_v62 = vld [vmem:[%s11773_s5 + $0x90] sm:$0xff]  ;;  %v9120_v1 = vld [vmem:[%s11773_s5 + $0x80] sm:$0xff] }
0x16a4   : > { %9880 = vmatpush3.msra.mxu1 %v9125_v16  ;;  %v9118_v2 = vld [vmem:[%s11775_s7 + $0x2] ss:$0 sm:$0xff] }
0x16a5   : > { %v6445_v8 = vadd.f32 %v6444_v5, %v6443_v3  ;;  %9881 = vmatprep.subr.mxu1 %v10412_v9 }
0x16a6   : > { %9882 = vmatpush3.msra.mxu1 %v9124_v59 }
0x16a7   : > { %v6450_v10 = vadd.f32 %v6449_v26, %v6445_v8  ;;  %9883 = vmatprep.subr.mxu1 %v10412_v9 }
0x16a8   : > { %9884 = vmatpush3.msra.mxu1 %v9123_v60 }
0x16a9   : > { %v11384_v44 = vadd.f32 %v6450_v10, %v10986_v56  ;;  %9885 = vmatprep.subr.mxu1 %v10412_v9 }
0x16aa   : > { %9886 = vmatpush3.msra.mxu1 %v9122_v62 }
0x16ab   : > { %v6452_v11 = vsel %vm407_vm0, %v11384_v44, 0.0  ;;  %9887 = vmatprep.subr.mxu1 %v10412_v9 }
0x16ac   : > { %6453 = vadd.xlane.f32.xlu0 %v6452_v11  ;;  %9888 = vmatpush3.msra.mxu1 %v9121_v63 }
0x16ad   : > { %9889 = vmatprep.subr.mxu1 %v10412_v9 }
0x16ae   : > { %9890 = vmatpush3.msra.mxu1 %v9120_v1 }
0x16af   : > { %9909 = vmatprep.subr.mxu1 %v10412_v9 }
0x16b0   : > { %6699 = vadd.xlane.f32.xlu0 %v6698_v12 }
0x1735   : > { %v6454_v13 = vpop.xlane.xlu0 %6453 }
0x1736   : > { %v6455_v19 = vmul.f32 0.03125, %v6454_v13 }
0x1738   : > { %v6456_v20 = vsub.f32 %v11384_v44, %v6455_v19 }
0x1739   : > { %v6700_v22 = vpop.xlane.xlu0 %6699 }
0x173a   : > { %v6701_v23 = vmul.f32 0.03125, %v6700_v22  ;;  %v6457_v24 = vmul.f32 %v6456_v20, %v6456_v20 }
0x173c   : > { %v6702_v27 = vsub.f32 %v11252_v25, %v6701_v23  ;;  %v6458_v28 = vsel %vm407_vm0, %v6457_v24, 0.0 }
0x173d   : > { %6459 = vadd.xlane.f32.xlu1 %v6458_v28  ;;  %v6576_v28 = vrot.slane %v11149_v7, %v10949_v21 }
0x173e   : > { %v6703_v6 = vmul.f32 %v6702_v27, %v6702_v27 }
0x1740   : > { %v6704_v43 = vsel %vm407_vm0, %v6703_v6, 0.0 }
0x1741   : > { %6705 = vadd.xlane.f32.xlu0 %v6704_v43 }
0x17c6   : > { %v6460_v35 = vpop.xlane.xlu1 %6459 }
0x17c7   : > { %v6461_v36 = vmul.f32 0.03125, %v6460_v35 }
0x17c9   : > { %v6462_v37 = vadd.f32 1e-05, %v6461_v36 }
0x17ca   : > { %v6706_v18 = vpop.xlane.xlu0 %6705 }
0x17cb   : > { %10189 = vrsqrt.f32 %v6462_v37  ;;  %v6707_v38 = vmul.f32 0.03125, %v6706_v18 }
0x17cd   : > { %v6708_v39 = vadd.f32 1e-05, %v6707_v38 }
0x17cf   : > { %10191 = vrsqrt.f32 %v6708_v39 }
0x17d8   : > { %v10190_v41 = vpop.eup %10189 }
0x17d9   : > { %v6464_v45 = vmul.f32 %v10190_v41, %v6456_v20  ;;  %v6691_v41 = vld [vmem:[#allocation7 + $0xc8] sm:$0xff] }
0x17db   : > { %v6469_v47 = vmul.f32 %v6468_v40, %v6464_v45  ;;  %v6690_v40 = vld [vmem:[#allocation7 + $0xc0] sm:$0xff] }
0x17dc   : > { %v10192_v51 = vpop.eup %10191 }
0x17dd   : > { %v6710_v52 = vmul.f32 %v10192_v51, %v6702_v27  ;;  %v6474_v53 = vadd.f32 %v6473_v46, %v6469_v47  ;;  %v9133_v27 = vld [vmem:[%s11770_s2 + $0xd8] sm:$0xff]  ;;  %v6667_v47 = vrot.slane %v11149_v7, %v10976_v48  ;;  %v6672_v51 = vrot.slane %v11149_v7, %v10979_v49  ;;  %v6695_v7 = vld [vmem:[#allocation7 + $0xe8] sm:$0xff] }
0x17df   : > { %9873 = vmatmul.mubr.msk.f32.vlgmr.msra.gmra.mxu0 %vm407_vm0, %v6474_v53  ;;  %v6715_v57 = vmul.f32 %v6714_v50, %v6710_v52 }
0x17e0   : > { %9895 = vmatpush3.xpose.msk.msra.mxu0 %vm407_vm0, %v9130_v54  ;;  %9896 = vmatprep.mubr.msk.f32.mxu0 %vm10413_vm1, %v10412_v9 }
0x17e1   : > { %v6720_v58 = vadd.f32 %v6719_v55, %v6715_v57  ;;  %9899 = vmatprep.subr.mxu0 %v10412_v9  ;;  %v6692_v57 = vld [vmem:[#allocation7 + $0xd0] sm:$0xff] }
0x17e3   : > { %9897 = vmatmul.mubr.msk.f32.vlgmr.msra.gmra.mxu0 %vm407_vm0, %v6720_v58 }
0x17e4   : > { %9900 = vmatpush3.xpose.msk.msra.mxu0 %vm407_vm0, %v9131_v15  ;;  %9901 = vmatprep.mubr.msk.f32.mxu0 %vm10413_vm1, %v10412_v9  ;;  %v6696_v15 = vld [vmem:[#allocation7 + $0xf0] sm:$0xff] }
0x17e5   : > { %9904 = vmatprep.subr.mxu0 %v10412_v9 }
0x17e7   : > { %9902 = vmatmul.mubr.msk.f32.vlgmr.msra.gmra.mxu0 %vm407_vm0, %v6720_v58 }
0x17e8   : > { %9905 = vmatpush3.xpose.msk.msra.mxu0 %vm407_vm0, %v9132_v17  ;;  %9906 = vmatprep.mubr.msk.f32.mxu0 %vm10413_vm1, %v10412_v9  ;;  %v6697_v17 = vld [vmem:[#allocation7 + $0xf8] sm:$0xff] }
0x17e9   : > { %9914 = vmatprep.subr.mxu0 %v10412_v9 }
0x17eb   : > { %9907 = vmatmul.mubr.msk.f32.vlgmr.msra.gmra.mxu0 %vm407_vm0, %v6720_v58 }
0x17ec   : > { %9916 = vmatprep.mubr.msk.f32.mxu0 %vm10413_vm1, %v10412_v9  ;;  %9915 = vmatpush3.xpose.msk.msra.mxu0 %vm407_vm0, %v6690_v40 }
0x17ed   : > { %9924 = vmatprep.subr.mxu0 %v10412_v9 }
0x189f   : > { %v6555_v3 = vpop.f32.mrf.mxu0 }
0x18a0   : > { %v6556_v26 = vadd.f32 %v9118_v2, %v6555_v3 }
0x18a1   : > { %v9874_v4 = vpop.f32.mrf.mxu0 }
0x18a2   : > { %v6560_v5 = vmul.f32 0.70710677, %v6556_v26  ;;  %v6559_v22 = vmul.f32 0.5, %v6556_v26 }
0x18a3   : > { %v11482_v8 = vpop.f32.mrf.mxu0 }
0x18a4   : > { %10193 = verf.f32 %v6560_v5 }
0x18a5   : > { %v9898_v10 = vpop.f32.mrf.mxu0 }
0x18a7   : > { %v11484_v11 = vpop.f32.mrf.mxu0 }
0x18a9   : > { %v9903_v12 = vpop.f32.mrf.mxu0 }
0x18ab   : > { %v11486_v13 = vpop.f32.mrf.mxu0 }
0x18ad   : > { %v9908_v19 = vpop.f32.mrf.mxu0 }
0x18b1   : > { %v10194_v20 = vpop.eup %10193 }
0x18b2   : > { %v6562_v23 = vadd.f32 1.0, %v10194_v20 }
0x18b4   : > { %v6563_v24 = vmul.f32 %v6562_v23, %v6559_v22 }
0x18b6   : > { %9892 = vmatmul.mubr.msk.f32.vlgmr.msra.gmra.mxu1 %vm2384_vm3, %v6563_v24 }
0x18b7   : > { %9910 = vmatpush3.xpose.msk.msra.mxu1 %vm407_vm0, %v9133_v27  ;;  %9911 = vmatprep.mubr.msk.f32.mxu1 %vm10413_vm1, %v10412_v9 }
0x18b8   : > { %9919 = vmatprep.subr.mxu1 %v10412_v9 }
0x18ba   : > { %9912 = vmatmul.mubr.msk.f32.vlgmr.msra.gmra.mxu1 %vm407_vm0, %v6720_v58  ;;  %v6693_v58 = vld [vmem:[#allocation7 + $0xd8] sm:$0xff] }
0x18bb   : > { %9921 = vmatprep.mubr.msk.f32.mxu1 %vm10413_vm1, %v10412_v9  ;;  %9920 = vmatpush3.xpose.msk.msra.mxu1 %vm407_vm0, %v6691_v41 }
0x18bc   : > { %9929 = vmatprep.subr.mxu1 %v10412_v9 }
0x1976   : > { %v6646_v6 = vpop.f32.mrf.mxu1 }
0x1977   : > { %v6647_v43 = vadd.f32 %v6646_v6, %v6576_v28 }
0x1978   : > { %v9893_v29 = vpop.f32.mrf.mxu1 }
0x1979   : > { %v6650_v30 = vadd.f32 %v6647_v43, %v11384_v44 }
0x197a   : > { %v11502_v31 = vpop.f32.mrf.mxu1 }
0x197b   : > { %v6651_v32 = vsel %vm407_vm0, %v6650_v30, 0.0 }
0x197c   : > { %6652 = vadd.xlane.f32.xlu1 %v6651_v32  ;;  %v9913_v35 = vpop.f32.mrf.mxu1 }
0x1a05   : > { %v6653_v36 = vpop.xlane.xlu1 %6652 }
0x1a06   : > { %v6654_v37 = vmul.f32 0.03125, %v6653_v36 }
0x1a08   : > { %v6655_v18 = vsub.f32 %v6650_v30, %v6654_v37 }
0x1a0a   : > { %v6656_v38 = vmul.f32 %v6655_v18, %v6655_v18 }
0x1a0c   : > { %v6657_v39 = vsel %vm407_vm0, %v6656_v38, 0.0 }
0x1a0d   : > { %6658 = vadd.xlane.f32.xlu1 %v6657_v39 }
0x1a96   : > { %v6659_v44 = vpop.xlane.xlu1 %6658 }
0x1a97   : > { %v6660_v45 = vmul.f32 0.03125, %v6659_v44 }
0x1a99   : > { %v6661_v46 = vadd.f32 1e-05, %v6660_v45 }
0x1a9b   : > { %10195 = vrsqrt.f32 %v6661_v46 }
0x1aa8   : > { %v10196_v50 = vpop.eup %10195 }
0x1aa9   : > { %v6663_v52 = vmul.f32 %v10196_v50, %v6655_v18 }
0x1aab   : > { %v6668_v53 = vmul.f32 %v6667_v47, %v6663_v52 }
0x1aad   : > { %v6673_v54 = vadd.f32 %v6672_v51, %v6668_v53 }
0x1aaf   : > { %v11515_v55 = vadd.f32 %v6673_v54, %v10986_v56  ;;  %v6694_v56 = vld [vmem:[#allocation7 + $0xe0] sm:$0xff] }
0x1ab1   : > { %9917 = vmatmul.mubr.msk.f32.vlgmr.msra.gmra.mxu0 %vm407_vm0, %v11515_v55  ;;  %9922 = vmatmul.mubr.msk.f32.vlgmr.msra.gmra.mxu1 %vm407_vm0, %v11515_v55 }
0x1ab2   : > { %9925 = vmatpush3.xpose.msk.msra.mxu0 %vm407_vm0, %v6692_v57  ;;  %9930 = vmatpush3.xpose.msk.msra.mxu1 %vm407_vm0, %v6693_v58 }
0x1ab3   : > { %9926 = vmatprep.mubr.msk.f32.mxu0 %vm10413_vm1, %v10412_v9  ;;  %9931 = vmatprep.mubr.msk.f32.mxu1 %vm10413_vm1, %v10412_v9 }
0x1ab4   : > { %9934 = vmatprep.subr.mxu0 %v10412_v9  ;;  %9939 = vmatprep.subr.mxu1 %v10412_v9 }
0x1ab5   : > { %9927 = vmatmul.mubr.msk.f32.vlgmr.msra.gmra.mxu0 %vm407_vm0, %v11515_v55  ;;  %9932 = vmatmul.mubr.msk.f32.vlgmr.msra.gmra.mxu1 %vm407_vm0, %v11515_v55 }
0x1ab6   : > { %9935 = vmatpush3.xpose.msk.msra.mxu0 %vm407_vm0, %v6694_v56  ;;  %9940 = vmatpush3.xpose.msk.msra.mxu1 %vm407_vm0, %v6695_v7 }
0x1ab7   : > { %9936 = vmatprep.mubr.msk.f32.mxu0 %vm10413_vm1, %v10412_v9  ;;  %9941 = vmatprep.mubr.msk.f32.mxu1 %vm10413_vm1, %v10412_v9 }
0x1ab8   : > { %9944 = vmatprep.subr.mxu0 %v10412_v9  ;;  %9949 = vmatprep.subr.mxu1 %v10412_v9 }
0x1ab9   : > { %9937 = vmatmul.mubr.msk.f32.vlgmr.msra.gmra.mxu0 %vm407_vm0, %v11515_v55  ;;  %9942 = vmatmul.mubr.msk.f32.vlgmr.msra.gmra.mxu1 %vm407_vm0, %v11515_v55 }
0x1aba   : > { %9945 = vmatpush3.xpose.msk.msra.mxu0 %vm407_vm0, %v6696_v15  ;;  %9950 = vmatpush3.xpose.msk.msra.mxu1 %vm407_vm0, %v6697_v17 }
0x1abb   : > { %9946 = vmatprep.mubr.msk.f32.mxu0 %vm10413_vm1, %v10412_v9  ;;  %9951 = vmatprep.mubr.msk.f32.mxu1 %vm10413_vm1, %v10412_v9 }
0x1abc   : > { %9954 = vmatprep.subr.mxu0 %v10412_v9  ;;  %9959 = vmatprep.subr.mxu1 %v10412_v9 }
0x1abd   : > { %9947 = vmatmul.mubr.msk.f32.vlgmr.msra.gmra.mxu0 %vm407_vm0, %v11515_v55  ;;  %9952 = vmatmul.mubr.msk.f32.vlgmr.msra.gmra.mxu1 %vm407_vm0, %v11515_v55 }
0x1abe   : > { %9956 = vmatprep.mubr.msk.f32.mxu0 %vm10413_vm1, %v10412_v9  ;;  %9961 = vmatprep.mubr.msk.f32.mxu1 %vm10413_vm1, %v10412_v9 }
0x1b71   : > { %v7088_v0 = vpop.f32.mrf.mxu0  ;;  %v7161_v14 = vpop.f32.mrf.mxu1 }
0x1b72   : > { %9955 = vmatpush3.xpose.msk.msra.mxu0 %vm1314_vm2, %v7088_v0  ;;  %9960 = vmatpush3.xpose.msk.msra.mxu1 %vm1314_vm2, %v7161_v14 }
0x1b73   : > { %v9918_v16 = vpop.f32.mrf.mxu0  ;;  %v9923_v59 = vpop.f32.mrf.mxu1  ;;  %9964 = vmatprep.subr.mxu0 %v10412_v9  ;;  %9969 = vmatprep.subr.mxu1 %v10412_v9 }
0x1b75   : > { %v7234_v60 = vpop.f32.mrf.mxu0  ;;  %v7307_v62 = vpop.f32.mrf.mxu1  ;;  %9957 = vmatmul.mubr.msk.f32.vlgmr.msra.gmra.mxu0 %vm1314_vm2, %v11482_v8  ;;  %9962 = vmatmul.mubr.msk.f32.vlgmr.msra.gmra.mxu1 %vm1314_vm2, %v11484_v11 }
0x1b76   : > { %9965 = vmatpush3.xpose.msk.msra.mxu0 %vm1314_vm2, %v7234_v60  ;;  %9970 = vmatpush3.xpose.msk.msra.mxu1 %vm1314_vm2, %v7307_v62 }
0x1b77   : > { %v9928_v63 = vpop.f32.mrf.mxu0  ;;  %v9933_v1 = vpop.f32.mrf.mxu1  ;;  %9966 = vmatprep.mubr.msk.f32.mxu0 %vm10413_vm1, %v10412_v9  ;;  %9971 = vmatprep.mubr.msk.f32.mxu1 %vm10413_vm1, %v10412_v9 }
0x1b78   : > { %9974 = vmatprep.subr.mxu0 %v10412_v9  ;;  %9979 = vmatprep.subr.mxu1 %v10412_v9  ;;  %v9134_v63 = vld [vmem:[%s11770_s2 + $0xe0] sm:$0xff]  ;;  %v9135_v1 = vld [vmem:[%s11770_s2 + $0xe8] sm:$0xff] }
0x1b79   : > { %v7380_v2 = vpop.f32.mrf.mxu0  ;;  %v7453_v3 = vpop.f32.mrf.mxu1  ;;  %9967 = vmatmul.mubr.msk.f32.vlgmr.msra.gmra.mxu0 %vm1314_vm2, %v11486_v13  ;;  %9972 = vmatmul.mubr.msk.f32.vlgmr.msra.gmra.mxu1 %vm1314_vm2, %v11502_v31 }
0x1b7a   : > { %9975 = vmatpush3.msra.mxu0 %v7380_v2  ;;  %9980 = vmatpush3.msra.mxu1 %v7453_v3  ;;  %v9137_v2 = vld [vmem:[%s11770_s2 + $0xf8] sm:$0xff] }
0x1b7b   : > { %v9938_v26 = vpop.f32.mrf.mxu0  ;;  %v9943_v4 = vpop.f32.mrf.mxu1  ;;  %9976 = vmatprep.mubr.msk.f32.mxu0 %vm10413_vm1, %v10412_v9  ;;  %9981 = vmatprep.mubr.msk.f32.mxu1 %vm10413_vm1, %v10412_v9 }
0x1b7c   : > { %9984 = vmatprep.subr.mxu0 %v10412_v9  ;;  %9989 = vmatprep.subr.mxu1 %v10412_v9  ;;  %v9136_v26 = vld [vmem:[%s11770_s2 + $0xf0] sm:$0xff] }
0x1b7d   : > { %v11587_v5 = vpop.f32.mrf.mxu0  ;;  %v7599_v8 = vpop.f32.mrf.mxu1 }
0x1b7f   : > { %v9948_v10 = vpop.f32.mrf.mxu0  ;;  %v9953_v11 = vpop.f32.mrf.mxu1 }
0x1c35   : > { %v7675_v12 = vpop.f32.mrf.mxu0  ;;  %v7751_v13 = vpop.f32.mrf.mxu1 }
0x1c36   : > { %v7910_v19 = vsel %vm1314_vm2, %v7751_v13, -inf  ;;  %v7907_v20 = vsel %vm1314_vm2, %v7675_v12, -inf }
0x1c37   : > { %7911 = vmax.xlane.f32.xlu1 %v7910_v19  ;;  %v9963_v22 = vpop.f32.mrf.mxu1  ;;  %7908 = vmax.xlane.f32.xlu0 %v7907_v20  ;;  %v9958_v23 = vpop.f32.mrf.mxu0 }
0x1c39   : > { %v7827_v24 = vpop.f32.mrf.mxu0  ;;  %v7903_v27 = vpop.f32.mrf.mxu1 }
0x1c3a   : > { %v7916_v28 = vsel %vm1314_vm2, %v7903_v27, -inf  ;;  %v7913_v6 = vsel %vm1314_vm2, %v7827_v24, -inf }
0x1c3b   : > { %7917 = vmax.xlane.f32.xlu1 %v7916_v28  ;;  %v9973_v43 = vpop.f32.mrf.mxu1  ;;  %7914 = vmax.xlane.f32.xlu0 %v7913_v6  ;;  %v9968_v29 = vpop.f32.mrf.mxu0 }
0x1cc0   : > { %v7912_v30 = vpop.xlane.xlu1 %7911  ;;  %v7909_v31 = vpop.xlane.xlu0 %7908 }
0x1cc1   : > { %v7920_v32 = vsub.f32 %v7751_v13, %v7912_v30  ;;  %v7919_v35 = vsub.f32 %v7675_v12, %v7909_v31 }
0x1cc3   : > { %v7925_v36 = vmul.f32 1.442695, %v7920_v32  ;;  %v7923_v37 = vmul.f32 1.442695, %v7919_v35  ;;  %v8545_v32 = vrot.slane %v11412_v42, %v10831_v61  ;;  %v9181_v61 = vld [vmem:[%s11772_s4 + $0x78] sm:$0xff] }
0x1cc4   : > { %v7918_v18 = vpop.xlane.xlu1 %7917  ;;  %v7915_v38 = vpop.xlane.xlu0 %7914 }
0x1cc5   : > { %10197 = vpow2.f32 %v7925_v36  ;;  %v7922_v39 = vsub.f32 %v7903_v27, %v7918_v18  ;;  %v7921_v40 = vsub.f32 %v7827_v24, %v7915_v38 }
0x1cc6   : > { %10199 = vpow2.f32 %v7923_v37 }
0x1cc7   : > { %v7929_v41 = vmul.f32 1.442695, %v7922_v39  ;;  %v7927_v44 = vmul.f32 1.442695, %v7921_v40 }
0x1cc9   : > { %10201 = vpow2.f32 %v7929_v41 }
0x1cca   : > { %10203 = vpow2.f32 %v7927_v44 }
0x1cd2   : > { %v10198_v45 = vpop.eup %10197 }
0x1cd3   : > { %v10200_v46 = vpop.eup %10199  ;;  %v7934_v47 = vsel %vm1314_vm2, %v10198_v45, 0.0 }
0x1cd4   : > { %7935 = vadd.xlane.f32.xlu1 %v7934_v47  ;;  %v7931_v50 = vsel %vm1314_vm2, %v10200_v46, 0.0  ;;  %v9180_v47 = vld [vmem:[%s11772_s4 + $0x70] sm:$0xff] }
0x1cd5   : > { %7932 = vadd.xlane.f32.xlu0 %v7931_v50  ;;  %v9179_v50 = vld [vmem:[%s11772_s4 + $0x68] sm:$0xff] }
0x1cd6   : > { %v10202_v51 = vpop.eup %10201 }
0x1cd7   : > { %v10204_v52 = vpop.eup %10203  ;;  %v7940_v53 = vsel %vm1314_vm2, %v10202_v51, 0.0 }
0x1cd8   : > { %7941 = vadd.xlane.f32.xlu1 %v7940_v53  ;;  %v7937_v54 = vsel %vm1314_vm2, %v10204_v52, 0.0 }
0x1cd9   : > { %7938 = vadd.xlane.f32.xlu0 %v7937_v54 }
0x1d5d   : > { %v7936_v57 = vpop.xlane.xlu1 %7935 }
0x1d5e   : > { %10205 = vrcp.f32 %v7936_v57  ;;  %v7933_v58 = vpop.xlane.xlu0 %7932  ;;  %v8564_v57 = vrot.slane %v11412_v42, %v10863_v33  ;;  %v9190_v33 = vld [vmem:[%s11773_s5 + $0xf0] sm:$0xff] }
0x1d5f   : > { %10207 = vrcp.f32 %v7933_v58 }
0x1d61   : > { %v7942_v56 = vpop.xlane.xlu1 %7941 }
0x1d62   : > { %10209 = vrcp.f32 %v7942_v56  ;;  %v7939_v7 = vpop.xlane.xlu0 %7938 }
0x1d63   : > { %10211 = vrcp.f32 %v7939_v7  ;;  %v8569_v7 = vrot.slane %v11412_v42, %v10866_v34  ;;  %v9189_v34 = vld [vmem:[%s11773_s5 + $0xe8] sm:$0xff] }
0x1d6b   : > { %v10206_v15 = vpop.eup %10205 }
0x1d6c   : > { %v10208_v17 = vpop.eup %10207  ;;  %v7946_v0 = vmul.f32 %v10206_v15, %v10198_v45 }
0x1d6d   : > { %v7944_v14 = vmul.f32 %v10208_v17, %v10200_v46 }
0x1d6e   : > { %9982 = vmatmul.mubr.msk.f32.vlgmr.msra.gmra.mxu1 %vm1314_vm2, %v7946_v0  ;;  %v9191_v0 = vld [vmem:[%s11773_s5 + $0xf8] sm:$0xff] }
0x1d6f   : > { %v10210_v16 = vpop.eup %10209  ;;  %9977 = vmatmul.mubr.msk.f32.vlgmr.msra.gmra.mxu0 %vm1314_vm2, %v7944_v14  ;;  %9990 = vmatpush3.msra.mxu1 %v7599_v8  ;;  %v9188_v14 = vld [vmem:[%s11773_s5 + $0xe0] sm:$0xff] }
0x1d70   : > { %v10212_v59 = vpop.eup %10211  ;;  %9985 = vmatpush3.msra.mxu0 %v11587_v5  ;;  %9986 = vmatprep.mubr.msk.f32.mxu0 %vm10413_vm1, %v10412_v9  ;;  %v7950_v60 = vmul.f32 %v10210_v16, %v10202_v51  ;;  %v9178_v51 = vld [vmem:[%s11772_s4 + $0x60] sm:$0xff]  ;;  %v9187_v16 = vld [vmem:[%s11773_s5 + $0xd8] sm:$0xff] }
0x1d71   : > { %9991 = vmatprep.mubr.msk.f32.mxu1 %vm10413_vm1, %v10412_v9  ;;  %v7948_v62 = vmul.f32 %v10212_v59, %v10204_v52  ;;  %9994 = vmatprep.subr.mxu0 %v10412_v9  ;;  %v9186_v59 = vld [vmem:[%s11773_s5 + $0xd0] sm:$0xff] }
0x1d72   : > { %9992 = vmatmul.mubr.msk.f32.vlgmr.msra.gmra.mxu1 %vm1314_vm2, %v7950_v60  ;;  %9999 = vmatprep.subr.mxu1 %v10412_v9  ;;  %v9185_v60 = vld [vmem:[%s11773_s5 + $0xc8] sm:$0xff] }
0x1d73   : > { %9987 = vmatmul.mubr.msk.f32.vlgmr.msra.gmra.mxu0 %vm1314_vm2, %v7948_v62  ;;  %10001 = vmatprep.mubr.msk.f32.mxu1 %vm10413_vm1, %v10412_v9  ;;  %v9184_v62 = vld [vmem:[%s11773_s5 + $0xc0] sm:$0xff] }
0x1d74   : > { %9995 = vmatpush3.msra.mxu0 %v9134_v63  ;;  %9996 = vmatprep.mubr.msk.f32.mxu0 %vm10413_vm1, %v10412_v9  ;;  %v9182_v63 = vld [vmem:[%s11775_s7 + $0x3] ss:$0 sm:$0xff] }
0x1d75   : > { %10004 = vmatprep.subr.mxu0 %v10412_v9  ;;  %10000 = vmatpush3.msra.mxu1 %v9135_v1 }
0x1d76   : > { %10009 = vmatprep.subr.mxu1 %v10412_v9 }
0x1e2e   : > { %v8093_v3 = vpop.f32.mrf.mxu1 }
0x1e2f   : > { %v8020_v4 = vpop.f32.mrf.mxu0  ;;  %10002 = vmatmul.mubr.msk.f32.vlgmr.msra.gmra.mxu1 %vm1314_vm2, %v8093_v3 }
0x1e30   : > { %9997 = vmatmul.mubr.msk.f32.vlgmr.msra.gmra.mxu0 %vm1314_vm2, %v8020_v4  ;;  %v9983_v5 = vpop.f32.mrf.mxu1  ;;  %10010 = vmatpush3.msra.mxu1 %v9137_v2 }
0x1e31   : > { %v9978_v8 = vpop.f32.mrf.mxu0  ;;  %10005 = vmatpush3.msra.mxu0 %v9136_v26  ;;  %10006 = vmatprep.mubr.msk.f32.mxu0 %vm10413_vm1, %v10412_v9 }
0x1e32   : > { %v8239_v10 = vpop.f32.mrf.mxu1  ;;  %10011 = vmatprep.mubr.msk.f32.mxu1 %vm10413_vm1, %v10412_v9  ;;  %10014 = vmatprep.subr.mxu0 %v10412_v9 }
0x1e33   : > { %v8166_v11 = vpop.f32.mrf.mxu0  ;;  %10012 = vmatmul.mubr.msk.f32.vlgmr.msra.gmra.mxu1 %vm1314_vm2, %v8239_v10  ;;  %10025 = vmatprep.subr.mxu1 %v10412_v9 }
0x1e34   : > { %10007 = vmatmul.mubr.msk.f32.vlgmr.msra.gmra.mxu0 %vm1314_vm2, %v8166_v11  ;;  %v9993_v12 = vpop.f32.mrf.mxu1  ;;  %10041 = vmatprep.mubr.msk.f32.mxu1 %vm10413_vm1, %v10412_v9  ;;  %v8672_v11 = vrot.slane %v11412_v42, %v10949_v21 }
0x1e35   : > { %v9988_v13 = vpop.f32.mrf.mxu0  ;;  %10022 = vmatprep.mubr.msk.f32.mxu0 %vm10413_vm1, %v10412_v9  ;;  %10015 = vmatpush3.msra.mxu0 %v9181_v61 }
0x1e36   : > { %10016 = vmatprep.subr.mxu0 %v10412_v9  ;;  %10026 = vmatpush3.msra.mxu1 %v9191_v0 }
0x1e37   : > { %10017 = vmatpush3.msra.mxu0 %v9180_v47  ;;  %10027 = vmatprep.subr.mxu1 %v10412_v9 }
0x1e38   : > { %10018 = vmatprep.subr.mxu0 %v10412_v9  ;;  %10028 = vmatpush3.msra.mxu1 %v9190_v33 }
0x1e39   : > { %10019 = vmatpush3.msra.mxu0 %v9179_v50  ;;  %10029 = vmatprep.subr.mxu1 %v10412_v9 }
0x1e3a   : > { %10020 = vmatprep.subr.mxu0 %v10412_v9  ;;  %10030 = vmatpush3.msra.mxu1 %v9189_v34 }
0x1e3b   : > { %10021 = vmatpush3.msra.mxu0 %v9178_v51  ;;  %10031 = vmatprep.subr.mxu1 %v10412_v9 }
0x1e3c   : > { %10032 = vmatpush3.msra.mxu1 %v9188_v14 }
0x1e3d   : > { %10033 = vmatprep.subr.mxu1 %v10412_v9 }
0x1e3e   : > { %10034 = vmatpush3.msra.mxu1 %v9187_v16 }
0x1e3f   : > { %10035 = vmatprep.subr.mxu1 %v10412_v9 }
0x1e40   : > { %10036 = vmatpush3.msra.mxu1 %v9186_v59 }
0x1e41   : > { %10037 = vmatprep.subr.mxu1 %v10412_v9 }
0x1e42   : > { %10038 = vmatpush3.msra.mxu1 %v9185_v60 }
0x1e43   : > { %10039 = vmatprep.subr.mxu1 %v10412_v9 }
0x1e44   : > { %10040 = vmatpush3.msra.mxu1 %v9184_v62 }
0x1eef   : > { %v8385_v19 = vpop.f32.mrf.mxu1 }
0x1ef0   : > { %v8312_v20 = vpop.f32.mrf.mxu0  ;;  %v8536_v23 = vsel %vm407_vm0, %v8385_v19, 0.0 }
0x1ef1   : > { %v8535_v22 = vsel %vm407_vm0, %v8312_v20, 0.0  ;;  %v10003_v24 = vpop.f32.mrf.mxu1 }
0x1ef2   : > { %v9998_v27 = vpop.f32.mrf.mxu0  ;;  %v8537_v6 = vadd.f32 %v8536_v23, %v8535_v22  ;;  %v8788_v23 = vsel %vm407_vm0, %v11515_v55, -inf }
0x1ef3   : > { %v8531_v28 = vpop.f32.mrf.mxu1 }
0x1ef4   : > { %v8458_v43 = vpop.f32.mrf.mxu0  ;;  %v8540_v36 = vsel %vm407_vm0, %v8531_v28, 0.0  ;;  %v8789_v28 = vrot.slane %v8788_v23, 4 }
0x1ef5   : > { %v8538_v29 = vsel %vm407_vm0, %v8458_v43, 0.0  ;;  %v10013_v30 = vpop.f32.mrf.mxu1 }
0x1ef6   : > { %v8539_v31 = vadd.f32 %v8538_v29, %v8537_v6  ;;  %v10008_v35 = vpop.f32.mrf.mxu0  ;;  %v8790_v29 = vmax.f32 %v8788_v23, %v8789_v28 }
0x1ef8   : > { %v8541_v37 = vadd.f32 %v8540_v36, %v8539_v31  ;;  %v8791_v21 = vrot.slane %v8790_v29, 2 }
0x1efa   : > { %v8546_v18 = vadd.f32 %v8545_v32, %v8541_v37  ;;  %v8792_v30 = vmax.f32 %v8790_v29, %v8791_v21 }
0x1efc   : > { %v11647_v38 = vadd.f32 %v8546_v18, %v11252_v25  ;;  %v8793_v31 = vrot.slane %v8792_v30, 1  ;;  %v8763_v18 = vrot.slane %v11412_v42, %v10976_v48 }
0x1efe   : > { %v8548_v39 = vsel %vm407_vm0, %v11647_v38, 0.0  ;;  %v8794_v32 = vmax.f32 %v8792_v30, %v8793_v31 }
0x1eff   : > { %8549 = vadd.xlane.f32.xlu0 %v8548_v39 }
0x1f88   : > { %v8550_v40 = vpop.xlane.xlu0 %8549 }
0x1f89   : > { %v8551_v41 = vmul.f32 0.03125, %v8550_v40  ;;  %v8768_v40 = vrot.slane %v11412_v42, %v10979_v49  ;;  %v8771_v42 = vsel %vm407_vm0, %v11515_v55, 0.0 }
0x1f8b   : > { %v8552_v44 = vsub.f32 %v11647_v38, %v8551_v41 }
0x1f8d   : > { %v8553_v45 = vmul.f32 %v8552_v44, %v8552_v44 }
0x1f8f   : > { %v8554_v46 = vsel %vm407_vm0, %v8553_v45, 0.0 }
0x1f90   : > { %8555 = vadd.xlane.f32.xlu1 %v8554_v46 }
0x2019   : > { %v8556_v52 = vpop.xlane.xlu1 %8555 }
0x201a   : > { %v8557_v53 = vmul.f32 0.03125, %v8556_v52 }
0x201c   : > { %v8558_v54 = vadd.f32 1e-05, %v8557_v53 }
0x201e   : > { %10213 = vrsqrt.f32 %v8558_v54 }
0x202b   : > { %v10214_v58 = vpop.eup %10213 }
0x202c   : > { %v8560_v56 = vmul.f32 %v10214_v58, %v8552_v44 }
0x202e   : > { %v8565_v15 = vmul.f32 %v8564_v57, %v8560_v56 }
0x2030   : > { %v8570_v17 = vadd.f32 %v8569_v7, %v8565_v15  ;;  %v8772_v15 = vrot.slane %v8771_v42, 4 }
0x2032   : > { %10023 = vmatmul.mubr.msk.f32.vlgmr.msra.gmra.mxu0 %vm407_vm0, %v8570_v17  ;;  %v8773_v17 = vadd.f32 %v8772_v15, %v8771_v42 }
0x2034   : > { %v8774_v0 = vrot.slane %v8773_v17, 2 }
0x2036   : > { %v8775_v33 = vadd.f32 %v8774_v0, %v8773_v17 }
0x2038   : > { %v8776_v34 = vrot.slane %v8775_v33, 1 }
0x203a   : > { %v8777_v14 = vadd.f32 %v8776_v34, %v8775_v33 }
0x203c   : > { %v8779_v59 = vmul.f32 0.125, %v8777_v14 }
0x20f2   : > { %v8651_v1 = vpop.f32.mrf.mxu0 }
0x20f3   : > { %v8652_v2 = vadd.f32 %v9182_v63, %v8651_v1 }
0x20f4   : > { %v10024_v3 = vpop.f32.mrf.mxu0 }
0x20f5   : > { %v8656_v26 = vmul.f32 0.70710677, %v8652_v2  ;;  %v8655_v5 = vmul.f32 0.5, %v8652_v2 }
0x20f7   : > { %10215 = verf.f32 %v8656_v26 }
0x2104   : > { %v10216_v4 = vpop.eup %10215 }
0x2105   : > { %v8658_v8 = vadd.f32 1.0, %v10216_v4 }
0x2107   : > { %v8659_v10 = vmul.f32 %v8658_v8, %v8655_v5 }
0x2109   : > { %10042 = vmatmul.mubr.msk.f32.vlgmr.msra.gmra.mxu1 %vm2384_vm3, %v8659_v10 }
0x21c9   : > { %v8742_v9 = vpop.f32.mrf.mxu1 }
0x21ca   : > { %v8743_v12 = vadd.f32 %v8742_v9, %v8672_v11 }
0x21cb   : > { %v10043_v13 = vpop.f32.mrf.mxu1 }
0x21cc   : > { %v8746_v19 = vadd.f32 %v8743_v12, %v11647_v38 }
0x21ce   : > { %v8747_v20 = vsel %vm407_vm0, %v8746_v19, 0.0 }
0x21cf   : > { %8748 = vadd.xlane.f32.xlu0 %v8747_v20 }
0x2258   : > { %v8749_v22 = vpop.xlane.xlu0 %8748 }
0x2259   : > { %v8750_v24 = vmul.f32 0.03125, %v8749_v22 }
0x225b   : > { %v8751_v27 = vsub.f32 %v8746_v19, %v8750_v24 }
0x225d   : > { %v8752_v6 = vmul.f32 %v8751_v27, %v8751_v27 }
0x225f   : > { %v8753_v43 = vsel %vm407_vm0, %v8752_v6, 0.0 }
0x2260   : > { %8754 = vadd.xlane.f32.xlu1 %v8753_v43 }
0x2271   : > { %8807 = vrot.lane.b32.xlu1 %v8794_v32, %s10414_s29 }
0x22e9   : > { %v8755_v35 = vpop.xlane.xlu1 %8754 }
0x22ea   : > { %v8756_v36 = vmul.f32 0.03125, %v8755_v35 }
0x22ec   : > { %v8757_v37 = vadd.f32 1e-05, %v8756_v36 }
0x22ed   : > { %v8808_v16 = vpop.permute.xlu1 %8807 }
0x22ee   : > { %10217 = vrsqrt.f32 %v8757_v37 }
0x22fb   : > { %v10218_v38 = vpop.eup %10217 }
0x22fc   : > { %v8759_v39 = vmul.f32 %v10218_v38, %v8751_v27 }
0x22fe   : > { %v8764_v41 = vmul.f32 %v8763_v18, %v8759_v39 }
0x2300   : > { %v8769_v44 = vadd.f32 %v8768_v40, %v8764_v41 }
0x2302   : > { %v8770_v45 = vadd.f32 %v8769_v44, %v11252_v25 }
0x2304   : > { %v8795_v46 = vsel %vm407_vm0, %v8770_v45, -inf  ;;  %v8780_v61 = vsel %vm407_vm0, %v8770_v45, 0.0 }
0x2305   : > { %v8796_v47 = vrot.slane %v8795_v46, 4  ;;  %v8781_v50 = vrot.slane %v8780_v61, 4 }
0x2307   : > { %v8797_v51 = vmax.f32 %v8795_v46, %v8796_v47  ;;  %v8782_v52 = vadd.f32 %v8781_v50, %v8780_v61 }
0x2309   : > { %v8798_v53 = vrot.slane %v8797_v51, 2  ;;  %v8783_v54 = vrot.slane %v8782_v52, 2 }
0x230b   : > { %v8799_v48 = vmax.f32 %v8797_v51, %v8798_v53  ;;  %v8784_v57 = vadd.f32 %v8783_v54, %v8782_v52 }
0x230d   : > { %v8800_v58 = vrot.slane %v8799_v48, 1  ;;  %v8785_v56 = vrot.slane %v8784_v57, 1 }
0x230f   : > { %v8801_v7 = vmax.f32 %v8799_v48, %v8800_v58  ;;  %v8786_v49 = vadd.f32 %v8785_v56, %v8784_v57 }
0x2311   : > { %8811 = vrot.lane.b32.xlu1 %v8801_v7, %s10415_s10  ;;  %v8787_v25 = vmul.f32 0.125, %v8786_v49 }
0x2313   : > { %8803 = vrot.lane.b32.xlu0 %v8787_v25, %s10416_s19 }
0x2383   : > { %v8812_v63 = vpop.permute.xlu1 %8811 }
0x2385   : > { %v8804_v60 = vpop.permute.xlu0 %8803 }
0x2386   : > { %v8814_v62 = vsel %vm407_vm0, %v8779_v59, %v8804_v60 }
0x2387   : > { %v8815_v55 = vsel %vm2384_vm3, %v8814_v62, %v8808_v16 }
0x2388   : > { %v8817_v1 = vsel %vm8816_vm4, %v8815_v55, %v8812_v63 }
0x2389   : > { %8818 = vst [vmem:[%s385_s20] sm:$0x1] %v8817_v1 }
0x238a   : > { %10341 = shalt.err (!%p10338_p4)
}
0x238b   : > { %s10342_s14 = scalar_lea.hbm %s11731_s25, 16  ;;  %s10346_s26 = scalar_lea.hbm %s11776_s8, 32 }
0x238c   : > { %p10343_p10 = scmp.ne.s32.totalorder %s11731_s25, %s10342_s14  ;;  %p10347_p11 = scmp.lt.s32.totalorder %s11731_s25, %s11776_s8 }
0x238d   : > { %p10348_p2 = scmp.lt.s32.totalorder %s10346_s26, %s10342_s14 }
0x238e   : > { %p10344_p0 = pnand %p10343_p10, %p11804_p7 }
0x238f   : > { %p10349_p6 = por %p10348_p2, %p10347_p11 }
0x2390   : > { %p10345_p8 = pneg %p10344_p0 }
0x2392   : > { %p10350_p12 = pnand %p10349_p6, %p10345_p8 }
0x2394   : > { %10353 = shalt.err (!%p10350_p12)
}
0x2395   : > { %10056 = dma.vmem_to_hbm [thread:$0]  (%p11804_p7), %s8833_s15, 16, %s11731_s25, %s8820_s13  }
0x2396 PF: > { %s8844_s10 = sand.u32 1, %s10392_s27   ;;  %p11805_p9 = scmp.ne.s32.totalorder %s11788_s12, 0 }
0x2397   : > { %p11806_p13 = scmp.ge.s32.totalorder %s10404_s30, 2  ;;  %s8845_s19 = scalar_lea.sflag [#allocation4], %s8844_s10 }
0x2399   : > { %p10073_p5 = pnand %p11806_p13, %p11805_p9 }
0x239b   : > { %p10074_p1 = pneg %p10073_p5 }
0x239d   : > { %10387 = dma.done.wait (%p10074_p1), %s8845_s19, 16  }
0x239e   : > { %10389 = vsyncadd (%p10074_p1), %s8845_s19, 4294967280  ;;  %s11807_s30 = sld [smem:[#allocation17_spill]]  ;;  %s11810_s27 = smov %s10396_s28 }
0x239f   : > { %s11808_s17 = sld [smem:[#allocation16_spill]] }
0x23a0   : > { %s11809_s29 = sld [smem:[#allocation18_spill]] }
0x23a4   : > { %p25_p3 = scmp.ge.s32.totalorder %s11807_s30, 4  }
0x23a5   : > { %s11811_s28 = smov %s11808_s17 }
0x23a6   :  { %27 = sbr.rel (!%p25_p3) target bundleno = 11 (0xb), region = 140 }
0x23ab   :  { %8849 = vsyncpa [#allocation3], 1 }
0x23ac   :  { %8851 = vsyncpa [#allocation3 + $0x1], 1 }
0x23ad   :  { %8852 = vsyncpa [#allocation6], 1 }
0x23ae   :  { %8854 = vsyncpa [#allocation6 + $0x1], 1 }
0x23af   :  { %8855 = vsyncpa [#allocation9], 1 }
0x23b0   :  { %8856 = vsyncpa [#allocation4], 1 }
0x23b1   :  { %8858 = vsyncpa [#allocation4 + $0x1], 1 }

</bundles_post_ra>
